<compile_context>
chip_gen: v5e
topology: v5e:2x2
jax: 0.10.0
libtpu: 0.0.40
codegen_flags: <defaults>
</compile_context>

<pallas_src>
import jax
import jax.numpy as jnp
from jax import lax
from jax.experimental import pallas as pl
from jax.experimental.pallas import tpu as pltpu

# ----------------------------- configuration ------------------------------
VOCAB = 100
TYPE_VOCAB = 2
MAX_LEN = 256          # same constant as the PyTorch script
HIDDEN = 128           # scaled-down 768
N_HEADS = 2
HEAD_DIM = HIDDEN // N_HEADS
INTERMEDIATE = 512     # scaled-down 3072
N_LAYERS = 2
LABEL_LENGTH = 3
CLS_PAD = 128          # lane-dense padded classifier width (slice [:, :LABEL_LENGTH] outside)
ROW_PAD = 8            # sublane-padded logits rows per batch element (row 0 = CLS token)
LN_EPS = 1e-12
DROPOUT_N = 0.2        # forward-pass (eval) semantics => identity
NEG_INF = -1e9


# ------------------------------ math helpers -------------------------------
def _gelu(y):
    # TODO(synk): BERT reference uses exact erf-GELU; tanh approximation used for TPU lowering.
    return 0.5 * y * (1.0 + jnp.tanh(0.7978845608028654 * (y + 0.044715 * y * y * y)))


def _ln(y, g, b):
    # one-pass statistics: var = E[y^2] - E[y]^2  (fewer elementwise passes; helps v5e)
    mu = jnp.mean(y, axis=-1, keepdims=True)
    ms = jnp.mean(y * y, axis=-1, keepdims=True)
    var = ms - mu * mu
    return (y - mu) * lax.rsqrt(var + LN_EPS) * g + b


# --------------------------- fused forward kernel ---------------------------
def _bert_fwd_kernel(x_ref, mask_ref,
                     emb_g_ref, emb_b_ref,
                     wq_ref, bq_ref, wk_ref, bk_ref, wv_ref, bv_ref,
                     wo_ref, bo_ref, ln1_g_ref, ln1_b_ref,
                     wi_ref, bi_ref, wf_ref, bf_ref, ln2_g_ref, ln2_b_ref,
                     pool_w_ref, pool_b_ref, cls_w_ref, cls_b_ref,
                     o_ref):
    """One batch element per grid step: embedding-LN -> N_LAYERS encoder layers ->
    pooler tanh -> dropout (eval identity) -> padded classifier logits."""
    addm = mask_ref[0]                                                    # (1, S) additive mask
    x = _ln(x_ref[0].astype(jnp.float32), emb_g_ref[...], emb_b_ref[...])  # (S, H) f32
    # (embedding dropout: identity in eval mode)

    for l in range(N_LAYERS):                                             # static unroll
        xb = x.astype(jnp.bfloat16)

        # ---- multi-head self-attention: per-head weights live on leading ref axes ----
        attn = None
        for h in range(N_HEADS):                                          # static unroll
            # 1/sqrt(HEAD_DIM) is folded into wq/bq at init time.
            q = jnp.dot(xb, wq_ref[l, h], preferred_element_type=jnp.float32) + bq_ref[l, h]
            k = jnp.dot(xb, wk_ref[l, h], preferred_element_type=jnp.float32) + bk_ref[l, h]
            v = jnp.dot(xb, wv_ref[l, h], preferred_element_type=jnp.float32) + bv_ref[l, h]
            # scores: contract the head dim of both operands (no explicit transpose)
            s = lax.dot_general(q.astype(jnp.bfloat16), k.astype(jnp.bfloat16),
                                (((1,), (1,)), ((), ())),
                                preferred_element_type=jnp.float32) + addm   # (S, S)
            s = s - jnp.max(s, axis=-1, keepdims=True)
            p = jnp.exp(s)
            p = p * pl.reciprocal(jnp.sum(p, axis=-1, keepdims=True), approx=True)
            ctx = jnp.dot(p.astype(jnp.bfloat16), v.astype(jnp.bfloat16),
                          preferred_element_type=jnp.float32)                # (S, HEAD_DIM)
            # accumulate straight into the output projection (no lane-concat of heads)
            part = jnp.dot(ctx.astype(jnp.bfloat16), wo_ref[l, h],
                           preferred_element_type=jnp.float32)               # (S, H)
            attn = part if attn is None else attn + part
        y = attn + bo_ref[l] + x                                           # out bias + residual
        x = _ln(y, ln1_g_ref[l], ln1_b_ref[l])

        # ---- feed-forward ----
        xb2 = x.astype(jnp.bfloat16)
        hdn = jnp.dot(xb2, wi_ref[l], preferred_element_type=jnp.float32) + bi_ref[l]
        hdn = _gelu(hdn)                                                   # f32 elementwise
        y = jnp.dot(hdn.astype(jnp.bfloat16), wf_ref[l],
                    preferred_element_type=jnp.float32) + bf_ref[l] + x    # + residual
        x = _ln(y, ln2_g_ref[l], ln2_b_ref[l])

    # ---- pooler tanh + dropout (eval identity) + classifier ----
    # Process the first ROW_PAD rows (row 0 is the [CLS] token) so the matmul keeps a full
    # 8-sublane M dim; only row 0 is consumed outside.
    cls_rows = x[0:ROW_PAD, :]                                             # (8, H)
    pooled = jnp.tanh(jnp.dot(cls_rows.astype(jnp.bfloat16), pool_w_ref[...],
                              preferred_element_type=jnp.float32) + pool_b_ref[...])
    # TODO(synk): stochastic dropout (training mode) not modeled; eval-mode identity used.
    logits = jnp.dot(pooled.astype(jnp.bfloat16), cls_w_ref[...],
                     preferred_element_type=jnp.float32) + cls_b_ref[...]  # (8, CLS_PAD)
    o_ref[0] = logits.astype(o_ref.dtype)


def _resident_spec(arr):
    """Full-array block with a constant index_map -> fetched once, VMEM-resident across grid."""
    nd = arr.ndim
    return pl.BlockSpec(arr.shape, lambda i, _nd=nd: (0,) * _nd)


# ------------------------------ parameters ---------------------------------
def init_params(key):
    def nrm(k, shape, scale=0.02):
        return scale * jax.random.normal(k, shape, dtype=jnp.float32)

    keys = iter(jax.random.split(key, 5 + 6 * N_LAYERS))
    att_scale = 1.0 / (HEAD_DIM ** 0.5)

    def split_cols(w):   # (H, N_HEADS*HEAD_DIM) -> (N_HEADS, H, HEAD_DIM)
        return jnp.stack([w[:, h * HEAD_DIM:(h + 1) * HEAD_DIM] for h in range(N_HEADS)], 0)

    def split_rows(w):   # (N_HEADS*HEAD_DIM, H) -> (N_HEADS, HEAD_DIM, H)
        return jnp.stack([w[h * HEAD_DIM:(h + 1) * HEAD_DIM, :] for h in range(N_HEADS)], 0)

    params = {
        "word_emb": nrm(next(keys), (VOCAB, HIDDEN)),
        "pos_emb": nrm(next(keys), (MAX_LEN, HIDDEN)),
        "type_emb": nrm(next(keys), (TYPE_VOCAB, HIDDEN)),
        "emb_ln_g": jnp.ones((1, HIDDEN), jnp.float32),
        "emb_ln_b": jnp.zeros((1, HIDDEN), jnp.float32),
        "pool_w": nrm(next(keys), (HIDDEN, HIDDEN)).astype(jnp.bfloat16),
        "pool_b": jnp.zeros((1, HIDDEN), jnp.float32),
    }
    cls_w = nrm(next(keys), (HIDDEN, LABEL_LENGTH))
    params["cls_w_pad"] = (jnp.zeros((HIDDEN, CLS_PAD), jnp.float32)
                           .at[:, :LABEL_LENGTH].set(cls_w)).astype(jnp.bfloat16)
    params["cls_b_pad"] = jnp.zeros((1, CLS_PAD), jnp.float32)

    wq, bq, wk, bk, wv, bv = [], [], [], [], [], []
    wo, bo, ln1g, ln1b = [], [], [], []
    wi, bi, wf, bf, ln2g, ln2b = [], [], [], [], [], []
    for _ in range(N_LAYERS):
        # fold the 1/sqrt(HEAD_DIM) attention scale into the query projection
        wq.append(split_cols(nrm(next(keys), (HIDDEN, HIDDEN)) * att_scale))
        wk.append(split_cols(nrm(next(keys), (HIDDEN, HIDDEN))))
        wv.append(split_cols(nrm(next(keys), (HIDDEN, HIDDEN))))
        wo.append(split_rows(nrm(next(keys), (HIDDEN, HIDDEN))))
        wi.append(nrm(next(keys), (HIDDEN, INTERMEDIATE)))
        wf.append(nrm(next(keys), (INTERMEDIATE, HIDDEN)))
        bq.append(jnp.zeros((N_HEADS, 1, HEAD_DIM), jnp.float32))  # already includes att_scale
        bk.append(jnp.zeros((N_HEADS, 1, HEAD_DIM), jnp.float32))
        bv.append(jnp.zeros((N_HEADS, 1, HEAD_DIM), jnp.float32))
        bo.append(jnp.zeros((1, HIDDEN), jnp.float32))
        ln1g.append(jnp.ones((1, HIDDEN), jnp.float32))
        ln1b.append(jnp.zeros((1, HIDDEN), jnp.float32))
        bi.append(jnp.zeros((1, INTERMEDIATE), jnp.float32))
        bf.append(jnp.zeros((1, HIDDEN), jnp.float32))
        ln2g.append(jnp.ones((1, HIDDEN), jnp.float32))
        ln2b.append(jnp.zeros((1, HIDDEN), jnp.float32))

    stack_bf16 = lambda xs: jnp.stack(xs, 0).astype(jnp.bfloat16)
    stack_f32 = lambda xs: jnp.stack(xs, 0)
    params.update({
        "wq": stack_bf16(wq), "bq": stack_f32(bq),      # (L, NH, H, HD) / (L, NH, 1, HD)
        "wk": stack_bf16(wk), "bk": stack_f32(bk),
        "wv": stack_bf16(wv), "bv": stack_f32(bv),
        "wo": stack_bf16(wo), "bo": stack_f32(bo),      # (L, NH, HD, H) / (L, 1, H)
        "ln1_g": stack_f32(ln1g), "ln1_b": stack_f32(ln1b),
        "wi": stack_bf16(wi), "bi": stack_f32(bi),      # (L, H, I) / (L, 1, I)
        "wf": stack_bf16(wf), "bf": stack_f32(bf),      # (L, I, H) / (L, 1, H)
        "ln2_g": stack_f32(ln2g), "ln2_b": stack_f32(ln2b),
    })
    return params


# ------------------------------ forward pass --------------------------------
def bert_class_forward(params, input_ids, attn_mask, token_type_ids):
    b, s = input_ids.shape
    # else-branch of BERTClass.forward (seq_len <= MAX_LEN).
    # TODO(synk): seq_len > MAX_LEN sub-sequence split + pooled-concat branch not implemented.
    assert ROW_PAD <= s <= MAX_LEN

    # ---- embeddings (gathers in plain JAX; LayerNorm happens inside the fused kernel) ----
    emb = (jnp.take(params["word_emb"], input_ids, axis=0)
           + params["pos_emb"][None, :s, :]
           + jnp.take(params["type_emb"], token_type_ids, axis=0))          # (B, S, H) f32

    # additive attention mask per batch element; broadcast over heads & query rows in-kernel
    mask_add = ((1.0 - attn_mask.astype(jnp.float32)) * NEG_INF).reshape(b, 1, s)

    weights = (params["emb_ln_g"], params["emb_ln_b"],
               params["wq"], params["bq"], params["wk"], params["bk"],
               params["wv"], params["bv"], params["wo"], params["bo"],
               params["ln1_g"], params["ln1_b"],
               params["wi"], params["bi"], params["wf"], params["bf"],
               params["ln2_g"], params["ln2_b"],
               params["pool_w"], params["pool_b"],
               params["cls_w_pad"], params["cls_b_pad"])

    out = pl.pallas_call(
        _bert_fwd_kernel,
        out_shape=jax.ShapeDtypeStruct((b, ROW_PAD, CLS_PAD), jnp.float32),
        grid=(b,),
        in_specs=[pl.BlockSpec((1, s, HIDDEN), lambda i: (i, 0, 0)),
                  pl.BlockSpec((1, 1, s), lambda i: (i, 0, 0))]
                 + [_resident_spec(w) for w in weights],
        out_specs=pl.BlockSpec((1, ROW_PAD, CLS_PAD), lambda i: (i, 0, 0)),
        # batch axis; on v7x consider pltpu.CORE_PARALLEL / pl.core_map for explicit 2-TC split
        compiler_params=pltpu.CompilerParams(dimension_semantics=("parallel",)),
    )(emb, mask_add, *weights)

    return out[:, 0, :LABEL_LENGTH]


# ---------------------------------- main ------------------------------------
if __name__ == "__main__":
    key = jax.random.PRNGKey(0)
    pkey, ikey = jax.random.split(key)
    params = init_params(pkey)

    B, S = 2, 8
    input_ids = jax.random.randint(ikey, (B, S), 0, VOCAB, dtype=jnp.int32)
    attn_mask = jnp.ones((B, S), dtype=jnp.int32)
    token_type_ids = jnp.zeros((B, S), dtype=jnp.int32)

    fwd = jax.jit(bert_class_forward)
    logits = jax.block_until_ready(fwd(params, input_ids, attn_mask, token_type_ids))
    assert logits.shape == (B, LABEL_LENGTH) and logits.dtype == jnp.float32
    print("KERNEL_OK")
</pallas_src>

<mosaic_0001>
module attributes {stable_mosaic.version = 11 : i64} {
  func.func @_bert_fwd_kernel(%arg0: i32, %arg1: memref<1x8x128xf32, #tpu.memory_space<vmem>>, %arg2: memref<1x1x8xf32, #tpu.memory_space<vmem>>, %arg3: memref<1x128xf32, #tpu.memory_space<vmem>>, %arg4: memref<1x128xf32, #tpu.memory_space<vmem>>, %arg5: memref<2x2x128x64xbf16, #tpu.memory_space<vmem>>, %arg6: memref<2x2x1x64xf32, #tpu.memory_space<vmem>>, %arg7: memref<2x2x128x64xbf16, #tpu.memory_space<vmem>>, %arg8: memref<2x2x1x64xf32, #tpu.memory_space<vmem>>, %arg9: memref<2x2x128x64xbf16, #tpu.memory_space<vmem>>, %arg10: memref<2x2x1x64xf32, #tpu.memory_space<vmem>>, %arg11: memref<2x2x64x128xbf16, #tpu.memory_space<vmem>>, %arg12: memref<2x1x128xf32, #tpu.memory_space<vmem>>, %arg13: memref<2x1x128xf32, #tpu.memory_space<vmem>>, %arg14: memref<2x1x128xf32, #tpu.memory_space<vmem>>, %arg15: memref<2x128x512xbf16, #tpu.memory_space<vmem>>, %arg16: memref<2x1x512xf32, #tpu.memory_space<vmem>>, %arg17: memref<2x512x128xbf16, #tpu.memory_space<vmem>>, %arg18: memref<2x1x128xf32, #tpu.memory_space<vmem>>, %arg19: memref<2x1x128xf32, #tpu.memory_space<vmem>>, %arg20: memref<2x1x128xf32, #tpu.memory_space<vmem>>, %arg21: memref<128x128xbf16, #tpu.memory_space<vmem>>, %arg22: memref<1x128xf32, #tpu.memory_space<vmem>>, %arg23: memref<128x128xbf16, #tpu.memory_space<vmem>>, %arg24: memref<1x128xf32, #tpu.memory_space<vmem>>, %arg25: memref<1x8x128xf32, #tpu.memory_space<vmem>>) attributes {dimension_semantics = [#tpu.dimension_semantics<parallel>], iteration_bounds = array<i64: 2>, scalar_prefetch = 0 : i64, scratch_operands = 0 : i64, tpu.core_type = #tpu.core_type<tc>, window_params = [{transform_indices = @transform_0, window_bounds = array<i64: 1, 8, 128>}, {transform_indices = @transform_1, window_bounds = array<i64: 1, 1, 8>}, {pipeline_mode = #tpu.pipeline_mode<synchronous>, transform_indices = @transform_2, window_bounds = array<i64: 1, 128>}, {pipeline_mode = #tpu.pipeline_mode<synchronous>, transform_indices = @transform_3, window_bounds = array<i64: 1, 128>}, {pipeline_mode = #tpu.pipeline_mode<synchronous>, transform_indices = @transform_4, window_bounds = array<i64: 2, 2, 128, 64>}, {pipeline_mode = #tpu.pipeline_mode<synchronous>, transform_indices = @transform_5, window_bounds = array<i64: 2, 2, 1, 64>}, {pipeline_mode = #tpu.pipeline_mode<synchronous>, transform_indices = @transform_6, window_bounds = array<i64: 2, 2, 128, 64>}, {pipeline_mode = #tpu.pipeline_mode<synchronous>, transform_indices = @transform_7, window_bounds = array<i64: 2, 2, 1, 64>}, {pipeline_mode = #tpu.pipeline_mode<synchronous>, transform_indices = @transform_8, window_bounds = array<i64: 2, 2, 128, 64>}, {pipeline_mode = #tpu.pipeline_mode<synchronous>, transform_indices = @transform_9, window_bounds = array<i64: 2, 2, 1, 64>}, {pipeline_mode = #tpu.pipeline_mode<synchronous>, transform_indices = @transform_10, window_bounds = array<i64: 2, 2, 64, 128>}, {pipeline_mode = #tpu.pipeline_mode<synchronous>, transform_indices = @transform_11, window_bounds = array<i64: 2, 1, 128>}, {pipeline_mode = #tpu.pipeline_mode<synchronous>, transform_indices = @transform_12, window_bounds = array<i64: 2, 1, 128>}, {pipeline_mode = #tpu.pipeline_mode<synchronous>, transform_indices = @transform_13, window_bounds = array<i64: 2, 1, 128>}, {pipeline_mode = #tpu.pipeline_mode<synchronous>, transform_indices = @transform_14, window_bounds = array<i64: 2, 128, 512>}, {pipeline_mode = #tpu.pipeline_mode<synchronous>, transform_indices = @transform_15, window_bounds = array<i64: 2, 1, 512>}, {pipeline_mode = #tpu.pipeline_mode<synchronous>, transform_indices = @transform_16, window_bounds = array<i64: 2, 512, 128>}, {pipeline_mode = #tpu.pipeline_mode<synchronous>, transform_indices = @transform_17, window_bounds = array<i64: 2, 1, 128>}, {pipeline_mode = #tpu.pipeline_mode<synchronous>, transform_indices = @transform_18, window_bounds = array<i64: 2, 1, 128>}, {pipeline_mode = #tpu.pipeline_mode<synchronous>, transform_indices = @transform_19, window_bounds = array<i64: 2, 1, 128>}, {pipeline_mode = #tpu.pipeline_mode<synchronous>, transform_indices = @transform_20, window_bounds = array<i64: 128, 128>}, {pipeline_mode = #tpu.pipeline_mode<synchronous>, transform_indices = @transform_21, window_bounds = array<i64: 1, 128>}, {pipeline_mode = #tpu.pipeline_mode<synchronous>, transform_indices = @transform_22, window_bounds = array<i64: 128, 128>}, {pipeline_mode = #tpu.pipeline_mode<synchronous>, transform_indices = @transform_23, window_bounds = array<i64: 1, 128>}, {transform_indices = @transform_24, window_bounds = array<i64: 1, 8, 128>}]} {
    %c0 = arith.constant 0 : index
    %c0_0 = arith.constant 0 : index
    %c0_1 = arith.constant 0 : index
    %0 = vector.load %arg2[%c0, %c0_0, %c0_1] : memref<1x1x8xf32, #tpu.memory_space<vmem>>, vector<1x1x8xf32>
    %1 = vector.shape_cast %0 : vector<1x1x8xf32> to vector<1x8xf32>
    %c0_2 = arith.constant 0 : index
    %c0_3 = arith.constant 0 : index
    %c0_4 = arith.constant 0 : index
    %2 = vector.load %arg1[%c0_2, %c0_3, %c0_4] : memref<1x8x128xf32, #tpu.memory_space<vmem>>, vector<1x8x128xf32>
    %3 = vector.shape_cast %2 : vector<1x8x128xf32> to vector<8x128xf32>
    %c0_5 = arith.constant 0 : index
    %c0_6 = arith.constant 0 : index
    %4 = vector.load %arg3[%c0_5, %c0_6] : memref<1x128xf32, #tpu.memory_space<vmem>>, vector<1x128xf32>
    %c0_7 = arith.constant 0 : index
    %c0_8 = arith.constant 0 : index
    %5 = vector.load %arg4[%c0_7, %c0_8] : memref<1x128xf32, #tpu.memory_space<vmem>>, vector<1x128xf32>
    %cst = arith.constant dense<0.000000e+00> : vector<8xf32>
    %6 = vector.multi_reduction <add>, %3, %cst [1] : vector<8x128xf32> to vector<8xf32>
    %7 = vector.shape_cast %6 : vector<8xf32> to vector<8x1xf32>
    %cst_9 = arith.constant 1.280000e+02 : f32
    %8 = vector.broadcast %cst_9 : f32 to vector<8x1xf32>
    %9 = arith.divf %7, %8 : vector<8x1xf32>
    %10 = arith.mulf %3, %3 : vector<8x128xf32>
    %cst_10 = arith.constant dense<0.000000e+00> : vector<8xf32>
    %11 = vector.multi_reduction <add>, %10, %cst_10 [1] : vector<8x128xf32> to vector<8xf32>
    %12 = vector.shape_cast %11 : vector<8xf32> to vector<8x1xf32>
    %cst_11 = arith.constant 1.280000e+02 : f32
    %13 = vector.broadcast %cst_11 : f32 to vector<8x1xf32>
    %14 = arith.divf %12, %13 : vector<8x1xf32>
    %15 = arith.mulf %9, %9 : vector<8x1xf32>
    %16 = arith.subf %14, %15 : vector<8x1xf32>
    %17 = vector.broadcast %9 : vector<8x1xf32> to vector<8x128xf32>
    %18 = arith.subf %3, %17 : vector<8x128xf32>
    %cst_12 = arith.constant 9.99999996E-13 : f32
    %19 = vector.broadcast %cst_12 : f32 to vector<8x1xf32>
    %20 = arith.addf %16, %19 : vector<8x1xf32>
    %21 = math.rsqrt %20 : vector<8x1xf32>
    %22 = vector.broadcast %21 : vector<8x1xf32> to vector<8x128xf32>
    %23 = arith.mulf %18, %22 : vector<8x128xf32>
    %24 = vector.broadcast %4 : vector<1x128xf32> to vector<8x128xf32>
    %25 = arith.mulf %23, %24 : vector<8x128xf32>
    %26 = vector.broadcast %5 : vector<1x128xf32> to vector<8x128xf32>
    %27 = arith.addf %25, %26 : vector<8x128xf32>
    %28 = arith.truncf %27 : vector<8x128xf32> to vector<8x128xbf16>
    %c0_13 = arith.constant 0 : index
    %c0_14 = arith.constant 0 : index
    %c0_15 = arith.constant 0 : index
    %c0_16 = arith.constant 0 : index
    %29 = vector.load %arg5[%c0_13, %c0_14, %c0_15, %c0_16] : memref<2x2x128x64xbf16, #tpu.memory_space<vmem>>, vector<1x1x128x64xbf16>
    %30 = vector.shape_cast %29 : vector<1x1x128x64xbf16> to vector<128x64xbf16>
    %cst_17 = arith.constant dense<0.000000e+00> : vector<8x64xf32>
    %31 = tpu.matmul %28, %30, %cst_17 {dimension_numbers = #tpu.dot_dimension_numbers<[1], [0], [0], [1], [0, 0, 1, 1], [], []>} : vector<8x128xbf16>, vector<128x64xbf16>, vector<8x64xf32> -> vector<8x64xf32>
    %c0_18 = arith.constant 0 : index
    %c0_19 = arith.constant 0 : index
    %c0_20 = arith.constant 0 : index
    %c0_21 = arith.constant 0 : index
    %32 = vector.load %arg6[%c0_18, %c0_19, %c0_20, %c0_21] : memref<2x2x1x64xf32, #tpu.memory_space<vmem>>, vector<1x1x1x64xf32>
    %33 = vector.shape_cast %32 : vector<1x1x1x64xf32> to vector<1x64xf32>
    %34 = vector.broadcast %33 : vector<1x64xf32> to vector<8x64xf32>
    %35 = arith.addf %31, %34 : vector<8x64xf32>
    %c0_22 = arith.constant 0 : index
    %c0_23 = arith.constant 0 : index
    %c0_24 = arith.constant 0 : index
    %c0_25 = arith.constant 0 : index
    %36 = vector.load %arg7[%c0_22, %c0_23, %c0_24, %c0_25] : memref<2x2x128x64xbf16, #tpu.memory_space<vmem>>, vector<1x1x128x64xbf16>
    %37 = vector.shape_cast %36 : vector<1x1x128x64xbf16> to vector<128x64xbf16>
    %cst_26 = arith.constant dense<0.000000e+00> : vector<8x64xf32>
    %38 = tpu.matmul %28, %37, %cst_26 {dimension_numbers = #tpu.dot_dimension_numbers<[1], [0], [0], [1], [0, 0, 1, 1], [], []>} : vector<8x128xbf16>, vector<128x64xbf16>, vector<8x64xf32> -> vector<8x64xf32>
    %c0_27 = arith.constant 0 : index
    %c0_28 = arith.constant 0 : index
    %c0_29 = arith.constant 0 : index
    %c0_30 = arith.constant 0 : index
    %39 = vector.load %arg8[%c0_27, %c0_28, %c0_29, %c0_30] : memref<2x2x1x64xf32, #tpu.memory_space<vmem>>, vector<1x1x1x64xf32>
    %40 = vector.shape_cast %39 : vector<1x1x1x64xf32> to vector<1x64xf32>
    %41 = vector.broadcast %40 : vector<1x64xf32> to vector<8x64xf32>
    %42 = arith.addf %38, %41 : vector<8x64xf32>
    %c0_31 = arith.constant 0 : index
    %c0_32 = arith.constant 0 : index
    %c0_33 = arith.constant 0 : index
    %c0_34 = arith.constant 0 : index
    %43 = vector.load %arg9[%c0_31, %c0_32, %c0_33, %c0_34] : memref<2x2x128x64xbf16, #tpu.memory_space<vmem>>, vector<1x1x128x64xbf16>
    %44 = vector.shape_cast %43 : vector<1x1x128x64xbf16> to vector<128x64xbf16>
    %cst_35 = arith.constant dense<0.000000e+00> : vector<8x64xf32>
    %45 = tpu.matmul %28, %44, %cst_35 {dimension_numbers = #tpu.dot_dimension_numbers<[1], [0], [0], [1], [0, 0, 1, 1], [], []>} : vector<8x128xbf16>, vector<128x64xbf16>, vector<8x64xf32> -> vector<8x64xf32>
    %c0_36 = arith.constant 0 : index
    %c0_37 = arith.constant 0 : index
    %c0_38 = arith.constant 0 : index
    %c0_39 = arith.constant 0 : index
    %46 = vector.load %arg10[%c0_36, %c0_37, %c0_38, %c0_39] : memref<2x2x1x64xf32, #tpu.memory_space<vmem>>, vector<1x1x1x64xf32>
    %47 = vector.shape_cast %46 : vector<1x1x1x64xf32> to vector<1x64xf32>
    %48 = vector.broadcast %47 : vector<1x64xf32> to vector<8x64xf32>
    %49 = arith.addf %45, %48 : vector<8x64xf32>
    %50 = arith.truncf %35 : vector<8x64xf32> to vector<8x64xbf16>
    %51 = arith.truncf %42 : vector<8x64xf32> to vector<8x64xbf16>
    %cst_40 = arith.constant dense<0.000000e+00> : vector<8x8xf32>
    %52 = tpu.matmul %50, %51, %cst_40 {dimension_numbers = #tpu.dot_dimension_numbers<[1], [1], [0], [0], [0, 0, 1, 0], [], []>} : vector<8x64xbf16>, vector<8x64xbf16>, vector<8x8xf32> -> vector<8x8xf32>
    %53 = vector.broadcast %1 : vector<1x8xf32> to vector<8x8xf32>
    %54 = arith.addf %52, %53 : vector<8x8xf32>
    %cst_41 = arith.constant dense<0xFF800000> : vector<8xf32>
    %55 = vector.multi_reduction <maximumf>, %54, %cst_41 [1] : vector<8x8xf32> to vector<8xf32>
    %56 = vector.shape_cast %55 : vector<8xf32> to vector<8x1xf32>
    %57 = vector.broadcast %56 : vector<8x1xf32> to vector<8x8xf32>
    %58 = arith.subf %54, %57 : vector<8x8xf32>
    %59 = math.exp %58 : vector<8x8xf32>
    %cst_42 = arith.constant dense<0.000000e+00> : vector<8xf32>
    %60 = vector.multi_reduction <add>, %59, %cst_42 [1] : vector<8x8xf32> to vector<8xf32>
    %61 = vector.shape_cast %60 : vector<8xf32> to vector<8x1xf32>
    %62 = tpu.reciprocal %61 {approx = true} : vector<8x1xf32> -> vector<8x1xf32>
    %63 = vector.broadcast %62 : vector<8x1xf32> to vector<8x8xf32>
    %64 = arith.mulf %59, %63 : vector<8x8xf32>
    %65 = arith.truncf %64 : vector<8x8xf32> to vector<8x8xbf16>
    %66 = arith.truncf %49 : vector<8x64xf32> to vector<8x64xbf16>
    %cst_43 = arith.constant dense<0.000000e+00> : vector<8x64xf32>
    %67 = tpu.matmul %65, %66, %cst_43 {dimension_numbers = #tpu.dot_dimension_numbers<[1], [0], [0], [1], [0, 0, 1, 1], [], []>} : vector<8x8xbf16>, vector<8x64xbf16>, vector<8x64xf32> -> vector<8x64xf32>
    %68 = arith.truncf %67 : vector<8x64xf32> to vector<8x64xbf16>
    %c0_44 = arith.constant 0 : index
    %c0_45 = arith.constant 0 : index
    %c0_46 = arith.constant 0 : index
    %c0_47 = arith.constant 0 : index
    %69 = vector.load %arg11[%c0_44, %c0_45, %c0_46, %c0_47] : memref<2x2x64x128xbf16, #tpu.memory_space<vmem>>, vector<1x1x64x128xbf16>
    %70 = vector.shape_cast %69 : vector<1x1x64x128xbf16> to vector<64x128xbf16>
    %cst_48 = arith.constant dense<0.000000e+00> : vector<8x128xf32>
    %71 = tpu.matmul %68, %70, %cst_48 {dimension_numbers = #tpu.dot_dimension_numbers<[1], [0], [0], [1], [0, 0, 1, 1], [], []>} : vector<8x64xbf16>, vector<64x128xbf16>, vector<8x128xf32> -> vector<8x128xf32>
    %c0_49 = arith.constant 0 : index
    %c1 = arith.constant 1 : index
    %c0_50 = arith.constant 0 : index
    %c0_51 = arith.constant 0 : index
    %72 = vector.load %arg5[%c0_49, %c1, %c0_50, %c0_51] : memref<2x2x128x64xbf16, #tpu.memory_space<vmem>>, vector<1x1x128x64xbf16>
    %73 = vector.shape_cast %72 : vector<1x1x128x64xbf16> to vector<128x64xbf16>
    %cst_52 = arith.constant dense<0.000000e+00> : vector<8x64xf32>
    %74 = tpu.matmul %28, %73, %cst_52 {dimension_numbers = #tpu.dot_dimension_numbers<[1], [0], [0], [1], [0, 0, 1, 1], [], []>} : vector<8x128xbf16>, vector<128x64xbf16>, vector<8x64xf32> -> vector<8x64xf32>
    %c0_53 = arith.constant 0 : index
    %c1_54 = arith.constant 1 : index
    %c0_55 = arith.constant 0 : index
    %c0_56 = arith.constant 0 : index
    %75 = vector.load %arg6[%c0_53, %c1_54, %c0_55, %c0_56] : memref<2x2x1x64xf32, #tpu.memory_space<vmem>>, vector<1x1x1x64xf32>
    %76 = vector.shape_cast %75 : vector<1x1x1x64xf32> to vector<1x64xf32>
    %77 = vector.broadcast %76 : vector<1x64xf32> to vector<8x64xf32>
    %78 = arith.addf %74, %77 : vector<8x64xf32>
    %c0_57 = arith.constant 0 : index
    %c1_58 = arith.constant 1 : index
    %c0_59 = arith.constant 0 : index
    %c0_60 = arith.constant 0 : index
    %79 = vector.load %arg7[%c0_57, %c1_58, %c0_59, %c0_60] : memref<2x2x128x64xbf16, #tpu.memory_space<vmem>>, vector<1x1x128x64xbf16>
    %80 = vector.shape_cast %79 : vector<1x1x128x64xbf16> to vector<128x64xbf16>
    %cst_61 = arith.constant dense<0.000000e+00> : vector<8x64xf32>
    %81 = tpu.matmul %28, %80, %cst_61 {dimension_numbers = #tpu.dot_dimension_numbers<[1], [0], [0], [1], [0, 0, 1, 1], [], []>} : vector<8x128xbf16>, vector<128x64xbf16>, vector<8x64xf32> -> vector<8x64xf32>
    %c0_62 = arith.constant 0 : index
    %c1_63 = arith.constant 1 : index
    %c0_64 = arith.constant 0 : index
    %c0_65 = arith.constant 0 : index
    %82 = vector.load %arg8[%c0_62, %c1_63, %c0_64, %c0_65] : memref<2x2x1x64xf32, #tpu.memory_space<vmem>>, vector<1x1x1x64xf32>
    %83 = vector.shape_cast %82 : vector<1x1x1x64xf32> to vector<1x64xf32>
    %84 = vector.broadcast %83 : vector<1x64xf32> to vector<8x64xf32>
    %85 = arith.addf %81, %84 : vector<8x64xf32>
    %c0_66 = arith.constant 0 : index
    %c1_67 = arith.constant 1 : index
    %c0_68 = arith.constant 0 : index
    %c0_69 = arith.constant 0 : index
    %86 = vector.load %arg9[%c0_66, %c1_67, %c0_68, %c0_69] : memref<2x2x128x64xbf16, #tpu.memory_space<vmem>>, vector<1x1x128x64xbf16>
    %87 = vector.shape_cast %86 : vector<1x1x128x64xbf16> to vector<128x64xbf16>
    %cst_70 = arith.constant dense<0.000000e+00> : vector<8x64xf32>
    %88 = tpu.matmul %28, %87, %cst_70 {dimension_numbers = #tpu.dot_dimension_numbers<[1], [0], [0], [1], [0, 0, 1, 1], [], []>} : vector<8x128xbf16>, vector<128x64xbf16>, vector<8x64xf32> -> vector<8x64xf32>
    %c0_71 = arith.constant 0 : index
    %c1_72 = arith.constant 1 : index
    %c0_73 = arith.constant 0 : index
    %c0_74 = arith.constant 0 : index
    %89 = vector.load %arg10[%c0_71, %c1_72, %c0_73, %c0_74] : memref<2x2x1x64xf32, #tpu.memory_space<vmem>>, vector<1x1x1x64xf32>
    %90 = vector.shape_cast %89 : vector<1x1x1x64xf32> to vector<1x64xf32>
    %91 = vector.broadcast %90 : vector<1x64xf32> to vector<8x64xf32>
    %92 = arith.addf %88, %91 : vector<8x64xf32>
    %93 = arith.truncf %78 : vector<8x64xf32> to vector<8x64xbf16>
    %94 = arith.truncf %85 : vector<8x64xf32> to vector<8x64xbf16>
    %cst_75 = arith.constant dense<0.000000e+00> : vector<8x8xf32>
    %95 = tpu.matmul %93, %94, %cst_75 {dimension_numbers = #tpu.dot_dimension_numbers<[1], [1], [0], [0], [0, 0, 1, 0], [], []>} : vector<8x64xbf16>, vector<8x64xbf16>, vector<8x8xf32> -> vector<8x8xf32>
    %96 = vector.broadcast %1 : vector<1x8xf32> to vector<8x8xf32>
    %97 = arith.addf %95, %96 : vector<8x8xf32>
    %cst_76 = arith.constant dense<0xFF800000> : vector<8xf32>
    %98 = vector.multi_reduction <maximumf>, %97, %cst_76 [1] : vector<8x8xf32> to vector<8xf32>
    %99 = vector.shape_cast %98 : vector<8xf32> to vector<8x1xf32>
    %100 = vector.broadcast %99 : vector<8x1xf32> to vector<8x8xf32>
    %101 = arith.subf %97, %100 : vector<8x8xf32>
    %102 = math.exp %101 : vector<8x8xf32>
    %cst_77 = arith.constant dense<0.000000e+00> : vector<8xf32>
    %103 = vector.multi_reduction <add>, %102, %cst_77 [1] : vector<8x8xf32> to vector<8xf32>
    %104 = vector.shape_cast %103 : vector<8xf32> to vector<8x1xf32>
    %105 = tpu.reciprocal %104 {approx = true} : vector<8x1xf32> -> vector<8x1xf32>
    %106 = vector.broadcast %105 : vector<8x1xf32> to vector<8x8xf32>
    %107 = arith.mulf %102, %106 : vector<8x8xf32>
    %108 = arith.truncf %107 : vector<8x8xf32> to vector<8x8xbf16>
    %109 = arith.truncf %92 : vector<8x64xf32> to vector<8x64xbf16>
    %cst_78 = arith.constant dense<0.000000e+00> : vector<8x64xf32>
    %110 = tpu.matmul %108, %109, %cst_78 {dimension_numbers = #tpu.dot_dimension_numbers<[1], [0], [0], [1], [0, 0, 1, 1], [], []>} : vector<8x8xbf16>, vector<8x64xbf16>, vector<8x64xf32> -> vector<8x64xf32>
    %111 = arith.truncf %110 : vector<8x64xf32> to vector<8x64xbf16>
    %c0_79 = arith.constant 0 : index
    %c1_80 = arith.constant 1 : index
    %c0_81 = arith.constant 0 : index
    %c0_82 = arith.constant 0 : index
    %112 = vector.load %arg11[%c0_79, %c1_80, %c0_81, %c0_82] : memref<2x2x64x128xbf16, #tpu.memory_space<vmem>>, vector<1x1x64x128xbf16>
    %113 = vector.shape_cast %112 : vector<1x1x64x128xbf16> to vector<64x128xbf16>
    %cst_83 = arith.constant dense<0.000000e+00> : vector<8x128xf32>
    %114 = tpu.matmul %111, %113, %cst_83 {dimension_numbers = #tpu.dot_dimension_numbers<[1], [0], [0], [1], [0, 0, 1, 1], [], []>} : vector<8x64xbf16>, vector<64x128xbf16>, vector<8x128xf32> -> vector<8x128xf32>
    %115 = arith.addf %71, %114 : vector<8x128xf32>
    %c0_84 = arith.constant 0 : index
    %c0_85 = arith.constant 0 : index
    %c0_86 = arith.constant 0 : index
    %116 = vector.load %arg12[%c0_84, %c0_85, %c0_86] : memref<2x1x128xf32, #tpu.memory_space<vmem>>, vector<1x1x128xf32>
    %117 = vector.shape_cast %116 : vector<1x1x128xf32> to vector<1x128xf32>
    %118 = vector.broadcast %117 : vector<1x128xf32> to vector<8x128xf32>
    %119 = arith.addf %115, %118 : vector<8x128xf32>
    %120 = arith.addf %119, %27 : vector<8x128xf32>
    %c0_87 = arith.constant 0 : index
    %c0_88 = arith.constant 0 : index
    %c0_89 = arith.constant 0 : index
    %121 = vector.load %arg13[%c0_87, %c0_88, %c0_89] : memref<2x1x128xf32, #tpu.memory_space<vmem>>, vector<1x1x128xf32>
    %122 = vector.shape_cast %121 : vector<1x1x128xf32> to vector<1x128xf32>
    %c0_90 = arith.constant 0 : index
    %c0_91 = arith.constant 0 : index
    %c0_92 = arith.constant 0 : index
    %123 = vector.load %arg14[%c0_90, %c0_91, %c0_92] : memref<2x1x128xf32, #tpu.memory_space<vmem>>, vector<1x1x128xf32>
    %124 = vector.shape_cast %123 : vector<1x1x128xf32> to vector<1x128xf32>
    %cst_93 = arith.constant dense<0.000000e+00> : vector<8xf32>
    %125 = vector.multi_reduction <add>, %120, %cst_93 [1] : vector<8x128xf32> to vector<8xf32>
    %126 = vector.shape_cast %125 : vector<8xf32> to vector<8x1xf32>
    %cst_94 = arith.constant 1.280000e+02 : f32
    %127 = vector.broadcast %cst_94 : f32 to vector<8x1xf32>
    %128 = arith.divf %126, %127 : vector<8x1xf32>
    %129 = arith.mulf %120, %120 : vector<8x128xf32>
    %cst_95 = arith.constant dense<0.000000e+00> : vector<8xf32>
    %130 = vector.multi_reduction <add>, %129, %cst_95 [1] : vector<8x128xf32> to vector<8xf32>
    %131 = vector.shape_cast %130 : vector<8xf32> to vector<8x1xf32>
    %cst_96 = arith.constant 1.280000e+02 : f32
    %132 = vector.broadcast %cst_96 : f32 to vector<8x1xf32>
    %133 = arith.divf %131, %132 : vector<8x1xf32>
    %134 = arith.mulf %128, %128 : vector<8x1xf32>
    %135 = arith.subf %133, %134 : vector<8x1xf32>
    %136 = vector.broadcast %128 : vector<8x1xf32> to vector<8x128xf32>
    %137 = arith.subf %120, %136 : vector<8x128xf32>
    %cst_97 = arith.constant 9.99999996E-13 : f32
    %138 = vector.broadcast %cst_97 : f32 to vector<8x1xf32>
    %139 = arith.addf %135, %138 : vector<8x1xf32>
    %140 = math.rsqrt %139 : vector<8x1xf32>
    %141 = vector.broadcast %140 : vector<8x1xf32> to vector<8x128xf32>
    %142 = arith.mulf %137, %141 : vector<8x128xf32>
    %143 = vector.broadcast %122 : vector<1x128xf32> to vector<8x128xf32>
    %144 = arith.mulf %142, %143 : vector<8x128xf32>
    %145 = vector.broadcast %124 : vector<1x128xf32> to vector<8x128xf32>
    %146 = arith.addf %144, %145 : vector<8x128xf32>
    %147 = arith.truncf %146 : vector<8x128xf32> to vector<8x128xbf16>
    %c0_98 = arith.constant 0 : index
    %c0_99 = arith.constant 0 : index
    %c0_100 = arith.constant 0 : index
    %148 = vector.load %arg15[%c0_98, %c0_99, %c0_100] : memref<2x128x512xbf16, #tpu.memory_space<vmem>>, vector<1x128x512xbf16>
    %149 = vector.shape_cast %148 : vector<1x128x512xbf16> to vector<128x512xbf16>
    %cst_101 = arith.constant dense<0.000000e+00> : vector<8x512xf32>
    %150 = tpu.matmul %147, %149, %cst_101 {dimension_numbers = #tpu.dot_dimension_numbers<[1], [0], [0], [1], [0, 0, 1, 1], [], []>} : vector<8x128xbf16>, vector<128x512xbf16>, vector<8x512xf32> -> vector<8x512xf32>
    %c0_102 = arith.constant 0 : index
    %c0_103 = arith.constant 0 : index
    %c0_104 = arith.constant 0 : index
    %151 = vector.load %arg16[%c0_102, %c0_103, %c0_104] : memref<2x1x512xf32, #tpu.memory_space<vmem>>, vector<1x1x512xf32>
    %152 = vector.shape_cast %151 : vector<1x1x512xf32> to vector<1x512xf32>
    %153 = vector.broadcast %152 : vector<1x512xf32> to vector<8x512xf32>
    %154 = arith.addf %150, %153 : vector<8x512xf32>
    %cst_105 = arith.constant 5.000000e-01 : f32
    %155 = vector.broadcast %cst_105 : f32 to vector<8x512xf32>
    %156 = arith.mulf %155, %154 : vector<8x512xf32>
    %cst_106 = arith.constant 4.471500e-02 : f32
    %157 = vector.broadcast %cst_106 : f32 to vector<8x512xf32>
    %158 = arith.mulf %157, %154 : vector<8x512xf32>
    %159 = arith.mulf %158, %154 : vector<8x512xf32>
    %160 = arith.mulf %159, %154 : vector<8x512xf32>
    %161 = arith.addf %154, %160 : vector<8x512xf32>
    %cst_107 = arith.constant 0.797884583 : f32
    %162 = vector.broadcast %cst_107 : f32 to vector<8x512xf32>
    %163 = arith.mulf %162, %161 : vector<8x512xf32>
    %164 = math.tanh %163 : vector<8x512xf32>
    %cst_108 = arith.constant 1.000000e+00 : f32
    %165 = vector.broadcast %cst_108 : f32 to vector<8x512xf32>
    %166 = arith.addf %165, %164 : vector<8x512xf32>
    %167 = arith.mulf %156, %166 : vector<8x512xf32>
    %168 = arith.truncf %167 : vector<8x512xf32> to vector<8x512xbf16>
    %c0_109 = arith.constant 0 : index
    %c0_110 = arith.constant 0 : index
    %c0_111 = arith.constant 0 : index
    %169 = vector.load %arg17[%c0_109, %c0_110, %c0_111] : memref<2x512x128xbf16, #tpu.memory_space<vmem>>, vector<1x512x128xbf16>
    %170 = vector.shape_cast %169 : vector<1x512x128xbf16> to vector<512x128xbf16>
    %cst_112 = arith.constant dense<0.000000e+00> : vector<8x128xf32>
    %171 = tpu.matmul %168, %170, %cst_112 {dimension_numbers = #tpu.dot_dimension_numbers<[1], [0], [0], [1], [0, 0, 1, 1], [], []>} : vector<8x512xbf16>, vector<512x128xbf16>, vector<8x128xf32> -> vector<8x128xf32>
    %c0_113 = arith.constant 0 : index
    %c0_114 = arith.constant 0 : index
    %c0_115 = arith.constant 0 : index
    %172 = vector.load %arg18[%c0_113, %c0_114, %c0_115] : memref<2x1x128xf32, #tpu.memory_space<vmem>>, vector<1x1x128xf32>
    %173 = vector.shape_cast %172 : vector<1x1x128xf32> to vector<1x128xf32>
    %174 = vector.broadcast %173 : vector<1x128xf32> to vector<8x128xf32>
    %175 = arith.addf %171, %174 : vector<8x128xf32>
    %176 = arith.addf %175, %146 : vector<8x128xf32>
    %c0_116 = arith.constant 0 : index
    %c0_117 = arith.constant 0 : index
    %c0_118 = arith.constant 0 : index
    %177 = vector.load %arg19[%c0_116, %c0_117, %c0_118] : memref<2x1x128xf32, #tpu.memory_space<vmem>>, vector<1x1x128xf32>
    %178 = vector.shape_cast %177 : vector<1x1x128xf32> to vector<1x128xf32>
    %c0_119 = arith.constant 0 : index
    %c0_120 = arith.constant 0 : index
    %c0_121 = arith.constant 0 : index
    %179 = vector.load %arg20[%c0_119, %c0_120, %c0_121] : memref<2x1x128xf32, #tpu.memory_space<vmem>>, vector<1x1x128xf32>
    %180 = vector.shape_cast %179 : vector<1x1x128xf32> to vector<1x128xf32>
    %cst_122 = arith.constant dense<0.000000e+00> : vector<8xf32>
    %181 = vector.multi_reduction <add>, %176, %cst_122 [1] : vector<8x128xf32> to vector<8xf32>
    %182 = vector.shape_cast %181 : vector<8xf32> to vector<8x1xf32>
    %cst_123 = arith.constant 1.280000e+02 : f32
    %183 = vector.broadcast %cst_123 : f32 to vector<8x1xf32>
    %184 = arith.divf %182, %183 : vector<8x1xf32>
    %185 = arith.mulf %176, %176 : vector<8x128xf32>
    %cst_124 = arith.constant dense<0.000000e+00> : vector<8xf32>
    %186 = vector.multi_reduction <add>, %185, %cst_124 [1] : vector<8x128xf32> to vector<8xf32>
    %187 = vector.shape_cast %186 : vector<8xf32> to vector<8x1xf32>
    %cst_125 = arith.constant 1.280000e+02 : f32
    %188 = vector.broadcast %cst_125 : f32 to vector<8x1xf32>
    %189 = arith.divf %187, %188 : vector<8x1xf32>
    %190 = arith.mulf %184, %184 : vector<8x1xf32>
    %191 = arith.subf %189, %190 : vector<8x1xf32>
    %192 = vector.broadcast %184 : vector<8x1xf32> to vector<8x128xf32>
    %193 = arith.subf %176, %192 : vector<8x128xf32>
    %cst_126 = arith.constant 9.99999996E-13 : f32
    %194 = vector.broadcast %cst_126 : f32 to vector<8x1xf32>
    %195 = arith.addf %191, %194 : vector<8x1xf32>
    %196 = math.rsqrt %195 : vector<8x1xf32>
    %197 = vector.broadcast %196 : vector<8x1xf32> to vector<8x128xf32>
    %198 = arith.mulf %193, %197 : vector<8x128xf32>
    %199 = vector.broadcast %178 : vector<1x128xf32> to vector<8x128xf32>
    %200 = arith.mulf %198, %199 : vector<8x128xf32>
    %201 = vector.broadcast %180 : vector<1x128xf32> to vector<8x128xf32>
    %202 = arith.addf %200, %201 : vector<8x128xf32>
    %203 = arith.truncf %202 : vector<8x128xf32> to vector<8x128xbf16>
    %c1_127 = arith.constant 1 : index
    %c0_128 = arith.constant 0 : index
    %c0_129 = arith.constant 0 : index
    %c0_130 = arith.constant 0 : index
    %204 = vector.load %arg5[%c1_127, %c0_128, %c0_129, %c0_130] : memref<2x2x128x64xbf16, #tpu.memory_space<vmem>>, vector<1x1x128x64xbf16>
    %205 = vector.shape_cast %204 : vector<1x1x128x64xbf16> to vector<128x64xbf16>
    %cst_131 = arith.constant dense<0.000000e+00> : vector<8x64xf32>
    %206 = tpu.matmul %203, %205, %cst_131 {dimension_numbers = #tpu.dot_dimension_numbers<[1], [0], [0], [1], [0, 0, 1, 1], [], []>} : vector<8x128xbf16>, vector<128x64xbf16>, vector<8x64xf32> -> vector<8x64xf32>
    %c1_132 = arith.constant 1 : index
    %c0_133 = arith.constant 0 : index
    %c0_134 = arith.constant 0 : index
    %c0_135 = arith.constant 0 : index
    %207 = vector.load %arg6[%c1_132, %c0_133, %c0_134, %c0_135] : memref<2x2x1x64xf32, #tpu.memory_space<vmem>>, vector<1x1x1x64xf32>
    %208 = vector.shape_cast %207 : vector<1x1x1x64xf32> to vector<1x64xf32>
    %209 = vector.broadcast %208 : vector<1x64xf32> to vector<8x64xf32>
    %210 = arith.addf %206, %209 : vector<8x64xf32>
    %c1_136 = arith.constant 1 : index
    %c0_137 = arith.constant 0 : index
    %c0_138 = arith.constant 0 : index
    %c0_139 = arith.constant 0 : index
    %211 = vector.load %arg7[%c1_136, %c0_137, %c0_138, %c0_139] : memref<2x2x128x64xbf16, #tpu.memory_space<vmem>>, vector<1x1x128x64xbf16>
    %212 = vector.shape_cast %211 : vector<1x1x128x64xbf16> to vector<128x64xbf16>
    %cst_140 = arith.constant dense<0.000000e+00> : vector<8x64xf32>
    %213 = tpu.matmul %203, %212, %cst_140 {dimension_numbers = #tpu.dot_dimension_numbers<[1], [0], [0], [1], [0, 0, 1, 1], [], []>} : vector<8x128xbf16>, vector<128x64xbf16>, vector<8x64xf32> -> vector<8x64xf32>
    %c1_141 = arith.constant 1 : index
    %c0_142 = arith.constant 0 : index
    %c0_143 = arith.constant 0 : index
    %c0_144 = arith.constant 0 : index
    %214 = vector.load %arg8[%c1_141, %c0_142, %c0_143, %c0_144] : memref<2x2x1x64xf32, #tpu.memory_space<vmem>>, vector<1x1x1x64xf32>
    %215 = vector.shape_cast %214 : vector<1x1x1x64xf32> to vector<1x64xf32>
    %216 = vector.broadcast %215 : vector<1x64xf32> to vector<8x64xf32>
    %217 = arith.addf %213, %216 : vector<8x64xf32>
    %c1_145 = arith.constant 1 : index
    %c0_146 = arith.constant 0 : index
    %c0_147 = arith.constant 0 : index
    %c0_148 = arith.constant 0 : index
    %218 = vector.load %arg9[%c1_145, %c0_146, %c0_147, %c0_148] : memref<2x2x128x64xbf16, #tpu.memory_space<vmem>>, vector<1x1x128x64xbf16>
    %219 = vector.shape_cast %218 : vector<1x1x128x64xbf16> to vector<128x64xbf16>
    %cst_149 = arith.constant dense<0.000000e+00> : vector<8x64xf32>
    %220 = tpu.matmul %203, %219, %cst_149 {dimension_numbers = #tpu.dot_dimension_numbers<[1], [0], [0], [1], [0, 0, 1, 1], [], []>} : vector<8x128xbf16>, vector<128x64xbf16>, vector<8x64xf32> -> vector<8x64xf32>
    %c1_150 = arith.constant 1 : index
    %c0_151 = arith.constant 0 : index
    %c0_152 = arith.constant 0 : index
    %c0_153 = arith.constant 0 : index
    %221 = vector.load %arg10[%c1_150, %c0_151, %c0_152, %c0_153] : memref<2x2x1x64xf32, #tpu.memory_space<vmem>>, vector<1x1x1x64xf32>
    %222 = vector.shape_cast %221 : vector<1x1x1x64xf32> to vector<1x64xf32>
    %223 = vector.broadcast %222 : vector<1x64xf32> to vector<8x64xf32>
    %224 = arith.addf %220, %223 : vector<8x64xf32>
    %225 = arith.truncf %210 : vector<8x64xf32> to vector<8x64xbf16>
    %226 = arith.truncf %217 : vector<8x64xf32> to vector<8x64xbf16>
    %cst_154 = arith.constant dense<0.000000e+00> : vector<8x8xf32>
    %227 = tpu.matmul %225, %226, %cst_154 {dimension_numbers = #tpu.dot_dimension_numbers<[1], [1], [0], [0], [0, 0, 1, 0], [], []>} : vector<8x64xbf16>, vector<8x64xbf16>, vector<8x8xf32> -> vector<8x8xf32>
    %228 = vector.broadcast %1 : vector<1x8xf32> to vector<8x8xf32>
    %229 = arith.addf %227, %228 : vector<8x8xf32>
    %cst_155 = arith.constant dense<0xFF800000> : vector<8xf32>
    %230 = vector.multi_reduction <maximumf>, %229, %cst_155 [1] : vector<8x8xf32> to vector<8xf32>
    %231 = vector.shape_cast %230 : vector<8xf32> to vector<8x1xf32>
    %232 = vector.broadcast %231 : vector<8x1xf32> to vector<8x8xf32>
    %233 = arith.subf %229, %232 : vector<8x8xf32>
    %234 = math.exp %233 : vector<8x8xf32>
    %cst_156 = arith.constant dense<0.000000e+00> : vector<8xf32>
    %235 = vector.multi_reduction <add>, %234, %cst_156 [1] : vector<8x8xf32> to vector<8xf32>
    %236 = vector.shape_cast %235 : vector<8xf32> to vector<8x1xf32>
    %237 = tpu.reciprocal %236 {approx = true} : vector<8x1xf32> -> vector<8x1xf32>
    %238 = vector.broadcast %237 : vector<8x1xf32> to vector<8x8xf32>
    %239 = arith.mulf %234, %238 : vector<8x8xf32>
    %240 = arith.truncf %239 : vector<8x8xf32> to vector<8x8xbf16>
    %241 = arith.truncf %224 : vector<8x64xf32> to vector<8x64xbf16>
    %cst_157 = arith.constant dense<0.000000e+00> : vector<8x64xf32>
    %242 = tpu.matmul %240, %241, %cst_157 {dimension_numbers = #tpu.dot_dimension_numbers<[1], [0], [0], [1], [0, 0, 1, 1], [], []>} : vector<8x8xbf16>, vector<8x64xbf16>, vector<8x64xf32> -> vector<8x64xf32>
    %243 = arith.truncf %242 : vector<8x64xf32> to vector<8x64xbf16>
    %c1_158 = arith.constant 1 : index
    %c0_159 = arith.constant 0 : index
    %c0_160 = arith.constant 0 : index
    %c0_161 = arith.constant 0 : index
    %244 = vector.load %arg11[%c1_158, %c0_159, %c0_160, %c0_161] : memref<2x2x64x128xbf16, #tpu.memory_space<vmem>>, vector<1x1x64x128xbf16>
    %245 = vector.shape_cast %244 : vector<1x1x64x128xbf16> to vector<64x128xbf16>
    %cst_162 = arith.constant dense<0.000000e+00> : vector<8x128xf32>
    %246 = tpu.matmul %243, %245, %cst_162 {dimension_numbers = #tpu.dot_dimension_numbers<[1], [0], [0], [1], [0, 0, 1, 1], [], []>} : vector<8x64xbf16>, vector<64x128xbf16>, vector<8x128xf32> -> vector<8x128xf32>
    %c1_163 = arith.constant 1 : index
    %c1_164 = arith.constant 1 : index
    %c0_165 = arith.constant 0 : index
    %c0_166 = arith.constant 0 : index
    %247 = vector.load %arg5[%c1_163, %c1_164, %c0_165, %c0_166] : memref<2x2x128x64xbf16, #tpu.memory_space<vmem>>, vector<1x1x128x64xbf16>
    %248 = vector.shape_cast %247 : vector<1x1x128x64xbf16> to vector<128x64xbf16>
    %cst_167 = arith.constant dense<0.000000e+00> : vector<8x64xf32>
    %249 = tpu.matmul %203, %248, %cst_167 {dimension_numbers = #tpu.dot_dimension_numbers<[1], [0], [0], [1], [0, 0, 1, 1], [], []>} : vector<8x128xbf16>, vector<128x64xbf16>, vector<8x64xf32> -> vector<8x64xf32>
    %c1_168 = arith.constant 1 : index
    %c1_169 = arith.constant 1 : index
    %c0_170 = arith.constant 0 : index
    %c0_171 = arith.constant 0 : index
    %250 = vector.load %arg6[%c1_168, %c1_169, %c0_170, %c0_171] : memref<2x2x1x64xf32, #tpu.memory_space<vmem>>, vector<1x1x1x64xf32>
    %251 = vector.shape_cast %250 : vector<1x1x1x64xf32> to vector<1x64xf32>
    %252 = vector.broadcast %251 : vector<1x64xf32> to vector<8x64xf32>
    %253 = arith.addf %249, %252 : vector<8x64xf32>
    %c1_172 = arith.constant 1 : index
    %c1_173 = arith.constant 1 : index
    %c0_174 = arith.constant 0 : index
    %c0_175 = arith.constant 0 : index
    %254 = vector.load %arg7[%c1_172, %c1_173, %c0_174, %c0_175] : memref<2x2x128x64xbf16, #tpu.memory_space<vmem>>, vector<1x1x128x64xbf16>
    %255 = vector.shape_cast %254 : vector<1x1x128x64xbf16> to vector<128x64xbf16>
    %cst_176 = arith.constant dense<0.000000e+00> : vector<8x64xf32>
    %256 = tpu.matmul %203, %255, %cst_176 {dimension_numbers = #tpu.dot_dimension_numbers<[1], [0], [0], [1], [0, 0, 1, 1], [], []>} : vector<8x128xbf16>, vector<128x64xbf16>, vector<8x64xf32> -> vector<8x64xf32>
    %c1_177 = arith.constant 1 : index
    %c1_178 = arith.constant 1 : index
    %c0_179 = arith.constant 0 : index
    %c0_180 = arith.constant 0 : index
    %257 = vector.load %arg8[%c1_177, %c1_178, %c0_179, %c0_180] : memref<2x2x1x64xf32, #tpu.memory_space<vmem>>, vector<1x1x1x64xf32>
    %258 = vector.shape_cast %257 : vector<1x1x1x64xf32> to vector<1x64xf32>
    %259 = vector.broadcast %258 : vector<1x64xf32> to vector<8x64xf32>
    %260 = arith.addf %256, %259 : vector<8x64xf32>
    %c1_181 = arith.constant 1 : index
    %c1_182 = arith.constant 1 : index
    %c0_183 = arith.constant 0 : index
    %c0_184 = arith.constant 0 : index
    %261 = vector.load %arg9[%c1_181, %c1_182, %c0_183, %c0_184] : memref<2x2x128x64xbf16, #tpu.memory_space<vmem>>, vector<1x1x128x64xbf16>
    %262 = vector.shape_cast %261 : vector<1x1x128x64xbf16> to vector<128x64xbf16>
    %cst_185 = arith.constant dense<0.000000e+00> : vector<8x64xf32>
    %263 = tpu.matmul %203, %262, %cst_185 {dimension_numbers = #tpu.dot_dimension_numbers<[1], [0], [0], [1], [0, 0, 1, 1], [], []>} : vector<8x128xbf16>, vector<128x64xbf16>, vector<8x64xf32> -> vector<8x64xf32>
    %c1_186 = arith.constant 1 : index
    %c1_187 = arith.constant 1 : index
    %c0_188 = arith.constant 0 : index
    %c0_189 = arith.constant 0 : index
    %264 = vector.load %arg10[%c1_186, %c1_187, %c0_188, %c0_189] : memref<2x2x1x64xf32, #tpu.memory_space<vmem>>, vector<1x1x1x64xf32>
    %265 = vector.shape_cast %264 : vector<1x1x1x64xf32> to vector<1x64xf32>
    %266 = vector.broadcast %265 : vector<1x64xf32> to vector<8x64xf32>
    %267 = arith.addf %263, %266 : vector<8x64xf32>
    %268 = arith.truncf %253 : vector<8x64xf32> to vector<8x64xbf16>
    %269 = arith.truncf %260 : vector<8x64xf32> to vector<8x64xbf16>
    %cst_190 = arith.constant dense<0.000000e+00> : vector<8x8xf32>
    %270 = tpu.matmul %268, %269, %cst_190 {dimension_numbers = #tpu.dot_dimension_numbers<[1], [1], [0], [0], [0, 0, 1, 0], [], []>} : vector<8x64xbf16>, vector<8x64xbf16>, vector<8x8xf32> -> vector<8x8xf32>
    %271 = vector.broadcast %1 : vector<1x8xf32> to vector<8x8xf32>
    %272 = arith.addf %270, %271 : vector<8x8xf32>
    %cst_191 = arith.constant dense<0xFF800000> : vector<8xf32>
    %273 = vector.multi_reduction <maximumf>, %272, %cst_191 [1] : vector<8x8xf32> to vector<8xf32>
    %274 = vector.shape_cast %273 : vector<8xf32> to vector<8x1xf32>
    %275 = vector.broadcast %274 : vector<8x1xf32> to vector<8x8xf32>
    %276 = arith.subf %272, %275 : vector<8x8xf32>
    %277 = math.exp %276 : vector<8x8xf32>
    %cst_192 = arith.constant dense<0.000000e+00> : vector<8xf32>
    %278 = vector.multi_reduction <add>, %277, %cst_192 [1] : vector<8x8xf32> to vector<8xf32>
    %279 = vector.shape_cast %278 : vector<8xf32> to vector<8x1xf32>
    %280 = tpu.reciprocal %279 {approx = true} : vector<8x1xf32> -> vector<8x1xf32>
    %281 = vector.broadcast %280 : vector<8x1xf32> to vector<8x8xf32>
    %282 = arith.mulf %277, %281 : vector<8x8xf32>
    %283 = arith.truncf %282 : vector<8x8xf32> to vector<8x8xbf16>
    %284 = arith.truncf %267 : vector<8x64xf32> to vector<8x64xbf16>
    %cst_193 = arith.constant dense<0.000000e+00> : vector<8x64xf32>
    %285 = tpu.matmul %283, %284, %cst_193 {dimension_numbers = #tpu.dot_dimension_numbers<[1], [0], [0], [1], [0, 0, 1, 1], [], []>} : vector<8x8xbf16>, vector<8x64xbf16>, vector<8x64xf32> -> vector<8x64xf32>
    %286 = arith.truncf %285 : vector<8x64xf32> to vector<8x64xbf16>
    %c1_194 = arith.constant 1 : index
    %c1_195 = arith.constant 1 : index
    %c0_196 = arith.constant 0 : index
    %c0_197 = arith.constant 0 : index
    %287 = vector.load %arg11[%c1_194, %c1_195, %c0_196, %c0_197] : memref<2x2x64x128xbf16, #tpu.memory_space<vmem>>, vector<1x1x64x128xbf16>
    %288 = vector.shape_cast %287 : vector<1x1x64x128xbf16> to vector<64x128xbf16>
    %cst_198 = arith.constant dense<0.000000e+00> : vector<8x128xf32>
    %289 = tpu.matmul %286, %288, %cst_198 {dimension_numbers = #tpu.dot_dimension_numbers<[1], [0], [0], [1], [0, 0, 1, 1], [], []>} : vector<8x64xbf16>, vector<64x128xbf16>, vector<8x128xf32> -> vector<8x128xf32>
    %290 = arith.addf %246, %289 : vector<8x128xf32>
    %c1_199 = arith.constant 1 : index
    %c0_200 = arith.constant 0 : index
    %c0_201 = arith.constant 0 : index
    %291 = vector.load %arg12[%c1_199, %c0_200, %c0_201] : memref<2x1x128xf32, #tpu.memory_space<vmem>>, vector<1x1x128xf32>
    %292 = vector.shape_cast %291 : vector<1x1x128xf32> to vector<1x128xf32>
    %293 = vector.broadcast %292 : vector<1x128xf32> to vector<8x128xf32>
    %294 = arith.addf %290, %293 : vector<8x128xf32>
    %295 = arith.addf %294, %202 : vector<8x128xf32>
    %c1_202 = arith.constant 1 : index
    %c0_203 = arith.constant 0 : index
    %c0_204 = arith.constant 0 : index
    %296 = vector.load %arg13[%c1_202, %c0_203, %c0_204] : memref<2x1x128xf32, #tpu.memory_space<vmem>>, vector<1x1x128xf32>
    %297 = vector.shape_cast %296 : vector<1x1x128xf32> to vector<1x128xf32>
    %c1_205 = arith.constant 1 : index
    %c0_206 = arith.constant 0 : index
    %c0_207 = arith.constant 0 : index
    %298 = vector.load %arg14[%c1_205, %c0_206, %c0_207] : memref<2x1x128xf32, #tpu.memory_space<vmem>>, vector<1x1x128xf32>
    %299 = vector.shape_cast %298 : vector<1x1x128xf32> to vector<1x128xf32>
    %cst_208 = arith.constant dense<0.000000e+00> : vector<8xf32>
    %300 = vector.multi_reduction <add>, %295, %cst_208 [1] : vector<8x128xf32> to vector<8xf32>
    %301 = vector.shape_cast %300 : vector<8xf32> to vector<8x1xf32>
    %cst_209 = arith.constant 1.280000e+02 : f32
    %302 = vector.broadcast %cst_209 : f32 to vector<8x1xf32>
    %303 = arith.divf %301, %302 : vector<8x1xf32>
    %304 = arith.mulf %295, %295 : vector<8x128xf32>
    %cst_210 = arith.constant dense<0.000000e+00> : vector<8xf32>
    %305 = vector.multi_reduction <add>, %304, %cst_210 [1] : vector<8x128xf32> to vector<8xf32>
    %306 = vector.shape_cast %305 : vector<8xf32> to vector<8x1xf32>
    %cst_211 = arith.constant 1.280000e+02 : f32
    %307 = vector.broadcast %cst_211 : f32 to vector<8x1xf32>
    %308 = arith.divf %306, %307 : vector<8x1xf32>
    %309 = arith.mulf %303, %303 : vector<8x1xf32>
    %310 = arith.subf %308, %309 : vector<8x1xf32>
    %311 = vector.broadcast %303 : vector<8x1xf32> to vector<8x128xf32>
    %312 = arith.subf %295, %311 : vector<8x128xf32>
    %cst_212 = arith.constant 9.99999996E-13 : f32
    %313 = vector.broadcast %cst_212 : f32 to vector<8x1xf32>
    %314 = arith.addf %310, %313 : vector<8x1xf32>
    %315 = math.rsqrt %314 : vector<8x1xf32>
    %316 = vector.broadcast %315 : vector<8x1xf32> to vector<8x128xf32>
    %317 = arith.mulf %312, %316 : vector<8x128xf32>
    %318 = vector.broadcast %297 : vector<1x128xf32> to vector<8x128xf32>
    %319 = arith.mulf %317, %318 : vector<8x128xf32>
    %320 = vector.broadcast %299 : vector<1x128xf32> to vector<8x128xf32>
    %321 = arith.addf %319, %320 : vector<8x128xf32>
    %322 = arith.truncf %321 : vector<8x128xf32> to vector<8x128xbf16>
    %c1_213 = arith.constant 1 : index
    %c0_214 = arith.constant 0 : index
    %c0_215 = arith.constant 0 : index
    %323 = vector.load %arg15[%c1_213, %c0_214, %c0_215] : memref<2x128x512xbf16, #tpu.memory_space<vmem>>, vector<1x128x512xbf16>
    %324 = vector.shape_cast %323 : vector<1x128x512xbf16> to vector<128x512xbf16>
    %cst_216 = arith.constant dense<0.000000e+00> : vector<8x512xf32>
    %325 = tpu.matmul %322, %324, %cst_216 {dimension_numbers = #tpu.dot_dimension_numbers<[1], [0], [0], [1], [0, 0, 1, 1], [], []>} : vector<8x128xbf16>, vector<128x512xbf16>, vector<8x512xf32> -> vector<8x512xf32>
    %c1_217 = arith.constant 1 : index
    %c0_218 = arith.constant 0 : index
    %c0_219 = arith.constant 0 : index
    %326 = vector.load %arg16[%c1_217, %c0_218, %c0_219] : memref<2x1x512xf32, #tpu.memory_space<vmem>>, vector<1x1x512xf32>
    %327 = vector.shape_cast %326 : vector<1x1x512xf32> to vector<1x512xf32>
    %328 = vector.broadcast %327 : vector<1x512xf32> to vector<8x512xf32>
    %329 = arith.addf %325, %328 : vector<8x512xf32>
    %cst_220 = arith.constant 5.000000e-01 : f32
    %330 = vector.broadcast %cst_220 : f32 to vector<8x512xf32>
    %331 = arith.mulf %330, %329 : vector<8x512xf32>
    %cst_221 = arith.constant 4.471500e-02 : f32
    %332 = vector.broadcast %cst_221 : f32 to vector<8x512xf32>
    %333 = arith.mulf %332, %329 : vector<8x512xf32>
    %334 = arith.mulf %333, %329 : vector<8x512xf32>
    %335 = arith.mulf %334, %329 : vector<8x512xf32>
    %336 = arith.addf %329, %335 : vector<8x512xf32>
    %cst_222 = arith.constant 0.797884583 : f32
    %337 = vector.broadcast %cst_222 : f32 to vector<8x512xf32>
    %338 = arith.mulf %337, %336 : vector<8x512xf32>
    %339 = math.tanh %338 : vector<8x512xf32>
    %cst_223 = arith.constant 1.000000e+00 : f32
    %340 = vector.broadcast %cst_223 : f32 to vector<8x512xf32>
    %341 = arith.addf %340, %339 : vector<8x512xf32>
    %342 = arith.mulf %331, %341 : vector<8x512xf32>
    %343 = arith.truncf %342 : vector<8x512xf32> to vector<8x512xbf16>
    %c1_224 = arith.constant 1 : index
    %c0_225 = arith.constant 0 : index
    %c0_226 = arith.constant 0 : index
    %344 = vector.load %arg17[%c1_224, %c0_225, %c0_226] : memref<2x512x128xbf16, #tpu.memory_space<vmem>>, vector<1x512x128xbf16>
    %345 = vector.shape_cast %344 : vector<1x512x128xbf16> to vector<512x128xbf16>
    %cst_227 = arith.constant dense<0.000000e+00> : vector<8x128xf32>
    %346 = tpu.matmul %343, %345, %cst_227 {dimension_numbers = #tpu.dot_dimension_numbers<[1], [0], [0], [1], [0, 0, 1, 1], [], []>} : vector<8x512xbf16>, vector<512x128xbf16>, vector<8x128xf32> -> vector<8x128xf32>
    %c1_228 = arith.constant 1 : index
    %c0_229 = arith.constant 0 : index
    %c0_230 = arith.constant 0 : index
    %347 = vector.load %arg18[%c1_228, %c0_229, %c0_230] : memref<2x1x128xf32, #tpu.memory_space<vmem>>, vector<1x1x128xf32>
    %348 = vector.shape_cast %347 : vector<1x1x128xf32> to vector<1x128xf32>
    %349 = vector.broadcast %348 : vector<1x128xf32> to vector<8x128xf32>
    %350 = arith.addf %346, %349 : vector<8x128xf32>
    %351 = arith.addf %350, %321 : vector<8x128xf32>
    %c1_231 = arith.constant 1 : index
    %c0_232 = arith.constant 0 : index
    %c0_233 = arith.constant 0 : index
    %352 = vector.load %arg19[%c1_231, %c0_232, %c0_233] : memref<2x1x128xf32, #tpu.memory_space<vmem>>, vector<1x1x128xf32>
    %353 = vector.shape_cast %352 : vector<1x1x128xf32> to vector<1x128xf32>
    %c1_234 = arith.constant 1 : index
    %c0_235 = arith.constant 0 : index
    %c0_236 = arith.constant 0 : index
    %354 = vector.load %arg20[%c1_234, %c0_235, %c0_236] : memref<2x1x128xf32, #tpu.memory_space<vmem>>, vector<1x1x128xf32>
    %355 = vector.shape_cast %354 : vector<1x1x128xf32> to vector<1x128xf32>
    %cst_237 = arith.constant dense<0.000000e+00> : vector<8xf32>
    %356 = vector.multi_reduction <add>, %351, %cst_237 [1] : vector<8x128xf32> to vector<8xf32>
    %357 = vector.shape_cast %356 : vector<8xf32> to vector<8x1xf32>
    %cst_238 = arith.constant 1.280000e+02 : f32
    %358 = vector.broadcast %cst_238 : f32 to vector<8x1xf32>
    %359 = arith.divf %357, %358 : vector<8x1xf32>
    %360 = arith.mulf %351, %351 : vector<8x128xf32>
    %cst_239 = arith.constant dense<0.000000e+00> : vector<8xf32>
    %361 = vector.multi_reduction <add>, %360, %cst_239 [1] : vector<8x128xf32> to vector<8xf32>
    %362 = vector.shape_cast %361 : vector<8xf32> to vector<8x1xf32>
    %cst_240 = arith.constant 1.280000e+02 : f32
    %363 = vector.broadcast %cst_240 : f32 to vector<8x1xf32>
    %364 = arith.divf %362, %363 : vector<8x1xf32>
    %365 = arith.mulf %359, %359 : vector<8x1xf32>
    %366 = arith.subf %364, %365 : vector<8x1xf32>
    %367 = vector.broadcast %359 : vector<8x1xf32> to vector<8x128xf32>
    %368 = arith.subf %351, %367 : vector<8x128xf32>
    %cst_241 = arith.constant 9.99999996E-13 : f32
    %369 = vector.broadcast %cst_241 : f32 to vector<8x1xf32>
    %370 = arith.addf %366, %369 : vector<8x1xf32>
    %371 = math.rsqrt %370 : vector<8x1xf32>
    %372 = vector.broadcast %371 : vector<8x1xf32> to vector<8x128xf32>
    %373 = arith.mulf %368, %372 : vector<8x128xf32>
    %374 = vector.broadcast %353 : vector<1x128xf32> to vector<8x128xf32>
    %375 = arith.mulf %373, %374 : vector<8x128xf32>
    %376 = vector.broadcast %355 : vector<1x128xf32> to vector<8x128xf32>
    %377 = arith.addf %375, %376 : vector<8x128xf32>
    %378 = arith.truncf %377 : vector<8x128xf32> to vector<8x128xbf16>
    %c0_242 = arith.constant 0 : index
    %c0_243 = arith.constant 0 : index
    %379 = vector.load %arg21[%c0_242, %c0_243] : memref<128x128xbf16, #tpu.memory_space<vmem>>, vector<128x128xbf16>
    %cst_244 = arith.constant dense<0.000000e+00> : vector<8x128xf32>
    %380 = tpu.matmul %378, %379, %cst_244 {dimension_numbers = #tpu.dot_dimension_numbers<[1], [0], [0], [1], [0, 0, 1, 1], [], []>} : vector<8x128xbf16>, vector<128x128xbf16>, vector<8x128xf32> -> vector<8x128xf32>
    %c0_245 = arith.constant 0 : index
    %c0_246 = arith.constant 0 : index
    %381 = vector.load %arg22[%c0_245, %c0_246] : memref<1x128xf32, #tpu.memory_space<vmem>>, vector<1x128xf32>
    %382 = vector.broadcast %381 : vector<1x128xf32> to vector<8x128xf32>
    %383 = arith.addf %380, %382 : vector<8x128xf32>
    %384 = math.tanh %383 : vector<8x128xf32>
    %385 = arith.truncf %384 : vector<8x128xf32> to vector<8x128xbf16>
    %c0_247 = arith.constant 0 : index
    %c0_248 = arith.constant 0 : index
    %386 = vector.load %arg23[%c0_247, %c0_248] : memref<128x128xbf16, #tpu.memory_space<vmem>>, vector<128x128xbf16>
    %cst_249 = arith.constant dense<0.000000e+00> : vector<8x128xf32>
    %387 = tpu.matmul %385, %386, %cst_249 {dimension_numbers = #tpu.dot_dimension_numbers<[1], [0], [0], [1], [0, 0, 1, 1], [], []>} : vector<8x128xbf16>, vector<128x128xbf16>, vector<8x128xf32> -> vector<8x128xf32>
    %c0_250 = arith.constant 0 : index
    %c0_251 = arith.constant 0 : index
    %388 = vector.load %arg24[%c0_250, %c0_251] : memref<1x128xf32, #tpu.memory_space<vmem>>, vector<1x128xf32>
    %389 = vector.broadcast %388 : vector<1x128xf32> to vector<8x128xf32>
    %390 = arith.addf %387, %389 : vector<8x128xf32>
    %c0_252 = arith.constant 0 : index
    %c0_253 = arith.constant 0 : index
    %c0_254 = arith.constant 0 : index
    %391 = vector.load %arg25[%c0_252, %c0_253, %c0_254] : memref<1x8x128xf32, #tpu.memory_space<vmem>>, vector<1x8x128xf32>
    %392 = vector.shape_cast %391 : vector<1x8x128xf32> to vector<8x128xf32>
    %393 = vector.shape_cast %390 : vector<8x128xf32> to vector<1x8x128xf32>
    tpu.vector_store %arg25[%c0_252, %c0_253, %c0_254], %393 {strides = array<i32>} : memref<1x8x128xf32, #tpu.memory_space<vmem>>, vector<1x8x128xf32>,
    return
  }
  func.func @transform_0(%arg0: i32) -> (i32, i32, i32) {
    %c0_i32 = arith.constant 0 : i32
    %c0_i32_0 = arith.constant 0 : i32
    %c0_i32_1 = arith.constant 0 : i32
    return %arg0, %c0_i32, %c0_i32_0 : i32, i32, i32
  }
  func.func @transform_1(%arg0: i32) -> (i32, i32, i32) {
    %c0_i32 = arith.constant 0 : i32
    %c0_i32_0 = arith.constant 0 : i32
    %c0_i32_1 = arith.constant 0 : i32
    return %arg0, %c0_i32, %c0_i32_0 : i32, i32, i32
  }
  func.func @transform_2(%arg0: i32) -> (i32, i32) {
    %c0_i32 = arith.constant 0 : i32
    %c0_i32_0 = arith.constant 0 : i32
    %c0_i32_1 = arith.constant 0 : i32
    return %c0_i32, %c0_i32_0 : i32, i32
  }
  func.func @transform_3(%arg0: i32) -> (i32, i32) {
    %c0_i32 = arith.constant 0 : i32
    %c0_i32_0 = arith.constant 0 : i32
    %c0_i32_1 = arith.constant 0 : i32
    return %c0_i32, %c0_i32_0 : i32, i32
  }
  func.func @transform_4(%arg0: i32) -> (i32, i32, i32, i32) {
    %c0_i32 = arith.constant 0 : i32
    %c0_i32_0 = arith.constant 0 : i32
    %c0_i32_1 = arith.constant 0 : i32
    %c0_i32_2 = arith.constant 0 : i32
    %c0_i32_3 = arith.constant 0 : i32
    return %c0_i32, %c0_i32_0, %c0_i32_1, %c0_i32_2 : i32, i32, i32, i32
  }
  func.func @transform_5(%arg0: i32) -> (i32, i32, i32, i32) {
    %c0_i32 = arith.constant 0 : i32
    %c0_i32_0 = arith.constant 0 : i32
    %c0_i32_1 = arith.constant 0 : i32
    %c0_i32_2 = arith.constant 0 : i32
    %c0_i32_3 = arith.constant 0 : i32
    return %c0_i32, %c0_i32_0, %c0_i32_1, %c0_i32_2 : i32, i32, i32, i32
  }
  func.func @transform_6(%arg0: i32) -> (i32, i32, i32, i32) {
    %c0_i32 = arith.constant 0 : i32
    %c0_i32_0 = arith.constant 0 : i32
    %c0_i32_1 = arith.constant 0 : i32
    %c0_i32_2 = arith.constant 0 : i32
    %c0_i32_3 = arith.constant 0 : i32
    return %c0_i32, %c0_i32_0, %c0_i32_1, %c0_i32_2 : i32, i32, i32, i32
  }
  func.func @transform_7(%arg0: i32) -> (i32, i32, i32, i32) {
    %c0_i32 = arith.constant 0 : i32
    %c0_i32_0 = arith.constant 0 : i32
    %c0_i32_1 = arith.constant 0 : i32
    %c0_i32_2 = arith.constant 0 : i32
    %c0_i32_3 = arith.constant 0 : i32
    return %c0_i32, %c0_i32_0, %c0_i32_1, %c0_i32_2 : i32, i32, i32, i32
  }
  func.func @transform_8(%arg0: i32) -> (i32, i32, i32, i32) {
    %c0_i32 = arith.constant 0 : i32
    %c0_i32_0 = arith.constant 0 : i32
    %c0_i32_1 = arith.constant 0 : i32
    %c0_i32_2 = arith.constant 0 : i32
    %c0_i32_3 = arith.constant 0 : i32
    return %c0_i32, %c0_i32_0, %c0_i32_1, %c0_i32_2 : i32, i32, i32, i32
  }
  func.func @transform_9(%arg0: i32) -> (i32, i32, i32, i32) {
    %c0_i32 = arith.constant 0 : i32
    %c0_i32_0 = arith.constant 0 : i32
    %c0_i32_1 = arith.constant 0 : i32
    %c0_i32_2 = arith.constant 0 : i32
    %c0_i32_3 = arith.constant 0 : i32
    return %c0_i32, %c0_i32_0, %c0_i32_1, %c0_i32_2 : i32, i32, i32, i32
  }
  func.func @transform_10(%arg0: i32) -> (i32, i32, i32, i32) {
    %c0_i32 = arith.constant 0 : i32
    %c0_i32_0 = arith.constant 0 : i32
    %c0_i32_1 = arith.constant 0 : i32
    %c0_i32_2 = arith.constant 0 : i32
    %c0_i32_3 = arith.constant 0 : i32
    return %c0_i32, %c0_i32_0, %c0_i32_1, %c0_i32_2 : i32, i32, i32, i32
  }
  func.func @transform_11(%arg0: i32) -> (i32, i32, i32) {
    %c0_i32 = arith.constant 0 : i32
    %c0_i32_0 = arith.constant 0 : i32
    %c0_i32_1 = arith.constant 0 : i32
    %c0_i32_2 = arith.constant 0 : i32
    return %c0_i32, %c0_i32_0, %c0_i32_1 : i32, i32, i32
  }
  func.func @transform_12(%arg0: i32) -> (i32, i32, i32) {
    %c0_i32 = arith.constant 0 : i32
    %c0_i32_0 = arith.constant 0 : i32
    %c0_i32_1 = arith.constant 0 : i32
    %c0_i32_2 = arith.constant 0 : i32
    return %c0_i32, %c0_i32_0, %c0_i32_1 : i32, i32, i32
  }
  func.func @transform_13(%arg0: i32) -> (i32, i32, i32) {
    %c0_i32 = arith.constant 0 : i32
    %c0_i32_0 = arith.constant 0 : i32
    %c0_i32_1 = arith.constant 0 : i32
    %c0_i32_2 = arith.constant 0 : i32
    return %c0_i32, %c0_i32_0, %c0_i32_1 : i32, i32, i32
  }
  func.func @transform_14(%arg0: i32) -> (i32, i32, i32) {
    %c0_i32 = arith.constant 0 : i32
    %c0_i32_0 = arith.constant 0 : i32
    %c0_i32_1 = arith.constant 0 : i32
    %c0_i32_2 = arith.constant 0 : i32
    return %c0_i32, %c0_i32_0, %c0_i32_1 : i32, i32, i32
  }
  func.func @transform_15(%arg0: i32) -> (i32, i32, i32) {
    %c0_i32 = arith.constant 0 : i32
    %c0_i32_0 = arith.constant 0 : i32
    %c0_i32_1 = arith.constant 0 : i32
    %c0_i32_2 = arith.constant 0 : i32
    return %c0_i32, %c0_i32_0, %c0_i32_1 : i32, i32, i32
  }
  func.func @transform_16(%arg0: i32) -> (i32, i32, i32) {
    %c0_i32 = arith.constant 0 : i32
    %c0_i32_0 = arith.constant 0 : i32
    %c0_i32_1 = arith.constant 0 : i32
    %c0_i32_2 = arith.constant 0 : i32
    return %c0_i32, %c0_i32_0, %c0_i32_1 : i32, i32, i32
  }
  func.func @transform_17(%arg0: i32) -> (i32, i32, i32) {
    %c0_i32 = arith.constant 0 : i32
    %c0_i32_0 = arith.constant 0 : i32
    %c0_i32_1 = arith.constant 0 : i32
    %c0_i32_2 = arith.constant 0 : i32
    return %c0_i32, %c0_i32_0, %c0_i32_1 : i32, i32, i32
  }
  func.func @transform_18(%arg0: i32) -> (i32, i32, i32) {
    %c0_i32 = arith.constant 0 : i32
    %c0_i32_0 = arith.constant 0 : i32
    %c0_i32_1 = arith.constant 0 : i32
    %c0_i32_2 = arith.constant 0 : i32
    return %c0_i32, %c0_i32_0, %c0_i32_1 : i32, i32, i32
  }
  func.func @transform_19(%arg0: i32) -> (i32, i32, i32) {
    %c0_i32 = arith.constant 0 : i32
    %c0_i32_0 = arith.constant 0 : i32
    %c0_i32_1 = arith.constant 0 : i32
    %c0_i32_2 = arith.constant 0 : i32
    return %c0_i32, %c0_i32_0, %c0_i32_1 : i32, i32, i32
  }
  func.func @transform_20(%arg0: i32) -> (i32, i32) {
    %c0_i32 = arith.constant 0 : i32
    %c0_i32_0 = arith.constant 0 : i32
    %c0_i32_1 = arith.constant 0 : i32
    return %c0_i32, %c0_i32_0 : i32, i32
  }
  func.func @transform_21(%arg0: i32) -> (i32, i32) {
    %c0_i32 = arith.constant 0 : i32
    %c0_i32_0 = arith.constant 0 : i32
    %c0_i32_1 = arith.constant 0 : i32
    return %c0_i32, %c0_i32_0 : i32, i32
  }
  func.func @transform_22(%arg0: i32) -> (i32, i32) {
    %c0_i32 = arith.constant 0 : i32
    %c0_i32_0 = arith.constant 0 : i32
    %c0_i32_1 = arith.constant 0 : i32
    return %c0_i32, %c0_i32_0 : i32, i32
  }
  func.func @transform_23(%arg0: i32) -> (i32, i32) {
    %c0_i32 = arith.constant 0 : i32
    %c0_i32_0 = arith.constant 0 : i32
    %c0_i32_1 = arith.constant 0 : i32
    return %c0_i32, %c0_i32_0 : i32, i32
  }
  func.func @transform_24(%arg0: i32) -> (i32, i32, i32) {
    %c0_i32 = arith.constant 0 : i32
    %c0_i32_0 = arith.constant 0 : i32
    %c0_i32_1 = arith.constant 0 : i32
    return %arg0, %c0_i32, %c0_i32_0 : i32, i32, i32
  }
}

</mosaic_0001>

<bundles_post_ra>
// kernel: bert_class_forward.1
= control target key start
LH: loop header
LB: loop body
LE: loop exit
PB: predicated region body
PF: predicated region fallthrough
CT: control target
= control target key end

     0   :  { %s6593_s0 = inlined_call_operand.vmem [shape: f32[2,8,128], index: 0, kind: input, shape index: {}]   ;;  %s6594_s1 = inlined_call_operand.vmem [shape: f32[2,1,8], index: 1, kind: input, shape index: {}]   ;;  %s6595_s2 = inlined_call_operand.vmem [shape: f32[1,128], index: 2, kind: input, shape index: {}]   ;;  %s6596_s3 = inlined_call_operand.vmem [shape: f32[1,128], index: 3, kind: input, shape index: {}]   ;;  %s6597_s4 = inlined_call_operand.vmem [shape: bf16[2,2,128,64], index: 4, kind: input, shape index: {}]   ;;  %s6598_s5 = inlined_call_operand.vmem [shape: f32[2,2,1,64], index: 5, kind: input, shape index: {}]   ;;  %s6599_s6 = inlined_call_operand.vmem [shape: bf16[2,2,128,64], index: 6, kind: input, shape index: {}]   ;;  %s6600_s7 = inlined_call_operand.vmem [shape: f32[2,2,1,64], index: 7, kind: input, shape index: {}]   ;;  %s6601_s8 = inlined_call_operand.vmem [shape: bf16[2,2,128,64], index: 8, kind: input, shape index: {}]   ;;  %s6602_s9 = inlined_call_operand.vmem [shape: f32[2,2,1,64], index: 9, kind: input, shape index: {}]   ;;  %s6603_s10 = inlined_call_operand.vmem [shape: bf16[2,2,64,128], index: 10, kind: input, shape index: {}]   ;;  %s6604_s11 = inlined_call_operand.vmem [shape: f32[2,1,128], index: 11, kind: input, shape index: {}]   ;;  %s6605_s12 = inlined_call_operand.vmem [shape: f32[2,1,128], index: 12, kind: input, shape index: {}]   ;;  %s6606_s13 = inlined_call_operand.vmem [shape: f32[2,1,128], index: 13, kind: input, shape index: {}]   ;;  %s6607_s14 = inlined_call_operand.vmem [shape: bf16[2,128,512], index: 14, kind: input, shape index: {}]   ;;  %s6608_s15 = inlined_call_operand.vmem [shape: f32[2,1,512], index: 15, kind: input, shape index: {}]   ;;  %s6609_s16 = inlined_call_operand.hbm [shape: bf16[2,512,128], index: 16, kind: input, shape index: {}]   ;;  %s6610_s17 = inlined_call_operand.vmem [shape: f32[2,1,128], index: 17, kind: input, shape index: {}]   ;;  %s6611_s18 = inlined_call_operand.vmem [shape: f32[2,1,128], index: 18, kind: input, shape index: {}]   ;;  %s6612_s19 = inlined_call_operand.vmem [shape: f32[2,1,128], index: 19, kind: input, shape index: {}]   ;;  %s6613_s20 = inlined_call_operand.vmem [shape: bf16[128,128], index: 20, kind: input, shape index: {}]   ;;  %s6614_s21 = inlined_call_operand.vmem [shape: f32[1,128], index: 21, kind: input, shape index: {}]   ;;  %s6615_s22 = inlined_call_operand.vmem [shape: bf16[128,128], index: 22, kind: input, shape index: {}]   ;;  %s6616_s23 = inlined_call_operand.vmem [shape: f32[1,128], index: 23, kind: input, shape index: {}]   ;;  %s6617_s24 = inlined_call_operand.vmem [shape: f32[2,8,128], index: 24, kind: output, shape index: {}]  }
   0x1   :  { %6625 = sst [smem:[#allocation6_spill]] %s6593_s0 }
   0x2   :  { %6626 = sst [smem:[#allocation7_spill]] %s6594_s1 }
   0x3   :  { %6627 = sst [smem:[#allocation8_spill]] %s6595_s2 }
   0x4   :  { %6628 = sst [smem:[#allocation9_spill]] %s6596_s3 }
   0x5   :  { %6629 = sst [smem:[#allocation10_spill]] %s6597_s4 }
   0x6   :  { %6630 = sst [smem:[#allocation11_spill]] %s6598_s5 }
   0x7   :  { %6631 = sst [smem:[#allocation12_spill]] %s6599_s6 }
   0x8   :  { %6632 = sst [smem:[#allocation13_spill]] %s6600_s7 }
   0x9   :  { %6633 = sst [smem:[#allocation14_spill]] %s6601_s8 }
   0xa   :  { %6634 = sst [smem:[#allocation15_spill]] %s6609_s16 }
   0xb   :  { %6635 = sst [smem:[#allocation16_spill]] %s6614_s21 }
   0xc   :  { %6636 = sst [smem:[#allocation17_spill]] %s6616_s23 }
   0xd   :  { %6637 = sst [smem:[#allocation18_spill]] %s6617_s24 }
   0xe   :  { %29 = vsyncpa [#allocation3], 0  ;;  %s5608_s5 = smov 0  }
   0xf LB: > { %6638 = sst [smem:[#allocation5_spill]] %s5477_s5  ;;  %s3820_s6 = sadd.s32 4294967295, %s5477_s5   ;;  %s5477_s5 = sphi %s5608_s5, %s35_s5  }
  0x10   : > { %s6639_s16 = sld [smem:[#allocation15_spill]]  ;;  %p3822_p0 = scmp.ge.s32.totalorder %s5477_s5, 1 }
  0x11   : > { %p580_p1 = scmp.lt.s32.totalorder %s5477_s5, 3  ;;  %p5347_p2 = scmp.eq.s32.totalorder %s3820_s6, 0 }
  0x12   : > { %s5479_s2 = smov [#allocation2]   ;;  %s5480_s0 = smov 64  }
  0x13   : > { %p581_p3 = pnand %p3822_p0, %p580_p1  ;;  %s635_s29 = sshll.u32 %s5479_s2, 4  ;;  %s636_s29 = int_to_ptr.vmem [resolvable:$true] %s635_s29 }
  0x14   : > { %s5481_s7 = smov 4  }
  0x15   : > { %p5343_p4 = pneg %p581_p3  ;;  %685 = sbr.rel (%p581_p3) target bundleno = 4194 (0x1062), region = 116 }
  0x16   : > { %s633_s28 = sshll.u32 %s6639_s16, 4  ;;  %s634_s28 = int_to_ptr.hbm [resolvable:$true] %s633_s28 }
  0x17   : > { %p5344_p5 = pnand %p5347_p2, %p5343_p4 }
  0x19   : > { %5346 = dma.hbm_to_vmem [thread:$0]  (!%p5344_p5), %s634_s28, 8192, %s636_s29, [#allocation3], %s5480_s0, %s5480_s0, %s5481_s7  }
  0x1a   : > { %5472 = dma.done.wait (%p5347_p2), [#allocation3], 8192  }
  0x1b   : > { %5474 = vsyncadd (%p5347_p2), [#allocation3], 4294959104  ;;  %p753_p6 = scmp.lt.s32.totalorder %s3820_s6, 1  ;;  %s6640_s8 = sld [smem:[#allocation6_spill]]  ;;  %v5482_v11 = vmov 128.0   ;;  %vm1055_vm4 = vcmask 523264  }
  0x1c   : > { %s6641_s27 = sld [smem:[#allocation10_spill]]  ;;  %5390 = vrcp.f32 %v5482_v11  ;;  %vm1092_vm5 = vcmask 1043456   ;;  %vm1075_vm6 = vcmask 64512  }
  0x1d   : > { %s6655_s6 = smov (!%p753_p6, %s3820_s6), 1  ;;  %s6642_s29 = sld [smem:[#allocation12_spill]] }
  0x1e   : > { %s6624_s30 = sshll.u32 %s6655_s6, 3  ;;  %s6643_s16 = sld [smem:[#allocation7_spill]] }
  0x1f   : > { %s6645_s2 = sld [smem:[#allocation8_spill]]  ;;  %s6651_s25 = sshll.u32 %s6655_s6, 3 }
  0x20   : > { %s6646_s3 = sld [smem:[#allocation9_spill]] }
  0x21   : > { %s756_s4 = scalar_lea.vmem %s6640_s8, %s6624_s30  ;;  %s6647_s1 = sld [smem:[#allocation13_spill]] }
  0x22   : > { %v5627_v0 = vld [vmem:[%s756_s4] sm:$0xff]  ;;  %v5090_v1 = vld [vmem:[%s6641_s27 + $0x38] sm:$0xff]  ;;  %v5089_v4 = vld [vmem:[%s6641_s27 + $0x30] sm:$0xff]  ;;  %s6644_s4 = sld [smem:[#allocation14_spill]]  ;;  %v5391_v15 = vpop.eup %5390 }
  0x23   : > { %v5098_v2 = vld [vmem:[%s6642_s29 + $0x38] sm:$0xff]  ;;  %769 = vadd.xlane.f32.xlu0 %v5627_v0  ;;  %875 = vmatpush.bf16.msra.mxu0 %v5090_v1  ;;  %v779_v3 = vmul.f32 %v5627_v0, %v5627_v0  ;;  %v5097_v5 = vld [vmem:[%s6642_s29 + $0x30] sm:$0xff]  ;;  %v5088_v6 = vld [vmem:[%s6641_s27 + $0x28] sm:$0xff]  ;;  %v772_v19 = vmul.f32 128.0, %v5391_v15  ;;  %vm776_vm0 = vweird.f32 %v5391_v15  ;;  %s6648_s28 = sld [smem:[#allocation11_spill]] }
  0x24   : > { %956 = vmatpush.bf16.msra.mxu1 %v5098_v2  ;;  %s5640_s5 = scalar_lea.vmem %s6643_s16, %s6655_s6  ;;  %v5096_v7 = vld [vmem:[%s6642_s29 + $0x28] sm:$0xff]  ;;  %v5087_v8 = vld [vmem:[%s6641_s27 + $0x20] sm:$0xff]  ;;  %v5086_v12 = vld [vmem:[%s6641_s27 + $0x18] sm:$0xff]  ;;  %s6649_s0 = sld [smem:[#allocation16_spill]] }
  0x25   : > { %v5095_v9 = vld [vmem:[%s6642_s29 + $0x20] sm:$0xff]  ;;  %v5094_v13 = vld [vmem:[%s6642_s29 + $0x18] sm:$0xff]  ;;  %v5085_v16 = vld [vmem:[%s6641_s27 + $0x10] sm:$0xff]  ;;  %v773_v23 = vsub.f32 1.0, %v772_v19  ;;  %s6652_s16 = sld [smem:[#allocation18_spill]] }
  0x26   : > { %v5093_v17 = vld [vmem:[%s6642_s29 + $0x10] sm:$0xff]  ;;  %v5084_v20 = vld [vmem:[%s6641_s27 + $0x8] sm:$0xff]  ;;  %v5083_v24 = vld [vmem:[%s6641_s27] sm:$0xff] }
  0x27   : > { %876 = vmatpush.bf16.msra.mxu0 %v5089_v4  ;;  %v5092_v21 = vld [vmem:[%s6642_s29 + $0x8] sm:$0xff]  ;;  %v5091_v25 = vld [vmem:[%s6642_s29] sm:$0xff]  ;;  %v5126_v27 = vld [vmem:[%s6642_s29 + $0x78] sm:$0xff]  ;;  %v774_v29 = vmul.f32 %v5391_v15, %v773_v23 }
  0x28   : > { %957 = vmatpush.bf16.msra.mxu1 %v5097_v5  ;;  %v5106_v10 = vld [vmem:[%s6644_s4 + $0x38] sm:$0xff]  ;;  %v5105_v14 = vld [vmem:[%s6644_s4 + $0x30] sm:$0xff]  ;;  %v5104_v18 = vld [vmem:[%s6644_s4 + $0x28] sm:$0xff] }
  0x29   : > { %1037 = vmatpush.bf16.msra.mxu2 %v5106_v10  ;;  %v5103_v22 = vld [vmem:[%s6644_s4 + $0x20] sm:$0xff]  ;;  %v5102_v26 = vld [vmem:[%s6644_s4 + $0x18] sm:$0xff]  ;;  %v5101_v30 = vld [vmem:[%s6644_s4 + $0x10] sm:$0xff]  ;;  %v775_v33 = vadd.f32 %v5391_v15, %v774_v29 }
  0x2a   : > { %v5134_v28 = vld [vmem:[%s6644_s4 + $0x78] sm:$0xff]  ;;  %v5125_v31 = vld [vmem:[%s6642_s29 + $0x70] sm:$0xff]  ;;  %v5100_v35 = vld [vmem:[%s6644_s4 + $0x8] sm:$0xff] }
  0x2b   : > { %780 = vadd.xlane.f32.xlu0 %v779_v3  ;;  %877 = vmatpush.bf16.msra.mxu0 %v5088_v6  ;;  %v5133_v32 = vld [vmem:[%s6644_s4 + $0x70] sm:$0xff]  ;;  %v5124_v36 = vld [vmem:[%s6642_s29 + $0x68] sm:$0xff]  ;;  %v5725_v38 = vsel %vm776_vm0, %v5391_v15, %v775_v33  ;;  %v5099_v39 = vld [vmem:[%s6644_s4] sm:$0xff]  ;;  %s763_s24 = scalar_lea.vmem %s6652_s16, %s6651_s25 }
  0x2c   : > { %958 = vmatpush.bf16.msra.mxu1 %v5096_v7  ;;  %v5132_v37 = vld [vmem:[%s6644_s4 + $0x68] sm:$0xff]  ;;  %v5123_v40 = vld [vmem:[%s6642_s29 + $0x60] sm:$0xff]  ;;  %v5122_v46 = vld [vmem:[%s6642_s29 + $0x58] sm:$0xff] }
  0x2d   : > { %1038 = vmatpush.bf16.msra.mxu2 %v5105_v14  ;;  %v5131_v41 = vld [vmem:[%s6644_s4 + $0x60] sm:$0xff]  ;;  %v5130_v47 = vld [vmem:[%s6644_s4 + $0x58] sm:$0xff]  ;;  %v5121_v49 = vld [vmem:[%s6642_s29 + $0x50] sm:$0xff] }
  0x2e   : > { %v5129_v50 = vld [vmem:[%s6644_s4 + $0x50] sm:$0xff]  ;;  %v5120_v52 = vld [vmem:[%s6642_s29 + $0x48] sm:$0xff]  ;;  %v5119_v54 = vld [vmem:[%s6642_s29 + $0x40] sm:$0xff] }
  0x2f   : > { %878 = vmatpush.bf16.msra.mxu0 %v5087_v8  ;;  %v5128_v53 = vld [vmem:[%s6644_s4 + $0x48] sm:$0xff]  ;;  %v5127_v55 = vld [vmem:[%s6644_s4 + $0x40] sm:$0xff] }
  0x30   : > { %959 = vmatpush.bf16.msra.mxu1 %v5095_v9  ;;  %v5361_v63 = vld [vmem:[%s6645_s2] ss:$0 sm:$0xff]  ;;  %v5367_v23 = vld [vmem:[%s6602_s9 + $0x1] ss:$0 sm:$0xff] }
  0x31   : > { %1039 = vmatpush.bf16.msra.mxu2 %v5104_v18  ;;  %v5362_v2 = vld [vmem:[%s6646_s3] ss:$0 sm:$0xff]  ;;  %s6650_s3 = sld [smem:[#allocation17_spill]] }
  0x32   : > { %v5363_v10 = vld [vmem:[%s6648_s28] ss:$0 sm:$0xff] }
  0x33   : > { %879 = vmatpush.bf16.msra.mxu0 %v5086_v12  ;;  %v5365_v12 = vld [vmem:[%s6602_s9] ss:$0 sm:$0xff] }
  0x34   : > { %960 = vmatpush.bf16.msra.mxu1 %v5094_v13 }
  0x35   : > { %1040 = vmatpush.bf16.msra.mxu2 %v5103_v22  ;;  %v5366_v22 = vld [vmem:[%s6647_s1 + $0x1] ss:$0 sm:$0xff] }
  0x37   : > { %880 = vmatpush.bf16.msra.mxu0 %v5085_v16 }
  0x38   : > { %961 = vmatpush.bf16.msra.mxu1 %v5093_v17 }
  0x39   : > { %1041 = vmatpush.bf16.msra.mxu2 %v5102_v26 }
  0x3b   : > { %881 = vmatpush.bf16.msra.mxu0 %v5084_v20 }
  0x3c   : > { %962 = vmatpush.bf16.msra.mxu1 %v5092_v21 }
  0x3d   : > { %1042 = vmatpush.bf16.msra.mxu2 %v5101_v30 }
  0x3f   : > { %882 = vmatpush.bf16.msra.mxu0 %v5083_v24 }
  0x40   : > { %963 = vmatpush.bf16.msra.mxu1 %v5091_v25 }
  0x41   : > { %1043 = vmatpush.bf16.msra.mxu2 %v5100_v35  ;;  %v5368_v35 = vld [vmem:[%s5640_s5] ss:$0 sm:$0xff] }
  0x43   : > { %1271 = vmatpush.bf16.msrb.mxu0 %v5126_v27 }
  0x44   : > { %1354 = vmatpush.bf16.msrb.mxu1 %v5134_v28 }
  0x45   : > { %1044 = vmatpush.bf16.msra.mxu2 %v5099_v39 }
  0x47   : > { %1272 = vmatpush.bf16.msrb.mxu0 %v5125_v31 }
  0x48   : > { %1355 = vmatpush.bf16.msrb.mxu1 %v5133_v32 }
  0x4b   : > { %1273 = vmatpush.bf16.msrb.mxu0 %v5124_v36 }
  0x4c   : > { %1356 = vmatpush.bf16.msrb.mxu1 %v5132_v37 }
  0x4f   : > { %1274 = vmatpush.bf16.msrb.mxu0 %v5123_v40 }
  0x50   : > { %1357 = vmatpush.bf16.msrb.mxu1 %v5131_v41  ;;  %v5118_v41 = vld [vmem:[%s6641_s27 + $0x78] sm:$0xff] }
  0x53   : > { %1275 = vmatpush.bf16.msrb.mxu0 %v5122_v46 }
  0x54   : > { %1358 = vmatpush.bf16.msrb.mxu1 %v5130_v47  ;;  %v5117_v47 = vld [vmem:[%s6641_s27 + $0x70] sm:$0xff] }
  0x57   : > { %1276 = vmatpush.bf16.msrb.mxu0 %v5121_v49  ;;  %v5115_v49 = vld [vmem:[%s6641_s27 + $0x60] sm:$0xff] }
  0x58   : > { %1359 = vmatpush.bf16.msrb.mxu1 %v5129_v50  ;;  %v5114_v50 = vld [vmem:[%s6641_s27 + $0x58] sm:$0xff] }
  0x5b   : > { %1277 = vmatpush.bf16.msrb.mxu0 %v5120_v52  ;;  %v5112_v52 = vld [vmem:[%s6641_s27 + $0x48] sm:$0xff] }
  0x5c   : > { %1360 = vmatpush.bf16.msrb.mxu1 %v5128_v53  ;;  %v5111_v53 = vld [vmem:[%s6641_s27 + $0x40] sm:$0xff] }
  0x5f   : > { %1278 = vmatpush.bf16.msrb.mxu0 %v5119_v54  ;;  %v5110_v54 = vld [vmem:[%s6603_s10 + $0x18] sm:$0xff] }
  0x60   : > { %1361 = vmatpush.bf16.msrb.mxu1 %v5127_v55  ;;  %v5109_v55 = vld [vmem:[%s6603_s10 + $0x10] sm:$0xff] }
  0x96   : > { %v770_v34 = vpop.xlane.xlu0 %769 }
  0x97   : > { %v778_v42 = vmul.f32 %v5725_v38, %v770_v34 }
  0x99   : > { %v783_v44 = vmul.f32 %v778_v42, %v778_v42  ;;  %v785_v62 = vsub.f32 %v5627_v0, %v778_v42  ;;  %v5364_v0 = vld [vmem:[%s6647_s1] ss:$0 sm:$0xff] }
  0x9e   : > { %v781_v43 = vpop.xlane.xlu0 %780 }
  0x9f   : > { %v782_v45 = vmul.f32 %v781_v43, %v5725_v38 }
  0xa1   : > { %v784_v48 = vsub.f32 %v782_v45, %v783_v44 }
  0xa3   : > { %v786_v51 = vadd.f32 1e-12, %v784_v48  ;;  %v5116_v48 = vld [vmem:[%s6641_s27 + $0x68] sm:$0xff] }
  0xa5   : > { %5392 = vrsqrt.f32 %v786_v51  ;;  %vm793_vm2 = vweird.f32 %v786_v51 }
  0xab   : > { %v5393_v56 = vpop.eup %5392 }
  0xac   : > { %v788_v57 = vmul.f32 %v5393_v56, %v786_v51  ;;  %vm794_vm1 = vweird.f32 %v5393_v56  ;;  %v5113_v51 = vld [vmem:[%s6641_s27 + $0x50] sm:$0xff] }
  0xad   : > { %vm795_vm3 = vmor %vm793_vm2, %vm794_vm1 }
  0xae   : > { %v789_v58 = vmul.f32 %v5393_v56, %v788_v57  ;;  %v5108_v57 = vld [vmem:[%s6603_s10 + $0x8] sm:$0xff] }
  0xb0   : > { %v790_v59 = vmul.f32 0.5, %v789_v58 }
  0xb2   : > { %v791_v60 = vsub.f32 1.5, %v790_v59 }
  0xb4   : > { %v792_v61 = vmul.f32 %v5393_v56, %v791_v60 }
  0xb6   : > { %v796_v1 = vsel %vm795_vm3, %v5393_v56, %v792_v61  ;;  %v5107_v61 = vld [vmem:[%s6603_s10] sm:$0xff] }
  0xb7   : > { %v797_v3 = vmul.f32 %v796_v1, %v785_v62 }
  0xb9   : > { %v801_v4 = vmul.f32 %v5361_v63, %v797_v3 }
  0xbb   : > { %v5769_v5 = vadd.f32 %v5362_v2, %v801_v4  ;;  %v5369_v2 = vld [vmem:[%s6648_s28 + $0x1] ss:$0 sm:$0xff] }
  0xbd   : > { %v5773_v6 = vpack.c.bf16 %v5769_v5, %v5769_v5 }
  0xbf   : > { %883 = vmatmul.bf16.vlgmr.msra.gmra.mxu0 %v5773_v6  ;;  %964 = vmatmul.bf16.vlgmr.msra.gmra.mxu1 %v5773_v6 }
  0xc0   : > { %1045 = vmatmul.bf16.vlgmr.msra.gmra.mxu2 %v5773_v6  ;;  %1501 = vmatpush.bf16.msra.mxu1 %v5110_v54  ;;  %v5166_v54 = vld [vmem:[%s6607_s14 + $0xd4] sm:$0xf0] }
  0xc4   : > { %1502 = vmatpush.bf16.msra.mxu1 %v5109_v55 }
  0xc8   : > { %1503 = vmatpush.bf16.msra.mxu1 %v5108_v57  ;;  %v5164_v57 = vld [vmem:[%s6607_s14 + $0xcc] sm:$0xf] }
  0xcc   : > { %1504 = vmatpush.bf16.msra.mxu1 %v5107_v61  ;;  %v5161_v61 = vld [vmem:[%s6607_s14 + $0xac] sm:$0xf0] }
  0xcf   : > { %1279 = vmatmul.bf16.vlgmr.msrb.gmra.mxu0 %v5773_v6  ;;  %1362 = vmatmul.bf16.vlgmr.msrb.gmra.mxu1 %v5773_v6 }
 0x13c   : > { %v884_v7 = vpop.f32.mrf.mxu0  ;;  %v965_v8 = vpop.f32.mrf.mxu1 }
 0x13d   : > { %v966_v9 = vadd.f32 %v5364_v0, %v965_v8  ;;  %v885_v14 = vadd.f32 %v5363_v10, %v884_v7 }
 0x13f   : > { %v1051_v11 = vpack.c.bf16 %v966_v9, %v966_v9  ;;  %v1050_v20 = vpack.c.bf16 %v885_v14, %v885_v14 }
 0x141   : > { %v1060_v13 = vsel %vm1055_vm4, %v1051_v11, 0 }
 0x142   : > { %1069 = vmatpush.bf16.xpose.msrb.mxu2 %v1060_v13 }
 0x143   : > { %v1046_v15 = vpop.f32.mrf.mxu2 }
 0x144   : > { %v1047_v16 = vadd.f32 %v5365_v12, %v1046_v15  ;;  %v886_v17 = vpop.f32.mrf.mxu0  ;;  %v967_v18 = vpop.f32.mrf.mxu1 }
 0x145   : > { %v5138_v18 = vld [vmem:[%s6603_s10 + $0x38] sm:$0xff] }
 0x146   : > { %v1088_v19 = vpack.c.bf16 %v1047_v16, %v1047_v16 }
 0x148   : > { %v1094_v21 = vsel %vm1092_vm5, %v1088_v19, 0  ;;  %v5137_v19 = vld [vmem:[%s6603_s10 + $0x30] sm:$0xff] }
 0x149   : > { %1103 = vmatpush.bf16.msra.mxu3 %v1094_v21  ;;  %3925 = vmatmul.msk.bf16.vlgmr.msrb.gmra.mxu2 %vm1055_vm4, %v1050_v20  ;;  %v5136_v20 = vld [vmem:[%s6603_s10 + $0x28] sm:$0xff] }
 0x14b   : > { %v1048_v24 = vpop.f32.mrf.mxu2 }
 0x14c   : > { %v1280_v25 = vpop.f32.mrf.mxu0  ;;  %v1363_v26 = vpop.f32.mrf.mxu1 }
 0x14d   : > { %v1281_v27 = vadd.f32 %v5366_v22, %v1280_v25  ;;  %v1364_v28 = vadd.f32 %v5367_v23, %v1363_v26  ;;  %1188 = vmatpush.bf16.msrb.mxu3 %v5118_v41  ;;  %v5135_v25 = vld [vmem:[%s6603_s10 + $0x20] sm:$0xff]  ;;  %v4240_v41 = vld [vmem:[%s6607_s14 + $0xe8] sm:$0xf] }
 0x14f   : > { %v1368_v29 = vpack.c.bf16 %v1281_v27, %v1281_v27  ;;  %v1400_v30 = vpack.c.bf16 %v1364_v28, %v1364_v28 }
 0x151   : > { %v1373_v31 = vsel %vm1055_vm4, %v1368_v29, 0  ;;  %v1405_v32 = vsel %vm1092_vm5, %v1400_v30, 0  ;;  %1189 = vmatpush.bf16.msrb.mxu3 %v5117_v47  ;;  %v5370_v29 = vld [vmem:[%s6604_s11] ss:$0 sm:$0xff] }
 0x152   : > { %1382 = vmatpush.bf16.xpose.msra.mxu2 %v1373_v31 }
 0x154   : > { %v1282_v33 = vpop.f32.mrf.mxu0  ;;  %v1365_v34 = vpop.f32.mrf.mxu1 }
 0x155   : > { %1190 = vmatpush.bf16.msrb.mxu3 %v5116_v48  ;;  %v4216_v48 = vld [vmem:[%s6607_s14 + $0xc0] sm:$0xf] }
 0x159   : > { %1191 = vmatpush.bf16.msrb.mxu3 %v5115_v49  ;;  %v5165_v49 = vld [vmem:[%s6607_s14 + $0xcc] sm:$0xf0] }
 0x15a   : > { %1414 = vmatpush.bf16.msrb.mxu2 %v1405_v32 }
 0x15d   : > { %1192 = vmatpush.bf16.msrb.mxu3 %v5114_v50  ;;  %v5163_v50 = vld [vmem:[%s6607_s14 + $0xc4] sm:$0xf] }
 0x161   : > { %1193 = vmatpush.bf16.msrb.mxu3 %v5113_v51  ;;  %v4217_v51 = vor.u32 %v5165_v49, %v4216_v48  ;;  %v5143_v48 = vld [vmem:[%s6607_s14 + $0x24] sm:$0xf] }
 0x165   : > { %1194 = vmatpush.bf16.msrb.mxu3 %v5112_v52  ;;  %v4218_v52 = vld [vmem:[%s6607_s14 + $0xd0] sm:$0xf0] }
 0x166   : > { %v4221_v55 = vor.u32 %v5163_v50, %v4218_v52  ;;  %v4138_v50 = vld [vmem:[%s6607_s14 + $0x30] sm:$0xf0]  ;;  %v5146_v52 = vld [vmem:[%s6607_s14 + $0x34] sm:$0xf0] }
 0x169   : > { %1195 = vmatpush.bf16.msrb.mxu3 %v5111_v53  ;;  %v4224_v53 = vld [vmem:[%s6607_s14 + $0xc8] sm:$0xf] }
 0x1cc   : > { %v1071_v36 = vpop.f32.mrf.mxu2 }
 0x1cd   : > { %v1072_v37 = vadd.f32 %v5368_v35, %v1071_v36  ;;  %v4232_v36 = vld [vmem:[%s6607_s14 + $0xe0] sm:$0xf] }
 0x1cf   : > { %v1076_v39 = vsel %vm1075_vm6, %v1072_v37, -inf }
 0x1d0   : > { %1077 = vmax.xlane.f32.xlu1 %v1076_v39 }
 0x1d4   : > { %v1073_v40 = vpop.f32.mrf.mxu2 }
 0x1d5   : > { %v4234_v40 = vld [vmem:[%s6607_s14 + $0xf0] sm:$0xf0] }
 0x243   : > { %v1078_v42 = vpop.xlane.xlu1 %1077 }
 0x244   : > { %v1079_v43 = vsub.f32 %v1072_v37, %v1078_v42  ;;  %v5169_v37 = vld [vmem:[%s6607_s14 + $0xec] sm:$0xf0]  ;;  %v5170_v42 = vld [vmem:[%s6607_s14 + $0xf4] sm:$0xf0] }
 0x245   : > { %v4233_v39 = vor.u32 %v5169_v37, %v4232_v36  ;;  %v5147_v36 = vld [vmem:[%s6607_s14 + $0x44] sm:$0xf] }
 0x246   : > { %v1080_v44 = vmul.f32 1.442695, %v1079_v43 }
 0x247   : > { %1751 = vmatpush.bf16.msrb.mxu1 %v4233_v39  ;;  %v4160_v39 = vld [vmem:[%s6607_s14 + $0x48] sm:$0xf] }
 0x248   : > { %5394 = vpow2.f32 %v1080_v44  ;;  %v4241_v44 = vor.u32 %v5170_v42, %v4240_v41 }
 0x24b   : > { %1752 = vmatpush.bf16.msrb.mxu1 %v4217_v51  ;;  %v4144_v51 = vld [vmem:[%s6607_s14 + $0x28] sm:$0xf] }
 0x24e   : > { %v5395_v45 = vpop.eup %5394 }
 0x24f   : > { %v1082_v46 = vsel %vm1075_vm6, %v5395_v45, 0.0 }
 0x250   : > { %1083 = vadd.xlane.f32.xlu1 %v1082_v46  ;;  %v4242_v46 = vld [vmem:[%s6607_s14 + $0xf8] sm:$0xf0] }
 0x2c3   : > { %v1084_v56 = vpop.xlane.xlu1 %1083 }
 0x2c4   : > { %5396 = vrcp.f32 %v1084_v56  ;;  %v4225_v56 = vor.u32 %v5166_v54, %v4224_v53  ;;  %v4141_v53 = vor.u32 %v5143_v48, %v4138_v50  ;;  %v4145_v54 = vor.u32 %v5146_v52, %v4144_v51  ;;  %v5182_v48 = vld [vmem:[#allocation2 + $0x58] sm:$0xff]  ;;  %v5172_v50 = vld [vmem:[#allocation2 + $0x8] sm:$0xff]  ;;  %v5181_v52 = vld [vmem:[#allocation2 + $0x50] sm:$0xff] }
 0x2c5   : > { %v5196_v51 = vld [vmem:[#allocation2 + $0xc8] sm:$0xff] }
 0x2ca   : > { %v5397_v58 = vpop.eup %5396 }
 0x2cb   : > { %v1086_v59 = vmul.f32 %v5397_v58, %v5395_v45  ;;  %v5168_v45 = vld [vmem:[%s6607_s14 + $0xec] sm:$0xf]  ;;  %v4226_v58 = vld [vmem:[%s6607_s14 + $0xd8] sm:$0xf0] }
 0x2cc   : > { %v4245_v47 = vor.u32 %v5168_v45, %v4242_v46  ;;  %v4136_v46 = vld [vmem:[%s6607_s14 + $0x20] sm:$0xf] }
 0x2cd   : > { %v1087_v60 = vpack.c.bf16 %v1086_v59, %v1086_v59  ;;  %v4229_v59 = vor.u32 %v5164_v57, %v4226_v58  ;;  %v4120_v57 = vld [vmem:[%s6607_s14] sm:$0xf] }
 0x2ce   : > { %1790 = vmatpush.bf16.msra.mxu0 %v4245_v47  ;;  %v5145_v47 = vld [vmem:[%s6607_s14 + $0x2c] sm:$0xf0] }
 0x2cf   : > { %3926 = vmatmul.msk.bf16.vlgmr.msra.gmra.mxu3 %vm1075_vm6, %v1087_v60  ;;  %v4200_v60 = vld [vmem:[%s6607_s14 + $0xa0] sm:$0xf]  ;;  %v4137_v49 = vor.u32 %v5145_v47, %v4136_v46  ;;  %v5173_v46 = vld [vmem:[#allocation2 + $0x10] sm:$0xff] }
 0x2d0   : > { %1461 = vmatpush.bf16.msra.mxu3 %v5138_v18  ;;  %v5156_v18 = vld [vmem:[%s6607_s14 + $0x8c] sm:$0xf]  ;;  %v5197_v47 = vld [vmem:[#allocation2 + $0xd0] sm:$0xff] }
 0x2d2   : > { %1791 = vmatpush.bf16.msra.mxu0 %v4229_v59  ;;  %v5141_v59 = vld [vmem:[%s6607_s14 + $0xc] sm:$0xf0] }
 0x2d4   : > { %1462 = vmatpush.bf16.msra.mxu3 %v5137_v19  ;;  %v4194_v19 = vld [vmem:[%s6607_s14 + $0x98] sm:$0xf0] }
 0x2d8   : > { %1463 = vmatpush.bf16.msra.mxu3 %v5136_v20  ;;  %v4197_v20 = vor.u32 %v5156_v18, %v4194_v19 }
 0x2dc   : > { %1464 = vmatpush.bf16.msra.mxu3 %v5135_v25  ;;  %v4170_v25 = vld [vmem:[%s6607_s14 + $0x70] sm:$0xf0] }
 0x2df   : > { %1196 = vmatmul.bf16.vlgmr.msrb.gmra.mxu3 %v5773_v6 }
 0x2e0   : > { %1777 = vmatpush.bf16.msrb.mxu3 %v4241_v44  ;;  %v4162_v44 = vld [vmem:[%s6607_s14 + $0x58] sm:$0xf0] }
 0x2e4   : > { %1778 = vmatpush.bf16.msrb.mxu3 %v4225_v56  ;;  %v4146_v56 = vld [vmem:[%s6607_s14 + $0x38] sm:$0xf0] }
 0x352   : > { %v1105_v62 = vpop.f32.mrf.mxu3 }
 0x353   : > { %v1109_v63 = vpack.c.bf16 %v1105_v62, %v1105_v62  ;;  %v5159_v62 = vld [vmem:[%s6607_s14 + $0xa4] sm:$0xf] }
 0x355   : > { %4117 = vmatmul.msk.bf16.vlgmr.msra.gmra.mxu1 %vm1055_vm4, %v1109_v63  ;;  %v4201_v63 = vor.u32 %v5161_v61, %v4200_v60  ;;  %v5139_v60 = vld [vmem:[%s6607_s14 + $0x4] sm:$0xf]  ;;  %v4122_v61 = vld [vmem:[%s6607_s14 + $0x10] sm:$0xf0] }
 0x357   : > { %1753 = vmatpush.bf16.msrb.mxu1 %v4201_v63  ;;  %v4125_v63 = vor.u32 %v5139_v60, %v4122_v61  ;;  %v5187_v60 = vld [vmem:[#allocation2 + $0x80] sm:$0xff] }
 0x35a   : > { %v1107_v1 = vpop.f32.mrf.mxu3 }
 0x35b   : > { %v4202_v1 = vld [vmem:[%s6607_s14 + $0xb0] sm:$0xf0] }
 0x362   : > { %v1197_v3 = vpop.f32.mrf.mxu3 }
 0x363   : > { %v1198_v4 = vadd.f32 %v5369_v2, %v1197_v3  ;;  %v4208_v2 = vld [vmem:[%s6607_s14 + $0xa8] sm:$0xf]  ;;  %v5162_v3 = vld [vmem:[%s6607_s14 + $0xb4] sm:$0xf0] }
 0x365   : > { %v1367_v0 = vpack.c.bf16 %v1198_v4, %v1198_v4  ;;  %v4205_v4 = vor.u32 %v5159_v62, %v4202_v1  ;;  %v4121_v62 = vor.u32 %v5141_v59, %v4120_v57  ;;  %v4128_v1 = vld [vmem:[%s6607_s14 + $0x8] sm:$0xf]  ;;  %v5179_v59 = vld [vmem:[#allocation2 + $0x40] sm:$0xff] }
 0x366   : > { %v5188_v57 = vld [vmem:[#allocation2 + $0x88] sm:$0xff] }
 0x367   : > { %4074 = vmatmul.msk.bf16.vlgmr.msra.gmra.mxu2 %vm1055_vm4, %v1367_v0  ;;  %v4209_v0 = vor.u32 %v5162_v3, %v4208_v2  ;;  %v5142_v2 = vld [vmem:[%s6607_s14 + $0x14] sm:$0xf0]  ;;  %v5140_v3 = vld [vmem:[%s6607_s14 + $0xc] sm:$0xf] }
 0x369   : > { %1779 = vmatpush.bf16.msrb.mxu3 %v4209_v0  ;;  %v4130_v0 = vld [vmem:[%s6607_s14 + $0x18] sm:$0xf0] }
 0x36a   : > { %v1199_v6 = vpop.f32.mrf.mxu3 }
 0x36b   : > { %v5160_v6 = vld [vmem:[%s6607_s14 + $0xac] sm:$0xf] }
 0x3d2   : > { %v1506_v7 = vpop.f32.mrf.mxu1 }
 0x3da   : > { %v1508_v8 = vpop.f32.mrf.mxu1 }
 0x3ea   : > { %v1384_v9 = vpop.f32.mrf.mxu2 }
 0x3eb   : > { %v1385_v10 = vadd.f32 %v5368_v35, %v1384_v9  ;;  %v4184_v9 = vld [vmem:[%s6607_s14 + $0x80] sm:$0xf] }
 0x3ed   : > { %v1388_v11 = vsel %vm1075_vm6, %v1385_v10, -inf }
 0x3ee   : > { %1389 = vmax.xlane.f32.xlu2 %v1388_v11  ;;  %v5155_v11 = vld [vmem:[%s6607_s14 + $0x84] sm:$0xf] }
 0x3f2   : > { %v1386_v12 = vpop.f32.mrf.mxu2 }
 0x461   : > { %v1390_v13 = vpop.xlane.xlu2 %1389 }
 0x462   : > { %v1391_v14 = vsub.f32 %v1385_v10, %v1390_v13  ;;  %v5157_v10 = vld [vmem:[%s6607_s14 + $0x8c] sm:$0xf0]  ;;  %v4186_v13 = vld [vmem:[%s6607_s14 + $0x90] sm:$0xf0] }
 0x463   : > { %v4185_v12 = vor.u32 %v5157_v10, %v4184_v9 }
 0x464   : > { %v1392_v15 = vmul.f32 1.442695, %v1391_v14  ;;  %v4192_v14 = vld [vmem:[%s6607_s14 + $0x88] sm:$0xf] }
 0x465   : > { %1754 = vmatpush.bf16.msrb.mxu1 %v4185_v12  ;;  %v5178_v12 = vld [vmem:[#allocation2 + $0x38] sm:$0xff] }
 0x466   : > { %5398 = vpow2.f32 %v1392_v15  ;;  %v5158_v15 = vld [vmem:[%s6607_s14 + $0x94] sm:$0xf0] }
 0x46c   : > { %v5399_v16 = vpop.eup %5398 }
 0x46d   : > { %v1394_v17 = vsel %vm1075_vm6, %v5399_v16, 0.0 }
 0x46e   : > { %1395 = vadd.xlane.f32.xlu2 %v1394_v17  ;;  %v4193_v17 = vor.u32 %v5158_v15, %v4192_v14  ;;  %v5177_v15 = vld [vmem:[#allocation2 + $0x30] sm:$0xff] }
 0x470   : > { %1780 = vmatpush.bf16.msrb.mxu3 %v4193_v17 }
 0x4e1   : > { %v1396_v21 = vpop.xlane.xlu2 %1395 }
 0x4e2   : > { %5400 = vrcp.f32 %v1396_v21  ;;  %v4168_v21 = vld [vmem:[%s6607_s14 + $0x60] sm:$0xf] }
 0x4e8   : > { %v5401_v22 = vpop.eup %5400 }
 0x4e9   : > { %v1398_v23 = vmul.f32 %v5401_v22, %v5399_v16  ;;  %v4189_v16 = vor.u32 %v5155_v11, %v4186_v13  ;;  %v5153_v22 = vld [vmem:[%s6607_s14 + $0x6c] sm:$0xf0]  ;;  %v5202_v13 = vld [vmem:[#allocation2 + $0xf8] sm:$0xff] }
 0x4eb   : > { %v1399_v24 = vpack.c.bf16 %v1398_v23, %v1398_v23  ;;  %v5151_v23 = vld [vmem:[%s6607_s14 + $0x64] sm:$0xf] }
 0x4ed   : > { %4075 = vmatmul.msk.bf16.vlgmr.msrb.gmra.mxu2 %vm1075_vm6, %v1399_v24  ;;  %v4169_v24 = vor.u32 %v5153_v22, %v4168_v21 }
 0x4ef   : > { %1755 = vmatpush.bf16.msrb.mxu1 %v4169_v24 }
 0x570   : > { %v1416_v26 = vpop.f32.mrf.mxu2 }
 0x571   : > { %v1420_v27 = vpack.c.bf16 %v1416_v26, %v1416_v26  ;;  %v4176_v26 = vld [vmem:[%s6607_s14 + $0x68] sm:$0xf] }
 0x573   : > { %4100 = vmatmul.msk.bf16.vlgmr.msra.gmra.mxu3 %vm1055_vm4, %v1420_v27  ;;  %v5154_v27 = vld [vmem:[%s6607_s14 + $0x74] sm:$0xf0] }
 0x578   : > { %v1418_v28 = vpop.f32.mrf.mxu2 }
 0x579   : > { %v4173_v28 = vor.u32 %v5151_v23, %v4170_v25  ;;  %v5371_v25 = vld [vmem:[%s6605_s12] ss:$0 sm:$0xff] }
 0x5f6   : > { %v1466_v30 = vpop.f32.mrf.mxu3 }
 0x5f7   : > { %v1507_v31 = vadd.f32 %v1506_v7, %v1466_v30  ;;  %v4210_v7 = vld [vmem:[%s6607_s14 + $0xb8] sm:$0xf0]  ;;  %v5152_v30 = vld [vmem:[%s6607_s14 + $0x6c] sm:$0xf] }
 0x5f8   : > { %v4213_v8 = vor.u32 %v5160_v6, %v4210_v7  ;;  %v4133_v7 = vor.u32 %v5140_v3, %v4130_v0 }
 0x5f9   : > { %v1514_v32 = vadd.f32 %v5370_v29, %v1507_v31  ;;  %v4177_v29 = vor.u32 %v5154_v27, %v4176_v26  ;;  %v4178_v31 = vld [vmem:[%s6607_s14 + $0x78] sm:$0xf0] }
 0x5fa   : > { %1792 = vmatpush.bf16.msra.mxu0 %v4213_v8 }
 0x5fb   : > { %v5866_v33 = vadd.f32 %v1514_v32, %v5769_v5  ;;  %v5167_v5 = vld [vmem:[%s6607_s14 + $0xe4] sm:$0xf]  ;;  %v4181_v32 = vor.u32 %v5152_v30, %v4178_v31  ;;  %1781 = vmatpush.bf16.msrb.mxu3 %v4177_v29 }
 0x5fc   : > { %v4237_v43 = vor.u32 %v5167_v5, %v4234_v40  ;;  %v4154_v5 = vld [vmem:[%s6607_s14 + $0x50] sm:$0xf0]  ;;  %v5150_v40 = vld [vmem:[%s6607_s14 + $0x54] sm:$0xf0] }
 0x5fd   : > { %1518 = vadd.xlane.f32.xlu0 %v5866_v33  ;;  %v1521_v34 = vmul.f32 %v5866_v33, %v5866_v33  ;;  %v4157_v41 = vor.u32 %v5147_v36, %v4154_v5  ;;  %v4161_v42 = vor.u32 %v5150_v40, %v4160_v39  ;;  %v5185_v36 = vld [vmem:[#allocation2 + $0x70] sm:$0xff]  ;;  %v5175_v5 = vld [vmem:[#allocation2 + $0x20] sm:$0xff]  ;;  %v5184_v40 = vld [vmem:[#allocation2 + $0x68] sm:$0xff] }
 0x5fe   : > { %v1468_v35 = vpop.f32.mrf.mxu3  ;;  %1764 = vmatpush.bf16.msra.mxu2 %v4237_v43  ;;  %1793 = vmatpush.bf16.msra.mxu0 %v4197_v20  ;;  %v5148_v43 = vld [vmem:[%s6607_s14 + $0x4c] sm:$0xf]  ;;  %v5199_v39 = vld [vmem:[#allocation2 + $0xe0] sm:$0xff] }
 0x5ff   : > { %1522 = vadd.xlane.f32.xlu1 %v1521_v34  ;;  %v4152_v34 = vld [vmem:[%s6607_s14 + $0x40] sm:$0xf]  ;;  %v5149_v35 = vld [vmem:[%s6607_s14 + $0x4c] sm:$0xf0]  ;;  %v4165_v45 = vor.u32 %v5148_v43, %v4162_v44  ;;  %1782 = vmatpush.bf16.msrb.mxu3 %v4161_v42  ;;  %v5174_v42 = vld [vmem:[#allocation2 + $0x18] sm:$0xff] }
 0x600   : > { %v4153_v37 = vor.u32 %v5149_v35, %v4152_v34  ;;  %v5176_v34 = vld [vmem:[#allocation2 + $0x28] sm:$0xff]  ;;  %v5198_v43 = vld [vmem:[#allocation2 + $0xd8] sm:$0xff]  ;;  %v5183_v44 = vld [vmem:[#allocation2 + $0x60] sm:$0xff] }
 0x601   : > { %v5200_v35 = vld [vmem:[#allocation2 + $0xe8] sm:$0xff] }
 0x602   : > { %1765 = vmatpush.bf16.msra.mxu2 %v4221_v55  ;;  %1794 = vmatpush.bf16.msra.mxu0 %v4181_v32  ;;  %v5144_v55 = vld [vmem:[%s6607_s14 + $0x2c] sm:$0xf]  ;;  %v5194_v32 = vld [vmem:[#allocation2 + $0xb8] sm:$0xff] }
 0x603   : > { %1756 = vmatpush.bf16.msrb.mxu1 %v4153_v37  ;;  %v4149_v58 = vor.u32 %v5144_v55, %v4146_v56  ;;  %1783 = vmatpush.bf16.msrb.mxu3 %v4145_v54  ;;  %v5193_v37 = vld [vmem:[#allocation2 + $0xb0] sm:$0xff]  ;;  %v5171_v54 = vld [vmem:[#allocation2] sm:$0xff]  ;;  %v5180_v56 = vld [vmem:[#allocation2 + $0x48] sm:$0xff] }
 0x604   : > { %v5195_v55 = vld [vmem:[#allocation2 + $0xc0] sm:$0xff] }
 0x606   : > { %1766 = vmatpush.bf16.msra.mxu2 %v4205_v4  ;;  %1795 = vmatpush.bf16.msra.mxu0 %v4165_v45  ;;  %v4129_v4 = vor.u32 %v5142_v2, %v4128_v1  ;;  %v5191_v45 = vld [vmem:[#allocation2 + $0xa0] sm:$0xff] }
 0x607   : > { %1757 = vmatpush.bf16.msrb.mxu1 %v4137_v49  ;;  %v5190_v49 = vld [vmem:[#allocation2 + $0x98] sm:$0xff] }
 0x608   : > { %1784 = vmatpush.bf16.msrb.mxu3 %v4129_v4 }
 0x60a   : > { %1767 = vmatpush.bf16.msra.mxu2 %v4189_v16  ;;  %1796 = vmatpush.bf16.msra.mxu0 %v4149_v58  ;;  %v5201_v16 = vld [vmem:[#allocation2 + $0xf0] sm:$0xff]  ;;  %v1581_v58 = vld [vmem:[%s6608_s15] sm:$0xf] }
 0x60b   : > { %1758 = vmatpush.bf16.msrb.mxu1 %v4121_v62  ;;  %v1583_v61 = vperm.slane %v1581_v58, 0  ;;  %v1586_v62 = vperm.slane %v1581_v58, 3  ;;  %v1584_v0 = vperm.slane %v1581_v58, 1 }
 0x60c   : > { %2129 = vmatpush.bf16.msra.mxu3 %v5194_v32 }
 0x60e   : > { %1768 = vmatpush.bf16.msra.mxu2 %v4173_v28  ;;  %1797 = vmatpush.bf16.msra.mxu0 %v4133_v7  ;;  %v5372_v28 = vld [vmem:[%s6606_s13] ss:$0 sm:$0xff]  ;;  %v1585_v7 = vperm.slane %v1581_v58, 2  ;;  %v5209_v58 = vld [vmem:[%s6641_s27 + $0xb0] sm:$0xff] }
 0x60f   : > { %2103 = vmatpush.bf16.msra.mxu1 %v5178_v12 }
 0x610   : > { %2130 = vmatpush.bf16.msra.mxu3 %v5193_v37 }
 0x612   : > { %1769 = vmatpush.bf16.msra.mxu2 %v4157_v41  ;;  %2142 = vmatpush.bf16.msrb.mxu0 %v5202_v13  ;;  %v5192_v41 = vld [vmem:[#allocation2 + $0xa8] sm:$0xff] }
 0x613   : > { %2104 = vmatpush.bf16.msra.mxu1 %v5177_v15 }
 0x614   : > { %2131 = vmatpush.bf16.msra.mxu3 %v5192_v41 }
 0x616   : > { %1770 = vmatpush.bf16.msra.mxu2 %v4141_v53  ;;  %2143 = vmatpush.bf16.msrb.mxu0 %v5201_v16  ;;  %v5189_v53 = vld [vmem:[#allocation2 + $0x90] sm:$0xff] }
 0x617   : > { %2105 = vmatpush.bf16.msra.mxu1 %v5176_v34 }
 0x618   : > { %2132 = vmatpush.bf16.msra.mxu3 %v5191_v45 }
 0x61a   : > { %1771 = vmatpush.bf16.msra.mxu2 %v4125_v63  ;;  %2144 = vmatpush.bf16.msrb.mxu0 %v5200_v35 }
 0x61b   : > { %2106 = vmatpush.bf16.msra.mxu1 %v5175_v5 }
 0x61c   : > { %2133 = vmatpush.bf16.msra.mxu3 %v5190_v49 }
 0x61e   : > { %2145 = vmatpush.bf16.msrb.mxu0 %v5199_v39 }
 0x61f   : > { %2107 = vmatpush.bf16.msra.mxu1 %v5174_v42 }
 0x620   : > { %2134 = vmatpush.bf16.msra.mxu3 %v5189_v53 }
 0x622   : > { %2146 = vmatpush.bf16.msrb.mxu0 %v5198_v43 }
 0x623   : > { %2108 = vmatpush.bf16.msra.mxu1 %v5173_v46 }
 0x624   : > { %2135 = vmatpush.bf16.msra.mxu3 %v5188_v57  ;;  %v5226_v57 = vld [vmem:[%s6644_s4 + $0xb8] sm:$0xff] }
 0x626   : > { %2147 = vmatpush.bf16.msrb.mxu0 %v5197_v47 }
 0x627   : > { %2109 = vmatpush.bf16.msra.mxu1 %v5172_v50 }
 0x628   : > { %2136 = vmatpush.bf16.msra.mxu3 %v5187_v60  ;;  %v5225_v60 = vld [vmem:[%s6644_s4 + $0xb0] sm:$0xff] }
 0x62a   : > { %2148 = vmatpush.bf16.msrb.mxu0 %v5196_v51 }
 0x62b   : > { %2110 = vmatpush.bf16.msra.mxu1 %v5171_v54 }
 0x62e   : > { %2149 = vmatpush.bf16.msrb.mxu0 %v5195_v55  ;;  %v5210_v55 = vld [vmem:[%s6641_s27 + $0xb8] sm:$0xff] }
 0x670   : > { %v1519_v6 = vpop.xlane.xlu0 %1518 }
 0x671   : > { %v1520_v8 = vmul.f32 %v1519_v6, %v5725_v38 }
 0x672   : > { %v1523_v9 = vpop.xlane.xlu1 %1522 }
 0x673   : > { %v1525_v10 = vmul.f32 %v1520_v8, %v1520_v8  ;;  %v1524_v11 = vmul.f32 %v1523_v9, %v5725_v38  ;;  %v1527_v24 = vsub.f32 %v5866_v33, %v1520_v8  ;;  %v5186_v33 = vld [vmem:[#allocation2 + $0x78] sm:$0xff] }
 0x674   : > { %2116 = vmatpush.bf16.msrb.mxu2 %v5186_v33 }
 0x675   : > { %v1526_v14 = vsub.f32 %v1524_v11, %v1525_v10 }
 0x677   : > { %v1528_v17 = vadd.f32 1e-12, %v1526_v14 }
 0x678   : > { %2117 = vmatpush.bf16.msrb.mxu2 %v5185_v36 }
 0x679   : > { %5402 = vrsqrt.f32 %v1528_v17  ;;  %vm1535_vm8 = vweird.f32 %v1528_v17 }
 0x67c   : > { %2118 = vmatpush.bf16.msrb.mxu2 %v5184_v40 }
 0x67f   : > { %v5403_v18 = vpop.eup %5402 }
 0x680   : > { %v1530_v19 = vmul.f32 %v5403_v18, %v1528_v17  ;;  %vm1536_vm7 = vweird.f32 %v5403_v18  ;;  %2119 = vmatpush.bf16.msrb.mxu2 %v5183_v44 }
 0x681   : > { %vm1537_vm9 = vmor %vm1535_vm8, %vm1536_vm7 }
 0x682   : > { %v1531_v20 = vmul.f32 %v5403_v18, %v1530_v19 }
 0x684   : > { %v1532_v21 = vmul.f32 0.5, %v1531_v20  ;;  %2120 = vmatpush.bf16.msrb.mxu2 %v5182_v48 }
 0x686   : > { %v1533_v22 = vsub.f32 1.5, %v1532_v21 }
 0x688   : > { %v1534_v23 = vmul.f32 %v5403_v18, %v1533_v22  ;;  %2121 = vmatpush.bf16.msrb.mxu2 %v5181_v52 }
 0x68a   : > { %v1538_v26 = vsel %vm1537_vm9, %v5403_v18, %v1534_v23 }
 0x68b   : > { %v1539_v27 = vmul.f32 %v1538_v26, %v1527_v24 }
 0x68c   : > { %2122 = vmatpush.bf16.msrb.mxu2 %v5180_v56  ;;  %v5218_v56 = vld [vmem:[%s6642_s29 + $0xb8] sm:$0xff] }
 0x68d   : > { %v1543_v29 = vmul.f32 %v5371_v25, %v1539_v27 }
 0x68f   : > { %v6072_v30 = vadd.f32 %v5372_v28, %v1543_v29 }
 0x690   : > { %2123 = vmatpush.bf16.msrb.mxu2 %v5179_v59  ;;  %v5217_v59 = vld [vmem:[%s6642_s29 + $0xb0] sm:$0xff] }
 0x691   : > { %v1548_v31 = vpack.c.bf16 %v6072_v30, %v6072_v30 }
 0x693   : > { %1759 = vmatmul.bf16.vlgmr.msrb.gmra.mxu1 %v1548_v31  ;;  %1772 = vmatmul.bf16.vlgmr.msra.gmra.mxu2 %v1548_v31 }
 0x694   : > { %1785 = vmatmul.bf16.vlgmr.msrb.gmra.mxu3 %v1548_v31  ;;  %1798 = vmatmul.bf16.vlgmr.msra.gmra.mxu0 %v1548_v31 }
 0x695   : > { %2259 = vmatpush.bf16.msrb.mxu1 %v5210_v55  ;;  %2342 = vmatpush.bf16.msra.mxu2 %v5218_v56  ;;  %v5232_v56 = vld [vmem:[%s6641_s27 + $0xc8] sm:$0xff] }
 0x696   : > { %2425 = vmatpush.bf16.msrb.mxu3 %v5226_v57  ;;  %v5240_v57 = vld [vmem:[%s6642_s29 + $0xc8] sm:$0xff] }
 0x699   : > { %2260 = vmatpush.bf16.msrb.mxu1 %v5209_v58  ;;  %2343 = vmatpush.bf16.msra.mxu2 %v5217_v59  ;;  %v5248_v58 = vld [vmem:[%s6644_s4 + $0xc8] sm:$0xff]  ;;  %v5231_v59 = vld [vmem:[%s6641_s27 + $0xc0] sm:$0xff] }
 0x69a   : > { %2426 = vmatpush.bf16.msrb.mxu3 %v5225_v60  ;;  %v5239_v60 = vld [vmem:[%s6642_s29 + $0xc0] sm:$0xff] }
 0x710   : > { %v1760_v63 = vpop.f32.mrf.mxu1 }
 0x711   : > { %v1761_v1 = vadd.f32 %v1760_v63, %v1583_v61  ;;  %v1799_v2 = vpop.f32.mrf.mxu0  ;;  %v5208_v61 = vld [vmem:[%s6641_s27 + $0xa8] sm:$0xff] }
 0x712   : > { %v1800_v3 = vadd.f32 %v1799_v2, %v1586_v62  ;;  %v5216_v62 = vld [vmem:[%s6642_s29 + $0xa8] sm:$0xff]  ;;  %2261 = vmatpush.bf16.msrb.mxu1 %v5208_v61  ;;  %v5247_v61 = vld [vmem:[%s6644_s4 + $0xc0] sm:$0xff] }
 0x713   : > { %v1807_v4 = vmul.f32 0.044715, %v1761_v1  ;;  %v1803_v37 = vmul.f32 0.5, %v1761_v1  ;;  %v5224_v63 = vld [vmem:[%s6644_s4 + $0xa8] sm:$0xff]  ;;  %2344 = vmatpush.bf16.msra.mxu2 %v5216_v62 }
 0x714   : > { %v1810_v6 = vmul.f32 0.044715, %v1800_v3  ;;  %v1806_v39 = vmul.f32 0.5, %v1800_v3  ;;  %2427 = vmatpush.bf16.msrb.mxu3 %v5224_v63 }
 0x715   : > { %v1811_v8 = vmul.f32 %v1807_v4, %v1761_v1 }
 0x716   : > { %v1814_v9 = vmul.f32 %v1810_v6, %v1800_v3  ;;  %v1773_v10 = vpop.f32.mrf.mxu2 }
 0x717   : > { %v1815_v11 = vmul.f32 %v1811_v8, %v1761_v1  ;;  %v1774_v12 = vadd.f32 %v1773_v10, %v1584_v0  ;;  %v1786_v13 = vpop.f32.mrf.mxu3 }
 0x718   : > { %v1818_v14 = vmul.f32 %v1814_v9, %v1800_v3  ;;  %v1787_v15 = vadd.f32 %v1786_v13, %v1585_v7  ;;  %v1762_v16 = vpop.f32.mrf.mxu1 }
 0x719   : > { %v1808_v17 = vmul.f32 0.044715, %v1774_v12  ;;  %v1801_v18 = vpop.f32.mrf.mxu0  ;;  %v1819_v19 = vadd.f32 %v1815_v11, %v1761_v1  ;;  %v1804_v47 = vmul.f32 0.5, %v1774_v12  ;;  %v5207_v16 = vld [vmem:[%s6641_s27 + $0xa0] sm:$0xff] }
 0x71a   : > { %v1809_v20 = vmul.f32 0.044715, %v1787_v15  ;;  %v1822_v21 = vadd.f32 %v1818_v14, %v1800_v3  ;;  %v1805_v49 = vmul.f32 0.5, %v1787_v15  ;;  %v5373_v3 = vld [vmem:[%s6610_s17] ss:$0 sm:$0xff]  ;;  %2262 = vmatpush.bf16.msrb.mxu1 %v5207_v16  ;;  %v5206_v18 = vld [vmem:[%s6641_s27 + $0x98] sm:$0xff] }
 0x71b   : > { %v1812_v22 = vmul.f32 %v1808_v17, %v1774_v12  ;;  %v1823_v23 = vmul.f32 0.7978846, %v1819_v19  ;;  %v5215_v17 = vld [vmem:[%s6642_s29 + $0xa0] sm:$0xff]  ;;  %v5214_v19 = vld [vmem:[%s6642_s29 + $0x98] sm:$0xff] }
 0x71c   : > { %v1813_v24 = vmul.f32 %v1809_v20, %v1787_v15  ;;  %v1826_v25 = vmul.f32 0.7978846, %v1822_v21  ;;  %2345 = vmatpush.bf16.msra.mxu2 %v5215_v17  ;;  %v5222_v20 = vld [vmem:[%s6644_s4 + $0x98] sm:$0xff]  ;;  %v5205_v21 = vld [vmem:[%s6641_s27 + $0x90] sm:$0xff] }
 0x71d   : > { %v1816_v26 = vmul.f32 %v1812_v22, %v1774_v12  ;;  %5404 = vtanh.f32 %v1823_v23  ;;  %v5213_v22 = vld [vmem:[%s6642_s29 + $0x90] sm:$0xff] }
 0x71e   : > { %v1817_v27 = vmul.f32 %v1813_v24, %v1787_v15  ;;  %v1775_v28 = vpop.f32.mrf.mxu2  ;;  %5406 = vtanh.f32 %v1826_v25  ;;  %2263 = vmatpush.bf16.msrb.mxu1 %v5206_v18  ;;  %v5221_v23 = vld [vmem:[%s6644_s4 + $0x90] sm:$0xff]  ;;  %v5204_v24 = vld [vmem:[%s6641_s27 + $0x88] sm:$0xff] }
 0x71f   : > { %v1788_v29 = vpop.f32.mrf.mxu3  ;;  %v1820_v31 = vadd.f32 %v1816_v26, %v1774_v12  ;;  %v5212_v25 = vld [vmem:[%s6642_s29 + $0x88] sm:$0xff]  ;;  %v5211_v28 = vld [vmem:[%s6642_s29 + $0x80] sm:$0xff] }
 0x720   : > { %v1821_v33 = vadd.f32 %v1817_v27, %v1787_v15  ;;  %2346 = vmatpush.bf16.msra.mxu2 %v5214_v19  ;;  %v5220_v26 = vld [vmem:[%s6644_s4 + $0x88] sm:$0xff]  ;;  %v5203_v27 = vld [vmem:[%s6641_s27 + $0x80] sm:$0xff] }
 0x721   : > { %v1824_v32 = vmul.f32 0.7978846, %v1820_v31  ;;  %v5219_v29 = vld [vmem:[%s6644_s4 + $0x80] sm:$0xff]  ;;  %v5238_v31 = vld [vmem:[%s6641_s27 + $0xf8] sm:$0xff] }
 0x722   : > { %v1825_v34 = vmul.f32 0.7978846, %v1821_v33  ;;  %2264 = vmatpush.bf16.msrb.mxu1 %v5205_v21  ;;  %v5246_v33 = vld [vmem:[%s6642_s29 + $0xf8] sm:$0xff] }
 0x723   : > { %v5405_v35 = vpop.eup %5404  ;;  %5408 = vtanh.f32 %v1824_v32  ;;  %v5254_v32 = vld [vmem:[%s6644_s4 + $0xf8] sm:$0xff] }
 0x724   : > { %v5407_v36 = vpop.eup %5406  ;;  %v1831_v5 = vadd.f32 1.0, %v5405_v35  ;;  %5410 = vtanh.f32 %v1825_v34  ;;  %2347 = vmatpush.bf16.msra.mxu2 %v5213_v22  ;;  %v5237_v34 = vld [vmem:[%s6641_s27 + $0xf0] sm:$0xff] }
 0x725   : > { %v1834_v40 = vadd.f32 1.0, %v5407_v36  ;;  %v5245_v35 = vld [vmem:[%s6642_s29 + $0xf0] sm:$0xff] }
 0x726   : > { %v1835_v41 = vmul.f32 %v1831_v5, %v1803_v37  ;;  %2265 = vmatpush.bf16.msrb.mxu1 %v5204_v24  ;;  %v5253_v36 = vld [vmem:[%s6644_s4 + $0xf0] sm:$0xff]  ;;  %v5236_v37 = vld [vmem:[%s6641_s27 + $0xe8] sm:$0xff] }
 0x727   : > { %v1838_v42 = vmul.f32 %v1834_v40, %v1806_v39  ;;  %v5244_v5 = vld [vmem:[%s6642_s29 + $0xe8] sm:$0xff]  ;;  %v5235_v40 = vld [vmem:[%s6641_s27 + $0xe0] sm:$0xff] }
 0x728   : > { %v1839_v43 = vpack.c.bf16 %v1835_v41, %v1835_v41  ;;  %2348 = vmatpush.bf16.msra.mxu2 %v5212_v25  ;;  %v5252_v39 = vld [vmem:[%s6644_s4 + $0xe8] sm:$0xff]  ;;  %v5243_v41 = vld [vmem:[%s6642_s29 + $0xe0] sm:$0xff] }
 0x729   : > { %v5409_v44 = vpop.eup %5408  ;;  %v1842_v45 = vpack.c.bf16 %v1838_v42, %v1838_v42  ;;  %v5251_v42 = vld [vmem:[%s6644_s4 + $0xe0] sm:$0xff] }
 0x72a   : > { %v5411_v46 = vpop.eup %5410  ;;  %2111 = vmatmul.bf16.vlgmr.msra.gmra.mxu1 %v1839_v43  ;;  %v1832_v48 = vadd.f32 1.0, %v5409_v44 }
 0x72b   : > { %2150 = vmatmul.bf16.vlgmr.msrb.gmra.mxu0 %v1842_v45  ;;  %v1833_v50 = vadd.f32 1.0, %v5411_v46  ;;  %2266 = vmatpush.bf16.msrb.mxu1 %v5203_v27 }
 0x72c   : > { %v1836_v51 = vmul.f32 %v1832_v48, %v1804_v47  ;;  %2349 = vmatpush.bf16.msra.mxu2 %v5211_v28  ;;  %v5234_v48 = vld [vmem:[%s6641_s27 + $0xd8] sm:$0xff] }
 0x72d   : > { %v1837_v52 = vmul.f32 %v1833_v50, %v1805_v49  ;;  %v5242_v49 = vld [vmem:[%s6642_s29 + $0xd8] sm:$0xff] }
 0x72e   : > { %v1840_v53 = vpack.c.bf16 %v1836_v51, %v1836_v51  ;;  %v5250_v50 = vld [vmem:[%s6644_s4 + $0xd8] sm:$0xff] }
 0x72f   : > { %v1841_v54 = vpack.c.bf16 %v1837_v52, %v1837_v52  ;;  %2571 = vmatpush.bf16.msra.mxu1 %v5238_v31  ;;  %v5233_v52 = vld [vmem:[%s6641_s27 + $0xd0] sm:$0xff]  ;;  %v5380_v31 = vld [vmem:[%s6647_s1 + $0x3] ss:$0 sm:$0xff] }
 0x730   : > { %2124 = vmatmul.bf16.vlgmr.msrb.gmra.mxu2 %v1840_v53  ;;  %v5241_v53 = vld [vmem:[%s6642_s29 + $0xd0] sm:$0xff] }
 0x731   : > { %2137 = vmatmul.bf16.vlgmr.msra.gmra.mxu3 %v1841_v54  ;;  %2654 = vmatpush.bf16.msrb.mxu2 %v5246_v33  ;;  %v5249_v54 = vld [vmem:[%s6644_s4 + $0xd0] sm:$0xff] }
 0x733   : > { %2572 = vmatpush.bf16.msra.mxu1 %v5237_v34 }
 0x735   : > { %2655 = vmatpush.bf16.msrb.mxu2 %v5245_v35 }
 0x737   : > { %2573 = vmatpush.bf16.msra.mxu1 %v5236_v37 }
 0x739   : > { %2656 = vmatpush.bf16.msrb.mxu2 %v5244_v5 }
 0x73b   : > { %2574 = vmatpush.bf16.msra.mxu1 %v5235_v40 }
 0x73d   : > { %2657 = vmatpush.bf16.msrb.mxu2 %v5243_v41  ;;  %v5436_v41 = vld [vmem:[%s5640_s5] ss:$0 sm:$0xff] }
 0x73f   : > { %2575 = vmatpush.bf16.msra.mxu1 %v5234_v48 }
 0x741   : > { %2658 = vmatpush.bf16.msrb.mxu2 %v5242_v49 }
 0x743   : > { %2576 = vmatpush.bf16.msra.mxu1 %v5233_v52  ;;  %v5381_v52 = vld [vmem:[%s6602_s9 + $0x3] ss:$0 sm:$0xff] }
 0x745   : > { %2659 = vmatpush.bf16.msrb.mxu2 %v5241_v53 }
 0x747   : > { %2577 = vmatpush.bf16.msra.mxu1 %v5232_v56 }
 0x749   : > { %2660 = vmatpush.bf16.msrb.mxu2 %v5240_v57 }
 0x74b   : > { %2578 = vmatpush.bf16.msra.mxu1 %v5231_v59 }
 0x74d   : > { %2661 = vmatpush.bf16.msrb.mxu2 %v5239_v60 }
 0x7a7   : > { %v2112_v1 = vpop.f32.mrf.mxu1 }
 0x7a8   : > { %v2151_v2 = vpop.f32.mrf.mxu0  ;;  %v2113_v6 = vadd.f32 %v5373_v3, %v2112_v1 }
 0x7af   : > { %v2114_v4 = vpop.f32.mrf.mxu1 }
 0x7b0   : > { %v2153_v0 = vpop.f32.mrf.mxu0 }
 0x7b3   : > { %v2125_v7 = vpop.f32.mrf.mxu2 }
 0x7b4   : > { %v2126_v8 = vadd.f32 %v2125_v7, %v2113_v6  ;;  %v2138_v9 = vpop.f32.mrf.mxu3  ;;  %v5374_v6 = vld [vmem:[%s6611_s18] ss:$0 sm:$0xff] }
 0x7b6   : > { %v2139_v10 = vadd.f32 %v2138_v9, %v2126_v8  ;;  %v5375_v8 = vld [vmem:[%s6612_s19] ss:$0 sm:$0xff] }
 0x7b8   : > { %v2152_v11 = vadd.f32 %v2151_v2, %v2139_v10 }
 0x7ba   : > { %v6110_v12 = vadd.f32 %v2152_v11, %v6072_v30  ;;  %v5223_v30 = vld [vmem:[%s6644_s4 + $0xa0] sm:$0xff] }
 0x7bb   : > { %v2127_v13 = vpop.f32.mrf.mxu2  ;;  %2428 = vmatpush.bf16.msrb.mxu3 %v5223_v30 }
 0x7bc   : > { %v2140_v14 = vpop.f32.mrf.mxu3  ;;  %2158 = vadd.xlane.f32.xlu2 %v6110_v12  ;;  %v2161_v15 = vmul.f32 %v6110_v12, %v6110_v12 }
 0x7bd   : > { %v5377_v14 = vld [vmem:[%s6647_s1 + $0x2] ss:$0 sm:$0xff] }
 0x7be   : > { %2162 = vadd.xlane.f32.xlu0 %v2161_v15  ;;  %v5378_v15 = vld [vmem:[%s6602_s9 + $0x2] ss:$0 sm:$0xff] }
 0x7bf   : > { %2429 = vmatpush.bf16.msrb.mxu3 %v5222_v20  ;;  %v5376_v20 = vld [vmem:[%s6648_s28 + $0x2] ss:$0 sm:$0xff] }
 0x7c3   : > { %2430 = vmatpush.bf16.msrb.mxu3 %v5221_v23 }
 0x7c7   : > { %2431 = vmatpush.bf16.msrb.mxu3 %v5220_v26 }
 0x7cb   : > { %2432 = vmatpush.bf16.msrb.mxu3 %v5219_v29 }
 0x7cf   : > { %2737 = vmatpush.bf16.msra.mxu3 %v5254_v32 }
 0x7d3   : > { %2738 = vmatpush.bf16.msra.mxu3 %v5253_v36 }
 0x7d7   : > { %2739 = vmatpush.bf16.msra.mxu3 %v5252_v39 }
 0x7db   : > { %2740 = vmatpush.bf16.msra.mxu3 %v5251_v42 }
 0x7df   : > { %2741 = vmatpush.bf16.msra.mxu3 %v5250_v50  ;;  %v5230_v50 = vld [vmem:[%s6603_s10 + $0x58] sm:$0xff] }
 0x7e3   : > { %2742 = vmatpush.bf16.msra.mxu3 %v5249_v54  ;;  %v5228_v54 = vld [vmem:[%s6603_s10 + $0x48] sm:$0xff] }
 0x7e7   : > { %2743 = vmatpush.bf16.msra.mxu3 %v5248_v58 }
 0x7eb   : > { %2744 = vmatpush.bf16.msra.mxu3 %v5247_v61  ;;  %v5379_v61 = vld [vmem:[%s6648_s28 + $0x3] ss:$0 sm:$0xff] }
 0x82f   : > { %v2159_v43 = vpop.xlane.xlu2 %2158 }
 0x830   : > { %v2160_v44 = vmul.f32 %v2159_v43, %v5725_v38 }
 0x831   : > { %v2163_v45 = vpop.xlane.xlu0 %2162 }
 0x832   : > { %v2165_v46 = vmul.f32 %v2160_v44, %v2160_v44  ;;  %v2164_v47 = vmul.f32 %v2163_v45, %v5725_v38  ;;  %v2167_v0 = vsub.f32 %v6110_v12, %v2160_v44 }
 0x834   : > { %v2166_v51 = vsub.f32 %v2164_v47, %v2165_v46 }
 0x836   : > { %v2168_v55 = vadd.f32 1e-12, %v2166_v51  ;;  %v5229_v51 = vld [vmem:[%s6603_s10 + $0x50] sm:$0xff] }
 0x838   : > { %5412 = vrsqrt.f32 %v2168_v55  ;;  %vm2175_vm11 = vweird.f32 %v2168_v55 }
 0x83e   : > { %v5413_v62 = vpop.eup %5412 }
 0x83f   : > { %v2170_v63 = vmul.f32 %v5413_v62, %v2168_v55  ;;  %vm2176_vm10 = vweird.f32 %v5413_v62 }
 0x840   : > { %vm2177_vm12 = vmor %vm2175_vm11, %vm2176_vm10 }
 0x841   : > { %v2171_v1 = vmul.f32 %v5413_v62, %v2170_v63 }
 0x843   : > { %v2172_v2 = vmul.f32 0.5, %v2171_v1  ;;  %v5227_v1 = vld [vmem:[%s6603_s10 + $0x40] sm:$0xff] }
 0x845   : > { %v2173_v3 = vsub.f32 1.5, %v2172_v2 }
 0x847   : > { %v2174_v4 = vmul.f32 %v5413_v62, %v2173_v3 }
 0x849   : > { %v2178_v7 = vsel %vm2177_vm12, %v5413_v62, %v2174_v4 }
 0x84a   : > { %v2179_v9 = vmul.f32 %v2178_v7, %v2167_v0 }
 0x84c   : > { %v2183_v10 = vmul.f32 %v5374_v6, %v2179_v9 }
 0x84e   : > { %v6241_v11 = vadd.f32 %v5375_v8, %v2183_v10 }
 0x850   : > { %v2188_v13 = vpack.c.bf16 %v6241_v11, %v6241_v11 }
 0x852   : > { %2267 = vmatmul.bf16.vlgmr.msrb.gmra.mxu1 %v2188_v13  ;;  %2350 = vmatmul.bf16.vlgmr.msra.gmra.mxu2 %v2188_v13 }
 0x853   : > { %2433 = vmatmul.bf16.vlgmr.msrb.gmra.mxu3 %v2188_v13  ;;  %2884 = vmatpush.bf16.msra.mxu2 %v5230_v50  ;;  %v4858_v50 = vld [vmem:[%s6607_s14 + $0x1d0] sm:$0xf0] }
 0x857   : > { %2885 = vmatpush.bf16.msra.mxu2 %v5229_v51  ;;  %v4864_v51 = vld [vmem:[%s6607_s14 + $0x1c8] sm:$0xf] }
 0x85b   : > { %2886 = vmatpush.bf16.msra.mxu2 %v5228_v54 }
 0x85f   : > { %2887 = vmatpush.bf16.msra.mxu2 %v5227_v1  ;;  %v5282_v1 = vld [vmem:[%s6607_s14 + $0x1b4] sm:$0xf0] }
 0x862   : > { %2579 = vmatmul.bf16.vlgmr.msra.gmra.mxu1 %v2188_v13  ;;  %2662 = vmatmul.bf16.vlgmr.msrb.gmra.mxu2 %v2188_v13 }
 0x863   : > { %2745 = vmatmul.bf16.vlgmr.msra.gmra.mxu3 %v2188_v13 }
 0x8cf   : > { %v2268_v12 = vpop.f32.mrf.mxu1 }
 0x8d0   : > { %v2269_v25 = vadd.f32 %v5376_v20, %v2268_v12 }
 0x8d2   : > { %v2438_v29 = vpack.c.bf16 %v2269_v25, %v2269_v25 }
 0x8d5   : > { %v2351_v16 = vpop.f32.mrf.mxu2 }
 0x8d6   : > { %v2352_v17 = vadd.f32 %v5377_v14, %v2351_v16  ;;  %v2434_v30 = vpop.f32.mrf.mxu3 }
 0x8d7   : > { %v2435_v18 = vadd.f32 %v5378_v15, %v2434_v30  ;;  %v2270_v19 = vpop.f32.mrf.mxu1  ;;  %v5257_v30 = vld [vmem:[%s6603_s10 + $0x70] sm:$0xff] }
 0x8d8   : > { %v2439_v21 = vpack.c.bf16 %v2352_v17, %v2352_v17  ;;  %v5258_v17 = vld [vmem:[%s6603_s10 + $0x78] sm:$0xff] }
 0x8d9   : > { %v2471_v22 = vpack.c.bf16 %v2435_v18, %v2435_v18  ;;  %2844 = vmatpush.bf16.msrb.mxu1 %v5258_v17  ;;  %v5256_v18 = vld [vmem:[%s6603_s10 + $0x68] sm:$0xff] }
 0x8da   : > { %v2444_v23 = vsel %vm1055_vm4, %v2439_v21, 0  ;;  %v5276_v17 = vld [vmem:[%s6607_s14 + $0x18c] sm:$0xf] }
 0x8db   : > { %v2476_v24 = vsel %vm1092_vm5, %v2471_v22, 0  ;;  %2453 = vmatpush.bf16.xpose.msra.mxu0 %v2444_v23  ;;  %v5255_v23 = vld [vmem:[%s6603_s10 + $0x60] sm:$0xff] }
 0x8dd   : > { %v2353_v26 = vpop.f32.mrf.mxu2  ;;  %2845 = vmatpush.bf16.msrb.mxu1 %v5257_v30  ;;  %v4834_v30 = vld [vmem:[%s6607_s14 + $0x198] sm:$0xf0] }
 0x8de   : > { %v2436_v27 = vpop.f32.mrf.mxu3 }
 0x8df   : > { %v2580_v28 = vpop.f32.mrf.mxu1  ;;  %v5382_v27 = vld [vmem:[%s6604_s11 + $0x1] ss:$0 sm:$0xff] }
 0x8e0   : > { %v2581_v62 = vadd.f32 %v5379_v61, %v2580_v28 }
 0x8e1   : > { %2846 = vmatpush.bf16.msrb.mxu1 %v5256_v18  ;;  %v4837_v18 = vor.u32 %v5276_v17, %v4834_v30 }
 0x8e2   : > { %4521 = vmatmul.msk.bf16.vlgmr.msra.gmra.mxu0 %vm1055_vm4, %v2438_v29  ;;  %v2750_v63 = vpack.c.bf16 %v2581_v62, %v2581_v62  ;;  %v4842_v62 = vld [vmem:[%s6607_s14 + $0x1b0] sm:$0xf0] }
 0x8e3   : > { %2485 = vmatpush.bf16.msrb.mxu0 %v2476_v24 }
 0x8e5   : > { %v2663_v33 = vpop.f32.mrf.mxu2  ;;  %2847 = vmatpush.bf16.msrb.mxu1 %v5255_v23  ;;  %v4810_v23 = vld [vmem:[%s6607_s14 + $0x170] sm:$0xf0] }
 0x8e6   : > { %v2664_v32 = vadd.f32 %v5380_v31, %v2663_v33  ;;  %v2746_v34 = vpop.f32.mrf.mxu3 }
 0x8e7   : > { %v2582_v35 = vpop.f32.mrf.mxu1  ;;  %v2747_v55 = vadd.f32 %v5381_v52, %v2746_v34  ;;  %v5286_v52 = vld [vmem:[%s6607_s14 + $0x1d4] sm:$0xf0] }
 0x8e8   : > { %v2751_v36 = vpack.c.bf16 %v2664_v32, %v2664_v32  ;;  %v4872_v35 = vld [vmem:[%s6607_s14 + $0x1e0] sm:$0xf]  ;;  %v4865_v54 = vor.u32 %v5286_v52, %v4864_v51 }
 0x8e9   : > { %v2783_v57 = vpack.c.bf16 %v2747_v55, %v2747_v55  ;;  %v5284_v55 = vld [vmem:[%s6607_s14 + $0x1cc] sm:$0xf] }
 0x8ea   : > { %v2756_v37 = vsel %vm1055_vm4, %v2751_v36, 0  ;;  %v5289_v36 = vld [vmem:[%s6607_s14 + $0x1ec] sm:$0xf0] }
 0x8eb   : > { %2765 = vmatpush.bf16.xpose.msra.mxu0 %v2756_v37  ;;  %v2788_v60 = vsel %vm1092_vm5, %v2783_v57, 0  ;;  %v4873_v37 = vor.u32 %v5289_v36, %v4872_v35  ;;  %v5267_v35 = vld [vmem:[%s6607_s14 + $0x144] sm:$0xf] }
 0x8ed   : > { %v2665_v5 = vpop.f32.mrf.mxu2  ;;  %3139 = vmatpush.bf16.msrb.mxu3 %v4873_v37  ;;  %v4800_v37 = vld [vmem:[%s6607_s14 + $0x148] sm:$0xf] }
 0x8ee   : > { %v2748_v39 = vpop.f32.mrf.mxu3  ;;  %v4874_v5 = vld [vmem:[%s6607_s14 + $0x1f0] sm:$0xf0] }
 0x8ef   : > { %v4880_v39 = vld [vmem:[%s6607_s14 + $0x1e8] sm:$0xf] }
 0x95f   : > { %v2455_v40 = vpop.f32.mrf.mxu0 }
 0x960   : > { %v2456_v42 = vadd.f32 %v5436_v41, %v2455_v40  ;;  %v5290_v40 = vld [vmem:[%s6607_s14 + $0x1f4] sm:$0xf0] }
 0x962   : > { %v2459_v43 = vsel %vm1075_vm6, %v2456_v42, -inf }
 0x963   : > { %2460 = vmax.xlane.f32.xlu1 %v2459_v43  ;;  %v5288_v43 = vld [vmem:[%s6607_s14 + $0x1ec] sm:$0xf] }
 0x967   : > { %v2457_v44 = vpop.f32.mrf.mxu0 }
 0x968   : > { %v4882_v44 = vld [vmem:[%s6607_s14 + $0x1f8] sm:$0xf0] }
 0x9d6   : > { %v2461_v45 = vpop.xlane.xlu1 %2460 }
 0x9d7   : > { %v2462_v46 = vsub.f32 %v2456_v42, %v2461_v45  ;;  %v4881_v42 = vor.u32 %v5290_v40, %v4880_v39  ;;  %v4885_v45 = vor.u32 %v5288_v43, %v4882_v44  ;;  %v4776_v44 = vld [vmem:[%s6607_s14 + $0x120] sm:$0xf] }
 0x9d9   : > { %v2463_v47 = vmul.f32 1.442695, %v2462_v46  ;;  %3165 = vmatpush.bf16.msra.mxu1 %v4881_v42  ;;  %v4856_v46 = vld [vmem:[%s6607_s14 + $0x1c0] sm:$0xf]  ;;  %3178 = vmatpush.bf16.msrb.mxu2 %v4885_v45  ;;  %v4802_v42 = vld [vmem:[%s6607_s14 + $0x158] sm:$0xf0] }
 0x9da   : > { %v5265_v45 = vld [vmem:[%s6607_s14 + $0x12c] sm:$0xf0] }
 0x9db   : > { %5414 = vpow2.f32 %v2463_v47  ;;  %v5285_v47 = vld [vmem:[%s6607_s14 + $0x1cc] sm:$0xf0] }
 0x9dd   : > { %3166 = vmatpush.bf16.msra.mxu1 %v4865_v54  ;;  %v4786_v54 = vld [vmem:[%s6607_s14 + $0x138] sm:$0xf0] }
 0x9e1   : > { %v5415_v48 = vpop.eup %5414 }
 0x9e2   : > { %v2465_v49 = vsel %vm1075_vm6, %v5415_v48, 0.0 }
 0x9e3   : > { %2466 = vadd.xlane.f32.xlu2 %v2465_v49  ;;  %v4857_v49 = vor.u32 %v5285_v47, %v4856_v46  ;;  %v5263_v46 = vld [vmem:[%s6607_s14 + $0x124] sm:$0xf]  ;;  %v4777_v47 = vor.u32 %v5265_v45, %v4776_v44  ;;  %v5301_v44 = vld [vmem:[#allocation2 + $0x150] sm:$0xff] }
 0x9e4   : > { %v5309_v45 = vld [vmem:[#allocation2 + $0x190] sm:$0xff] }
 0x9e5   : > { %3140 = vmatpush.bf16.msrb.mxu3 %v4857_v49  ;;  %v4784_v49 = vld [vmem:[%s6607_s14 + $0x128] sm:$0xf] }
 0xa56   : > { %v2467_v53 = vpop.xlane.xlu2 %2466 }
 0xa57   : > { %5416 = vrcp.f32 %v2467_v53 }
 0xa5d   : > { %v5417_v56 = vpop.eup %5416 }
 0xa5e   : > { %v2469_v58 = vmul.f32 %v5417_v56, %v5415_v48  ;;  %v5283_v48 = vld [vmem:[%s6607_s14 + $0x1c4] sm:$0xf]  ;;  %v4866_v56 = vld [vmem:[%s6607_s14 + $0x1d8] sm:$0xf0] }
 0xa5f   : > { %v4861_v53 = vor.u32 %v5283_v48, %v4858_v50  ;;  %v4869_v57 = vor.u32 %v5284_v55, %v4866_v56  ;;  %v4778_v48 = vld [vmem:[%s6607_s14 + $0x130] sm:$0xf0]  ;;  %v5266_v50 = vld [vmem:[%s6607_s14 + $0x134] sm:$0xf0]  ;;  %v4760_v55 = vld [vmem:[%s6607_s14 + $0x100] sm:$0xf] }
 0xa60   : > { %v2470_v59 = vpack.c.bf16 %v2469_v58, %v2469_v58  ;;  %v4840_v58 = vld [vmem:[%s6607_s14 + $0x1a0] sm:$0xf]  ;;  %v4781_v51 = vor.u32 %v5263_v46, %v4778_v48  ;;  %v4785_v52 = vor.u32 %v5266_v50, %v4784_v49  ;;  %v5294_v46 = vld [vmem:[#allocation2 + $0x118] sm:$0xff]  ;;  %v5300_v48 = vld [vmem:[#allocation2 + $0x148] sm:$0xff] }
 0xa61   : > { %3179 = vmatpush.bf16.msrb.mxu2 %v4869_v57  ;;  %v5261_v57 = vld [vmem:[%s6607_s14 + $0x10c] sm:$0xf0]  ;;  %v5308_v49 = vld [vmem:[#allocation2 + $0x188] sm:$0xff] }
 0xa62   : > { %4522 = vmatmul.msk.bf16.vlgmr.msrb.gmra.mxu0 %vm1075_vm6, %v2470_v59  ;;  %v5281_v59 = vld [vmem:[%s6607_s14 + $0x1ac] sm:$0xf0] }
 0xa63   : > { %2797 = vmatpush.bf16.msrb.mxu0 %v2788_v60  ;;  %v5279_v60 = vld [vmem:[%s6607_s14 + $0x1a4] sm:$0xf]  ;;  %v4841_v61 = vor.u32 %v5281_v59, %v4840_v58  ;;  %v4762_v59 = vld [vmem:[%s6607_s14 + $0x110] sm:$0xf0] }
 0xa64   : > { %v5259_v58 = vld [vmem:[%s6607_s14 + $0x104] sm:$0xf]  ;;  %v5293_v50 = vld [vmem:[#allocation2 + $0x110] sm:$0xff] }
 0xa65   : > { %3141 = vmatpush.bf16.msrb.mxu3 %v4841_v61  ;;  %v4765_v61 = vor.u32 %v5259_v58, %v4762_v59  ;;  %v5315_v58 = vld [vmem:[#allocation2 + $0x1c0] sm:$0xff] }
 0xa72   : > { %4678 = vmatmul.msk.bf16.vlgmr.msra.gmra.mxu0 %vm1055_vm4, %v2750_v63  ;;  %v4848_v63 = vld [vmem:[%s6607_s14 + $0x1a8] sm:$0xf] }
 0xadf   : > { %v2487_v2 = vpop.f32.mrf.mxu0 }
 0xae0   : > { %v2491_v3 = vpack.c.bf16 %v2487_v2, %v2487_v2  ;;  %v4845_v2 = vor.u32 %v5279_v60, %v4842_v62  ;;  %v4761_v60 = vor.u32 %v5261_v57, %v4760_v55  ;;  %v4768_v62 = vld [vmem:[%s6607_s14 + $0x108] sm:$0xf]  ;;  %v5291_v57 = vld [vmem:[#allocation2 + $0x100] sm:$0xff] }
 0xae1   : > { %v5316_v55 = vld [vmem:[#allocation2 + $0x1c8] sm:$0xff] }
 0xae2   : > { %4721 = vmatmul.msk.bf16.vlgmr.msra.gmra.mxu2 %vm1055_vm4, %v2491_v3  ;;  %v4849_v3 = vor.u32 %v5282_v1, %v4848_v63  ;;  %v5262_v63 = vld [vmem:[%s6607_s14 + $0x114] sm:$0xf0]  ;;  %v5260_v1 = vld [vmem:[%s6607_s14 + $0x10c] sm:$0xf] }
 0xae4   : > { %3167 = vmatpush.bf16.msra.mxu1 %v4849_v3  ;;  %v4770_v3 = vld [vmem:[%s6607_s14 + $0x118] sm:$0xf0] }
 0xae7   : > { %v2489_v4 = vpop.f32.mrf.mxu0 }
 0xae8   : > { %v5280_v4 = vld [vmem:[%s6607_s14 + $0x1ac] sm:$0xf] }
 0xaef   : > { %v2767_v0 = vpop.f32.mrf.mxu0 }
 0xaf0   : > { %v2768_v6 = vadd.f32 %v5436_v41, %v2767_v0  ;;  %v4850_v0 = vld [vmem:[%s6607_s14 + $0x1b8] sm:$0xf0] }
 0xaf2   : > { %v2771_v7 = vsel %vm1075_vm6, %v2768_v6, -inf }
 0xaf3   : > { %2772 = vmax.xlane.f32.xlu0 %v2771_v7  ;;  %v4824_v7 = vld [vmem:[%s6607_s14 + $0x180] sm:$0xf] }
 0xaf7   : > { %v2769_v8 = vpop.f32.mrf.mxu0 }
 0xaf8   : > { %v5277_v8 = vld [vmem:[%s6607_s14 + $0x18c] sm:$0xf0] }
 0xb65   : > { %v2889_v9 = vpop.f32.mrf.mxu2 }
 0xb66   : > { %v2773_v10 = vpop.xlane.xlu0 %2772 }
 0xb67   : > { %v2774_v13 = vsub.f32 %v2768_v6, %v2773_v10  ;;  %v4853_v6 = vor.u32 %v5280_v4, %v4850_v0  ;;  %v4825_v10 = vor.u32 %v5277_v8, %v4824_v7  ;;  %v4773_v0 = vor.u32 %v5260_v1, %v4770_v3 }
 0xb69   : > { %v2775_v12 = vmul.f32 1.442695, %v2774_v13  ;;  %3180 = vmatpush.bf16.msrb.mxu2 %v4853_v6  ;;  %v4826_v13 = vld [vmem:[%s6607_s14 + $0x190] sm:$0xf0]  ;;  %3142 = vmatpush.bf16.msrb.mxu3 %v4825_v10  ;;  %v5306_v10 = vld [vmem:[#allocation2 + $0x178] sm:$0xff] }
 0xb6b   : > { %5418 = vpow2.f32 %v2775_v12  ;;  %v4832_v12 = vld [vmem:[%s6607_s14 + $0x188] sm:$0xf] }
 0xb6d   : > { %v2891_v14 = vpop.f32.mrf.mxu2  ;;  %3181 = vmatpush.bf16.msrb.mxu2 %v4837_v18 }
 0xb6e   : > { %v5278_v14 = vld [vmem:[%s6607_s14 + $0x194] sm:$0xf0] }
 0xb71   : > { %v5419_v15 = vpop.eup %5418 }
 0xb72   : > { %v2777_v16 = vsel %vm1075_vm6, %v5419_v15, 0.0 }
 0xb73   : > { %2778 = vadd.xlane.f32.xlu1 %v2777_v16  ;;  %v4833_v16 = vor.u32 %v5278_v14, %v4832_v12  ;;  %v5305_v14 = vld [vmem:[#allocation2 + $0x170] sm:$0xff] }
 0xb75   : > { %3168 = vmatpush.bf16.msra.mxu1 %v4833_v16 }
 0xbe6   : > { %v2779_v19 = vpop.xlane.xlu1 %2778 }
 0xbe7   : > { %5420 = vrcp.f32 %v2779_v19  ;;  %v4808_v19 = vld [vmem:[%s6607_s14 + $0x160] sm:$0xf] }
 0xbed   : > { %v5421_v20 = vpop.eup %5420 }
 0xbee   : > { %v2781_v21 = vmul.f32 %v5421_v20, %v5419_v15  ;;  %v5273_v20 = vld [vmem:[%s6607_s14 + $0x16c] sm:$0xf0] }
 0xbf0   : > { %v2782_v22 = vpack.c.bf16 %v2781_v21, %v2781_v21  ;;  %v5271_v21 = vld [vmem:[%s6607_s14 + $0x164] sm:$0xf] }
 0xbf2   : > { %4679 = vmatmul.msk.bf16.vlgmr.msrb.gmra.mxu0 %vm1075_vm6, %v2782_v22  ;;  %v4809_v22 = vor.u32 %v5273_v20, %v4808_v19 }
 0xbf4   : > { %3143 = vmatpush.bf16.msrb.mxu3 %v4809_v22 }
 0xc6f   : > { %v2799_v24 = vpop.f32.mrf.mxu0 }
 0xc70   : > { %v2803_v25 = vpack.c.bf16 %v2799_v24, %v2799_v24  ;;  %v4816_v24 = vld [vmem:[%s6607_s14 + $0x168] sm:$0xf] }
 0xc72   : > { %4704 = vmatmul.msk.bf16.vlgmr.msrb.gmra.mxu1 %vm1055_vm4, %v2803_v25  ;;  %v5274_v25 = vld [vmem:[%s6607_s14 + $0x174] sm:$0xf0] }
 0xc77   : > { %v2801_v26 = vpop.f32.mrf.mxu0 }
 0xc78   : > { %v4813_v26 = vor.u32 %v5271_v21, %v4810_v23  ;;  %v5383_v23 = vld [vmem:[%s6605_s12 + $0x1] ss:$0 sm:$0xff] }
 0xcef   : > { %v2849_v28 = vpop.f32.mrf.mxu1 }
 0xcf0   : > { %v2890_v29 = vadd.f32 %v2889_v9, %v2849_v28  ;;  %v5275_v9 = vld [vmem:[%s6607_s14 + $0x184] sm:$0xf]  ;;  %v5272_v28 = vld [vmem:[%s6607_s14 + $0x16c] sm:$0xf] }
 0xcf1   : > { %v4829_v15 = vor.u32 %v5275_v9, %v4826_v13  ;;  %v5314_v13 = vld [vmem:[#allocation2 + $0x1b8] sm:$0xff] }
 0xcf2   : > { %v2898_v31 = vadd.f32 %v5382_v27, %v2890_v29  ;;  %v4817_v27 = vor.u32 %v5274_v25, %v4816_v24  ;;  %v4818_v29 = vld [vmem:[%s6607_s14 + $0x178] sm:$0xf0] }
 0xcf4   : > { %v6306_v33 = vadd.f32 %v2898_v31, %v6241_v11  ;;  %v5287_v11 = vld [vmem:[%s6607_s14 + $0x1e4] sm:$0xf]  ;;  %v4821_v31 = vor.u32 %v5272_v28, %v4818_v29  ;;  %3169 = vmatpush.bf16.msra.mxu1 %v4817_v27 }
 0xcf5   : > { %v4877_v41 = vor.u32 %v5287_v11, %v4874_v5  ;;  %v4794_v11 = vld [vmem:[%s6607_s14 + $0x150] sm:$0xf0]  ;;  %v5270_v5 = vld [vmem:[%s6607_s14 + $0x154] sm:$0xf0] }
 0xcf6   : > { %2904 = vadd.xlane.f32.xlu2 %v6306_v33  ;;  %v2907_v32 = vmul.f32 %v6306_v33, %v6306_v33  ;;  %3182 = vmatpush.bf16.msrb.mxu2 %v4821_v31  ;;  %v4797_v39 = vor.u32 %v5267_v35, %v4794_v11  ;;  %v4801_v40 = vor.u32 %v5270_v5, %v4800_v37  ;;  %v5322_v31 = vld [vmem:[#allocation2 + $0x1f8] sm:$0xff]  ;;  %v5297_v35 = vld [vmem:[#allocation2 + $0x130] sm:$0xff]  ;;  %v5303_v11 = vld [vmem:[#allocation2 + $0x160] sm:$0xff] }
 0xcf7   : > { %v2851_v34 = vpop.f32.mrf.mxu1  ;;  %3152 = vmatpush.bf16.msra.mxu0 %v4877_v41  ;;  %v5268_v41 = vld [vmem:[%s6607_s14 + $0x14c] sm:$0xf]  ;;  %v5311_v37 = vld [vmem:[#allocation2 + $0x1a0] sm:$0xff] }
 0xcf8   : > { %2908 = vadd.xlane.f32.xlu0 %v2907_v32  ;;  %v4792_v32 = vld [vmem:[%s6607_s14 + $0x140] sm:$0xf]  ;;  %v5269_v34 = vld [vmem:[%s6607_s14 + $0x14c] sm:$0xf0]  ;;  %v4805_v43 = vor.u32 %v5268_v41, %v4802_v42  ;;  %3170 = vmatpush.bf16.msra.mxu1 %v4801_v40  ;;  %v5296_v5 = vld [vmem:[#allocation2 + $0x128] sm:$0xff] }
 0xcf9   : > { %v4793_v36 = vor.u32 %v5269_v34, %v4792_v32  ;;  %v5304_v32 = vld [vmem:[#allocation2 + $0x168] sm:$0xff]  ;;  %v5302_v40 = vld [vmem:[#allocation2 + $0x158] sm:$0xff]  ;;  %v5295_v42 = vld [vmem:[#allocation2 + $0x120] sm:$0xff] }
 0xcfa   : > { %3183 = vmatpush.bf16.msrb.mxu2 %v4805_v43  ;;  %v5312_v34 = vld [vmem:[#allocation2 + $0x1a8] sm:$0xff]  ;;  %v5310_v41 = vld [vmem:[#allocation2 + $0x198] sm:$0xff]  ;;  %v5319_v43 = vld [vmem:[#allocation2 + $0x1e0] sm:$0xff] }
 0xcfb   : > { %3153 = vmatpush.bf16.msra.mxu0 %v4861_v53  ;;  %3144 = vmatpush.bf16.msrb.mxu3 %v4793_v36  ;;  %v5264_v53 = vld [vmem:[%s6607_s14 + $0x12c] sm:$0xf]  ;;  %v5321_v36 = vld [vmem:[#allocation2 + $0x1f0] sm:$0xff] }
 0xcfc   : > { %v4789_v56 = vor.u32 %v5264_v53, %v4786_v54  ;;  %3171 = vmatpush.bf16.msra.mxu1 %v4785_v52  ;;  %v5299_v52 = vld [vmem:[#allocation2 + $0x140] sm:$0xff]  ;;  %v5292_v54 = vld [vmem:[#allocation2 + $0x108] sm:$0xff] }
 0xcfd   : > { %v5307_v53 = vld [vmem:[#allocation2 + $0x180] sm:$0xff] }
 0xcfe   : > { %3184 = vmatpush.bf16.msrb.mxu2 %v4789_v56  ;;  %v4757_v56 = vld [vmem:[%s6608_s15 + $0x4] sm:$0xf] }
 0xcff   : > { %3154 = vmatpush.bf16.msra.mxu0 %v4845_v2  ;;  %3145 = vmatpush.bf16.msrb.mxu3 %v4777_v47  ;;  %v4769_v2 = vor.u32 %v5262_v63, %v4768_v62  ;;  %v5318_v47 = vld [vmem:[#allocation2 + $0x1d8] sm:$0xff]  ;;  %v2972_v59 = vperm.slane %v4757_v56, 1  ;;  %v2971_v3 = vperm.slane %v4757_v56, 0 }
 0xd01   : > { %3172 = vmatpush.bf16.msra.mxu1 %v4769_v2 }
 0xd02   : > { %3185 = vmatpush.bf16.msrb.mxu2 %v4773_v0  ;;  %v2974_v0 = vperm.slane %v4757_v56, 3 }
 0xd03   : > { %3155 = vmatpush.bf16.msra.mxu0 %v4829_v15  ;;  %3146 = vmatpush.bf16.msrb.mxu3 %v4761_v60  ;;  %v5313_v15 = vld [vmem:[#allocation2 + $0x1b0] sm:$0xff]  ;;  %v2973_v60 = vperm.slane %v4757_v56, 2 }
 0xd05   : > { %3519 = vmatpush.bf16.msrb.mxu1 %v5314_v13 }
 0xd06   : > { %3532 = vmatpush.bf16.msra.mxu2 %v5322_v31 }
 0xd07   : > { %3156 = vmatpush.bf16.msra.mxu0 %v4813_v26  ;;  %v5384_v26 = vld [vmem:[%s6606_s13 + $0x1] ss:$0 sm:$0xff] }
 0xd09   : > { %3520 = vmatpush.bf16.msrb.mxu1 %v5313_v15 }
 0xd0a   : > { %3533 = vmatpush.bf16.msra.mxu2 %v5321_v36 }
 0xd0b   : > { %3157 = vmatpush.bf16.msra.mxu0 %v4797_v39  ;;  %v5320_v39 = vld [vmem:[#allocation2 + $0x1e8] sm:$0xff] }
 0xd0d   : > { %3521 = vmatpush.bf16.msrb.mxu1 %v5312_v34 }
 0xd0e   : > { %3534 = vmatpush.bf16.msra.mxu2 %v5320_v39 }
 0xd0f   : > { %3158 = vmatpush.bf16.msra.mxu0 %v4781_v51  ;;  %v5317_v51 = vld [vmem:[#allocation2 + $0x1d0] sm:$0xff] }
 0xd11   : > { %3522 = vmatpush.bf16.msrb.mxu1 %v5311_v37 }
 0xd12   : > { %3535 = vmatpush.bf16.msra.mxu2 %v5319_v43 }
 0xd13   : > { %3159 = vmatpush.bf16.msra.mxu0 %v4765_v61 }
 0xd15   : > { %3523 = vmatpush.bf16.msrb.mxu1 %v5310_v41 }
 0xd16   : > { %3536 = vmatpush.bf16.msra.mxu2 %v5318_v47 }
 0xd17   : > { %3506 = vmatpush.bf16.msrb.mxu0 %v5306_v10 }
 0xd19   : > { %3524 = vmatpush.bf16.msrb.mxu1 %v5309_v45 }
 0xd1a   : > { %3537 = vmatpush.bf16.msra.mxu2 %v5317_v51 }
 0xd1b   : > { %3507 = vmatpush.bf16.msrb.mxu0 %v5305_v14 }
 0xd1d   : > { %3525 = vmatpush.bf16.msrb.mxu1 %v5308_v49 }
 0xd1e   : > { %3538 = vmatpush.bf16.msra.mxu2 %v5316_v55 }
 0xd1f   : > { %3508 = vmatpush.bf16.msrb.mxu0 %v5304_v32 }
 0xd21   : > { %3526 = vmatpush.bf16.msrb.mxu1 %v5307_v53 }
 0xd22   : > { %3539 = vmatpush.bf16.msra.mxu2 %v5315_v58 }
 0xd23   : > { %3509 = vmatpush.bf16.msrb.mxu0 %v5303_v11 }
 0xd27   : > { %3510 = vmatpush.bf16.msrb.mxu0 %v5302_v40 }
 0xd2b   : > { %3511 = vmatpush.bf16.msrb.mxu0 %v5301_v44 }
 0xd2f   : > { %3512 = vmatpush.bf16.msrb.mxu0 %v5300_v48 }
 0xd33   : > { %3513 = vmatpush.bf16.msrb.mxu0 %v5299_v52 }
 0xd69   : > { %v2905_v4 = vpop.xlane.xlu2 %2904 }
 0xd6a   : > { %v2906_v6 = vmul.f32 %v2905_v4, %v5725_v38 }
 0xd6b   : > { %v2909_v7 = vpop.xlane.xlu0 %2908 }
 0xd6c   : > { %v2911_v8 = vmul.f32 %v2906_v6, %v2906_v6  ;;  %v2910_v9 = vmul.f32 %v2909_v7, %v5725_v38  ;;  %v2913_v22 = vsub.f32 %v6306_v33, %v2906_v6  ;;  %v5298_v33 = vld [vmem:[#allocation2 + $0x138] sm:$0xff] }
 0xd6d   : > { %3493 = vmatpush.bf16.msra.mxu3 %v5298_v33 }
 0xd6e   : > { %v2912_v12 = vsub.f32 %v2910_v9, %v2911_v8 }
 0xd70   : > { %v2914_v16 = vadd.f32 1e-12, %v2912_v12 }
 0xd71   : > { %3494 = vmatpush.bf16.msra.mxu3 %v5297_v35 }
 0xd72   : > { %5422 = vrsqrt.f32 %v2914_v16  ;;  %vm2921_vm14 = vweird.f32 %v2914_v16 }
 0xd75   : > { %3495 = vmatpush.bf16.msra.mxu3 %v5296_v5 }
 0xd78   : > { %v5423_v17 = vpop.eup %5422 }
 0xd79   : > { %v2916_v30 = vmul.f32 %v5423_v17, %v2914_v16  ;;  %vm2922_vm13 = vweird.f32 %v5423_v17  ;;  %3496 = vmatpush.bf16.msra.mxu3 %v5295_v42 }
 0xd7a   : > { %vm2923_vm15 = vmor %vm2921_vm14, %vm2922_vm13 }
 0xd7b   : > { %v2917_v18 = vmul.f32 %v5423_v17, %v2916_v30 }
 0xd7d   : > { %v2918_v19 = vmul.f32 0.5, %v2917_v18  ;;  %3497 = vmatpush.bf16.msra.mxu3 %v5294_v46 }
 0xd7f   : > { %v2919_v20 = vsub.f32 1.5, %v2918_v19 }
 0xd81   : > { %v2920_v21 = vmul.f32 %v5423_v17, %v2919_v20  ;;  %3498 = vmatpush.bf16.msra.mxu3 %v5293_v50 }
 0xd83   : > { %v2924_v24 = vsel %vm2923_vm15, %v5423_v17, %v2920_v21 }
 0xd84   : > { %v2925_v25 = vmul.f32 %v2924_v24, %v2913_v22 }
 0xd85   : > { %3499 = vmatpush.bf16.msra.mxu3 %v5292_v54 }
 0xd86   : > { %v2929_v27 = vmul.f32 %v5383_v23, %v2925_v25 }
 0xd88   : > { %v6512_v28 = vadd.f32 %v5384_v26, %v2929_v27 }
 0xd89   : > { %3500 = vmatpush.bf16.msra.mxu3 %v5291_v57  ;;  %v5385_v57 = vld [vmem:[%s6610_s17 + $0x1] ss:$0 sm:$0xff] }
 0xd8a   : > { %v2934_v29 = vpack.c.bf16 %v6512_v28, %v6512_v28 }
 0xd8c   : > { %3147 = vmatmul.bf16.vlgmr.msrb.gmra.mxu3 %v2934_v29  ;;  %3160 = vmatmul.bf16.vlgmr.msra.gmra.mxu0 %v2934_v29 }
 0xd8d   : > { %3173 = vmatmul.bf16.vlgmr.msra.gmra.mxu1 %v2934_v29  ;;  %3186 = vmatmul.bf16.vlgmr.msrb.gmra.mxu2 %v2934_v29 }
 0xe09   : > { %v3161_v61 = vpop.f32.mrf.mxu0 }
 0xe0a   : > { %v3162_v62 = vadd.f32 %v3161_v61, %v2972_v59  ;;  %v3174_v63 = vpop.f32.mrf.mxu1 }
 0xe0b   : > { %v3175_v1 = vadd.f32 %v3174_v63, %v2973_v60 }
 0xe0c   : > { %v3196_v2 = vmul.f32 0.044715, %v3162_v62  ;;  %v3192_v36 = vmul.f32 0.5, %v3162_v62 }
 0xe0d   : > { %v3197_v4 = vmul.f32 0.044715, %v3175_v1  ;;  %v3193_v37 = vmul.f32 0.5, %v3175_v1 }
 0xe0e   : > { %v3200_v6 = vmul.f32 %v3196_v2, %v3162_v62 }
 0xe0f   : > { %v3201_v7 = vmul.f32 %v3197_v4, %v3175_v1  ;;  %v3148_v8 = vpop.f32.mrf.mxu3 }
 0xe10   : > { %v3204_v9 = vmul.f32 %v3200_v6, %v3162_v62  ;;  %v3149_v10 = vadd.f32 %v3148_v8, %v2971_v3  ;;  %v3187_v13 = vpop.f32.mrf.mxu2  ;;  %v5329_v6 = vld [vmem:[%s6613_s20 + $0x30] sm:$0xff]  ;;  %v5326_v8 = vld [vmem:[%s6613_s20 + $0x18] sm:$0xff] }
 0xe11   : > { %v3205_v12 = vmul.f32 %v3201_v7, %v3175_v1  ;;  %v3188_v14 = vadd.f32 %v3187_v13, %v2974_v0  ;;  %v3163_v15 = vpop.f32.mrf.mxu0  ;;  %v5330_v0 = vld [vmem:[%s6613_s20 + $0x38] sm:$0xff]  ;;  %v5328_v7 = vld [vmem:[%s6613_s20 + $0x28] sm:$0xff]  ;;  %v5323_v13 = vld [vmem:[%s6613_s20] sm:$0xff] }
 0xe12   : > { %v3195_v16 = vmul.f32 0.044715, %v3149_v10  ;;  %v3176_v17 = vpop.f32.mrf.mxu1  ;;  %v3208_v30 = vadd.f32 %v3204_v9, %v3162_v62  ;;  %v3191_v45 = vmul.f32 0.5, %v3149_v10  ;;  %3649 = vmatpush.bf16.msrb.mxu3 %v5330_v0  ;;  %v5325_v9 = vld [vmem:[%s6613_s20 + $0x10] sm:$0xff] }
 0xe13   : > { %v3198_v18 = vmul.f32 0.044715, %v3188_v14  ;;  %v3209_v19 = vadd.f32 %v3205_v12, %v3175_v1  ;;  %v3194_v47 = vmul.f32 0.5, %v3188_v14 }
 0xe14   : > { %v3199_v20 = vmul.f32 %v3195_v16, %v3149_v10  ;;  %v3212_v21 = vmul.f32 0.7978846, %v3208_v30  ;;  %v5338_v30 = vld [vmem:[%s6615_s22 + $0x38] sm:$0xff] }
 0xe15   : > { %v3202_v22 = vmul.f32 %v3198_v18, %v3188_v14  ;;  %v3213_v23 = vmul.f32 0.7978846, %v3209_v19  ;;  %3732 = vmatpush.bf16.msra.mxu0 %v5338_v30  ;;  %v5337_v19 = vld [vmem:[%s6615_s22 + $0x30] sm:$0xff] }
 0xe16   : > { %v3203_v24 = vmul.f32 %v3199_v20, %v3149_v10  ;;  %5424 = vtanh.f32 %v3212_v21  ;;  %3650 = vmatpush.bf16.msrb.mxu3 %v5329_v6  ;;  %v5336_v21 = vld [vmem:[%s6615_s22 + $0x28] sm:$0xff] }
 0xe17   : > { %v3206_v25 = vmul.f32 %v3202_v22, %v3188_v14  ;;  %v3150_v26 = vpop.f32.mrf.mxu3  ;;  %5426 = vtanh.f32 %v3213_v23 }
 0xe18   : > { %v3189_v27 = vpop.f32.mrf.mxu2  ;;  %v3207_v29 = vadd.f32 %v3203_v24, %v3149_v10  ;;  %v5324_v10 = vld [vmem:[%s6613_s20 + $0x8] sm:$0xff]  ;;  %v5334_v24 = vld [vmem:[%s6615_s22 + $0x18] sm:$0xff] }
 0xe19   : > { %v3210_v33 = vadd.f32 %v3206_v25, %v3188_v14  ;;  %3733 = vmatpush.bf16.msra.mxu0 %v5337_v19 }
 0xe1a   : > { %v3211_v31 = vmul.f32 0.7978846, %v3207_v29  ;;  %3651 = vmatpush.bf16.msrb.mxu3 %v5328_v7 }
 0xe1b   : > { %v3214_v32 = vmul.f32 0.7978846, %v3210_v33 }
 0xe1c   : > { %v5425_v34 = vpop.eup %5424  ;;  %5428 = vtanh.f32 %v3211_v31  ;;  %v5386_v31 = vld [vmem:[%s6611_s18 + $0x1] ss:$0 sm:$0xff] }
 0xe1d   : > { %v5427_v35 = vpop.eup %5426  ;;  %v3220_v11 = vadd.f32 1.0, %v5425_v34  ;;  %5430 = vtanh.f32 %v3214_v32  ;;  %3734 = vmatpush.bf16.msra.mxu0 %v5336_v21 }
 0xe1e   : > { %v3221_v5 = vadd.f32 1.0, %v5427_v35  ;;  %v5387_v35 = vld [vmem:[%s6612_s19 + $0x1] ss:$0 sm:$0xff] }
 0xe1f   : > { %v3224_v39 = vmul.f32 %v3220_v11, %v3192_v36 }
 0xe20   : > { %v3225_v40 = vmul.f32 %v3221_v5, %v3193_v37  ;;  %v5333_v5 = vld [vmem:[%s6615_s22 + $0x10] sm:$0xff] }
 0xe21   : > { %v3228_v41 = vpack.c.bf16 %v3224_v39, %v3224_v39  ;;  %v5332_v39 = vld [vmem:[%s6615_s22 + $0x8] sm:$0xff] }
 0xe22   : > { %v5429_v42 = vpop.eup %5428  ;;  %v3229_v43 = vpack.c.bf16 %v3225_v40, %v3225_v40  ;;  %v5331_v40 = vld [vmem:[%s6615_s22] sm:$0xff] }
 0xe23   : > { %v5431_v44 = vpop.eup %5430  ;;  %3514 = vmatmul.bf16.vlgmr.msrb.gmra.mxu0 %v3228_v41  ;;  %v3219_v46 = vadd.f32 1.0, %v5429_v42  ;;  %v5388_v41 = vld [vmem:[%s6649_s0] ss:$0 sm:$0xff] }
 0xe24   : > { %3527 = vmatmul.bf16.vlgmr.msrb.gmra.mxu1 %v3229_v43  ;;  %v3222_v48 = vadd.f32 1.0, %v5431_v44 }
 0xe25   : > { %v3223_v49 = vmul.f32 %v3219_v46, %v3191_v45 }
 0xe26   : > { %v3226_v50 = vmul.f32 %v3222_v48, %v3194_v47  ;;  %v5389_v47 = vld [vmem:[%s6650_s3] ss:$0 sm:$0xff] }
 0xe27   : > { %v3227_v51 = vpack.c.bf16 %v3223_v49, %v3223_v49 }
 0xe28   : > { %v3230_v52 = vpack.c.bf16 %v3226_v50, %v3226_v50 }
 0xe29   : > { %3501 = vmatmul.bf16.vlgmr.msra.gmra.mxu3 %v3227_v51 }
 0xe2a   : > { %3540 = vmatmul.bf16.vlgmr.msra.gmra.mxu2 %v3230_v52 }
 0xea0   : > { %v3515_v53 = vpop.f32.mrf.mxu0 }
 0xea1   : > { %v3528_v54 = vpop.f32.mrf.mxu1 }
 0xea8   : > { %v3517_v55 = vpop.f32.mrf.mxu0 }
 0xea9   : > { %v3530_v56 = vpop.f32.mrf.mxu1 }
 0xeac   : > { %v3502_v58 = vpop.f32.mrf.mxu3 }
 0xead   : > { %v3503_v59 = vadd.f32 %v5385_v57, %v3502_v58  ;;  %v3541_v60 = vpop.f32.mrf.mxu2 }
 0xeaf   : > { %v3516_v61 = vadd.f32 %v3515_v53, %v3503_v59 }
 0xeb1   : > { %v3529_v62 = vadd.f32 %v3528_v54, %v3516_v61 }
 0xeb3   : > { %v3542_v63 = vadd.f32 %v3541_v60, %v3529_v62 }
 0xeb4   : > { %v3504_v1 = vpop.f32.mrf.mxu3 }
 0xeb5   : > { %v3545_v2 = vadd.f32 %v3542_v63, %v6512_v28  ;;  %v3543_v3 = vpop.f32.mrf.mxu2  ;;  %v5327_v28 = vld [vmem:[%s6613_s20 + $0x20] sm:$0xff] }
 0xeb6   : > { %3652 = vmatpush.bf16.msrb.mxu3 %v5327_v28 }
 0xeb7   : > { %3550 = vadd.xlane.f32.xlu1 %v3545_v2  ;;  %v3553_v4 = vmul.f32 %v3545_v2, %v3545_v2 }
 0xeb9   : > { %3554 = vadd.xlane.f32.xlu2 %v3553_v4 }
 0xeba   : > { %3653 = vmatpush.bf16.msrb.mxu3 %v5326_v8 }
 0xebe   : > { %3654 = vmatpush.bf16.msrb.mxu3 %v5325_v9 }
 0xec2   : > { %3655 = vmatpush.bf16.msrb.mxu3 %v5324_v10 }
 0xec6   : > { %3656 = vmatpush.bf16.msrb.mxu3 %v5323_v13 }
 0xf2a   : > { %v3551_v12 = vpop.xlane.xlu1 %3550 }
 0xf2b   : > { %v3552_v14 = vmul.f32 %v3551_v12, %v5725_v38 }
 0xf2c   : > { %v3555_v15 = vpop.xlane.xlu2 %3554 }
 0xf2d   : > { %v3557_v16 = vmul.f32 %v3552_v14, %v3552_v14  ;;  %v3556_v17 = vmul.f32 %v3555_v15, %v5725_v38  ;;  %v5335_v38 = vld [vmem:[%s6615_s22 + $0x20] sm:$0xff]  ;;  %v3559_v33 = vsub.f32 %v3545_v2, %v3552_v14 }
 0xf2e   : > { %3735 = vmatpush.bf16.msra.mxu0 %v5335_v38 }
 0xf2f   : > { %v3558_v18 = vsub.f32 %v3556_v17, %v3557_v16 }
 0xf31   : > { %v3560_v20 = vadd.f32 1e-12, %v3558_v18 }
 0xf32   : > { %3736 = vmatpush.bf16.msra.mxu0 %v5334_v24 }
 0xf33   : > { %5432 = vrsqrt.f32 %v3560_v20  ;;  %vm3567_vm1 = vweird.f32 %v3560_v20 }
 0xf36   : > { %3737 = vmatpush.bf16.msra.mxu0 %v5333_v5 }
 0xf39   : > { %v5433_v22 = vpop.eup %5432 }
 0xf3a   : > { %v3562_v23 = vmul.f32 %v5433_v22, %v3560_v20  ;;  %vm3568_vm0 = vweird.f32 %v5433_v22  ;;  %3738 = vmatpush.bf16.msra.mxu0 %v5332_v39 }
 0xf3b   : > { %vm3569_vm2 = vmor %vm3567_vm1, %vm3568_vm0 }
 0xf3c   : > { %v3563_v25 = vmul.f32 %v5433_v22, %v3562_v23 }
 0xf3e   : > { %v3564_v26 = vmul.f32 0.5, %v3563_v25  ;;  %3739 = vmatpush.bf16.msra.mxu0 %v5331_v40 }
 0xf40   : > { %v3565_v27 = vsub.f32 1.5, %v3564_v26 }
 0xf42   : > { %v3566_v29 = vmul.f32 %v5433_v22, %v3565_v27 }
 0xf44   : > { %v3570_v32 = vsel %vm3569_vm2, %v5433_v22, %v3566_v29 }
 0xf45   : > { %v3571_v34 = vmul.f32 %v3570_v32, %v3559_v33 }
 0xf47   : > { %v3575_v36 = vmul.f32 %v5386_v31, %v3571_v34 }
 0xf49   : > { %v3579_v11 = vadd.f32 %v5387_v35, %v3575_v36 }
 0xf4b   : > { %v3580_v37 = vpack.c.bf16 %v3579_v11, %v3579_v11 }
 0xf4d   : > { %3657 = vmatmul.bf16.vlgmr.msrb.gmra.mxu3 %v3580_v37 }
 0xfd0   : > { %v3658_v42 = vpop.f32.mrf.mxu3 }
 0xfd1   : > { %v3659_v43 = vadd.f32 %v5388_v41, %v3658_v42 }
 0xfd3   : > { %5434 = vtanh.f32 %v3659_v43 }
 0xfd8   : > { %v3660_v44 = vpop.f32.mrf.mxu3 }
 0xfd9   : > { %v5435_v45 = vpop.eup %5434 }
 0xfda   : > { %v3663_v46 = vpack.c.bf16 %v5435_v45, %v5435_v45 }
 0xfdc   : > { %3740 = vmatmul.bf16.vlgmr.msra.gmra.mxu0 %v3663_v46 }
0x1059   : > { %v3741_v48 = vpop.f32.mrf.mxu0 }
0x105a   : > { %v3742_v49 = vadd.f32 %v5389_v47, %v3741_v48 }
0x105c   : > { %3745 = vst [vmem:[%s763_s24] sm:$0xff] %v3742_v49 }
0x1061   : > { %v3743_v50 = vpop.f32.mrf.mxu0 }
0x1062 PF: > { %s6653_s30 = sld [smem:[#allocation5_spill]] }
0x1068   : > { %s35_s5 = sadd.s32 1, %s6653_s30  }
0x1069   : > { %p32_p7 = scmp.ge.s32.totalorder %s35_s5, 4  }
0x106b   :  { %34 = sbr.rel (!%p32_p7) target bundleno = 15 (0xf), region = 184 }
0x1070   :  { %3765 = vsyncpa [#allocation3], 1 }
0x1071   :  { %3767 = vsyncpa [#allocation3 + $0x1], 1 }

</bundles_post_ra>
